<compile_context>
chip_gen: v5e
topology: v5e:2x2
jax: 0.10.0
libtpu: 0.0.40
codegen_flags: <defaults>
</compile_context>

<pallas_src>
import numpy as np

import jax
import jax.numpy as jnp
from jax import lax
from jax.experimental import pallas as pl
from jax.experimental.pallas import tpu as pltpu

EPS = 1e-5
NEG_SLOPE = 0.01


def _leaky(v):
    return jnp.maximum(v, NEG_SLOPE * v)


# ----------------------------------------------------------------------------
# Pallas kernel: whole forward pass, single grid-less invocation, everything in
# VMEM (total residency ~1.5 MiB, far below v5e/v6e 128 MiB and v7x 64 MiB).
# ----------------------------------------------------------------------------
def exnet_kernel(cin_ref, dat_ref, wconv_ref, wcx_ref, wbr_ref, wsmall_ref,
                 chan5_ref, chan5t_ref, blk_ref, blkt_ref, vecs_ref, out_ref):
    B = cin_ref.shape[0]
    C5 = wcx_ref.shape[1]          # 5 * in_channels
    C = C5 // 5
    G = chan5_ref.shape[1]         # 80 BatchNorm2d stat groups (sample, conv, channel)
    C2, C6 = 2 * C, 6 * C
    NC = out_ref.shape[1]
    SEG = dat_ref.shape[1] // 3    # 128-aligned lane segment width inside dat
    inv_n = 1.0 / float(B * C)

    def mm(a, b):
        # Main GEMMs: bf16 operands (weights pre-cast host-side), f32 accumulation.
        return jnp.dot(a.astype(jnp.bfloat16), b, preferred_element_type=jnp.float32)

    def mm_sel(a, sel):
        # Near-f32-exact matmul against an exactly-bf16-representable 0/1 selector:
        # split the f32 operand into hi+lo bf16 halves stacked along the tiny M
        # axis -> a single one-pass bf16 MXU matmul (replaces HIGHEST multi-pass).
        hi = a.astype(jnp.bfloat16)
        lo = (a - hi.astype(jnp.float32)).astype(jnp.bfloat16)
        r = jnp.dot(jnp.concatenate([hi, lo], axis=0), sel,
                    preferred_element_type=jnp.float32)
        n = a.shape[0]
        return r[:n] + r[n:]

    def bn_feat(h, g, e):
        # BatchNorm1d, training-mode batch statistics (f32, per-lane = per-feature).
        m = jnp.mean(h, axis=0, keepdims=True)
        cen = h - m
        var = jnp.mean(cen * cen, axis=0, keepdims=True)
        return cen * (g * lax.rsqrt(var + EPS)) + e

    # ---- conv branch: c1|c2 over all 5 y-samples, samples living in lanes -------
    convz = jnp.dot(cin_ref[...], wconv_ref[...],
                    preferred_element_type=jnp.float32)            # (B, 80C)

    # BatchNorm2d(8): stats per (sample, conv, channel) group = C consecutive
    # lanes x B rows.  Row-sum on the XLU, lane-group reduce/broadcast via two
    # selector matmuls; gamma folded into one scale, one-pass mean/E[z^2].
    s1 = jnp.sum(convz, axis=0, keepdims=True)
    s2 = jnp.sum(convz * convz, axis=0, keepdims=True)
    stats = mm_sel(jnp.concatenate([s1, s2], axis=0), chan5_ref[...]) * inv_n   # (2, G)
    m_g = stats[0:1]
    var_g = stats[1:2] - m_g * m_g
    scl_g = vecs_ref[0:1, 0:G] * lax.rsqrt(var_g + EPS)            # gamma / sqrt(var+eps)
    off_g = vecs_ref[1:2, 0:G] - m_g * scl_g                       # beta - mean*scale
    full = mm_sel(jnp.concatenate([scl_g, off_g], axis=0), chan5t_ref[...])     # (2, 80C)
    act = _leaky(convz * full[0:1] + full[1:2])

    # cx Linear (block-diagonal over samples): x1 features emerge directly as (B, 5C).
    x1c = mm(act, wcx_ref[...]) + vecs_ref[2:3, 0:C5]

    # ---- x2 / x3 features --------------------------------------------------------
    xr = dat_ref[:, 0:C5]                      # x tiled 5x along lanes
    yf = dat_ref[:, SEG:SEG + C5]              # y flattened
    pse = dat_ref[:, 2 * SEG:2 * SEG + C5]     # [p|s|zs] zero-padded to 5C lanes
    x2c = yf - xr
    xs = xr[:, 0:C]
    xn2 = jnp.sum(xs * xs, axis=1, keepdims=True)                  # |x|^2 computed once
    yn2 = mm_sel(yf * yf, blk_ref[...])                            # cols 0..4 = |y_i|^2
    inv_nrm = lax.rsqrt(xn2 * yn2)                                 # EUP rsqrt, no divides
    x3c = (xr * yf) * mm_sel(inv_nrm, blkt_ref[...])               # (B, 5C)

    # ---- six Linear->BN->LeakyReLU branches: ONE block-diagonal matmul ----------
    feat = jnp.concatenate([x1c, x2c, x3c, pse], axis=1)           # (B, 4*5C)
    h = mm(feat, wbr_ref[...]) + vecs_ref[3:4, 0:C6]
    nx = _leaky(bn_feat(h, vecs_ref[4:5, 0:C6], vecs_ref[5:6, 0:C6]))

    # ---- head: fc -> lrelu -> bn7 -> fc2 -> lrelu -> out -------------------------
    ui = bn_feat(_leaky(mm(nx, wsmall_ref[0:C6, 0:C2]) + vecs_ref[6:7, 0:C2]),
                 vecs_ref[7:8, 0:C2], vecs_ref[8:9, 0:C2])
    h2 = _leaky(mm(ui, wsmall_ref[C6:8 * C, 0:C]) + vecs_ref[9:10, 0:C])
    out_ref[...] = mm(h2, wsmall_ref[8 * C:9 * C, 0:NC]) + vecs_ref[10:11, 0:NC]


# ----------------------------------------------------------------------------
# One-time host-side parameter packing (numpy -> a few bf16/f32 device slabs).
# Nothing in here runs on the per-inference path.
# ----------------------------------------------------------------------------
def prepare_params(P, C, n_classes):
    Pn = {k: np.asarray(v, np.float32) for k, v in P.items()}
    HW = C + 4                    # shared pad-2 row width
    BLK = 2 * HW                  # per-sample conv-input width ([x_pad | y_pad])
    KPAD = ((5 * BLK + 255) // 256) * 256
    OC = 16 * C                   # conv output lanes per sample
    G = 5 * 16                    # BN2d stat groups
    C5, C6, C2 = 5 * C, 6 * C, 2 * C

    def banded(W, shift):
        # Lower a (O,1,2,KW) Conv2d weight to a banded (2*HW, O*C) matrix so the
        # conv over a [x_pad | y_pad] lane block becomes a plain matmul.
        O, _, KH, KW = W.shape
        out = np.zeros((KH * HW, O * C), np.float32)
        for o in range(O):
            for kh in range(KH):
                for kw in range(KW):
                    for c in range(C):
                        out[kh * HW + c + kw + shift, o * C + c] += W[o, 0, kh, kw]
        return out

    band = np.concatenate([banded(Pn["W1"], 0), banded(Pn["W2"], 1)], axis=1)  # (BLK, 16C)

    wconv = np.zeros((KPAD, 5 * OC), np.float32)        # block-diag conv weight
    wcx = np.zeros((5 * OC, C5), np.float32)            # block-diag cx weight
    for i in range(5):
        wconv[i * BLK:(i + 1) * BLK, i * OC:(i + 1) * OC] = band
        wcx[i * OC:(i + 1) * OC, i * C:(i + 1) * C] = Pn["Wcx"].T

    wbr = np.zeros((4 * C5, C6), np.float32)            # block-diag l1..l6 weight
    blocks = [("Wl1", 0, C5), ("Wl2", C5, C5), ("Wl3", 2 * C5, C5),
              ("Wl4", 3 * C5, 15), ("Wl5", 3 * C5 + 15, 30), ("Wl6", 3 * C5 + 45, 30)]
    for j, (name, off, width) in enumerate(blocks):
        wbr[off:off + width, j * C:(j + 1) * C] = Pn[name].T

    wsmall = np.zeros((9 * C, 128), np.float32)         # fc | fc2 | out stacked
    wsmall[0:C6, 0:C2] = Pn["Wfc"].T
    wsmall[C6:8 * C, 0:C] = Pn["Wfc2"].T
    wsmall[8 * C:9 * C, 0:n_classes] = Pn["Wout"].T

    r = np.arange(5 * OC)
    chan5 = (r[:, None] // C == np.arange(G)[None, :]).astype(np.float32)   # (80C, 80)
    rr = np.arange(C5)
    blk = np.ones((C5, 16), np.float32)                  # cols 5..15 = 1 (harmless, avoids inf)
    blk[:, :5] = (rr[:, None] // C == np.arange(5)[None, :]).astype(np.float32)
    blkt = np.zeros((16, C5), np.float32)                # rows 5..15 = 0 (pad contributes nothing)
    blkt[:5] = blk[:, :5].T

    vecs = np.zeros((16, 128), np.float32)               # all 1-D params in one f32 slab
    vecs[0, 0:G] = np.tile(np.tile(Pn["gc"], 2), 5)      # gamma per (sample, conv, channel) group
    vecs[1, 0:G] = np.tile(np.tile(Pn["bc"], 2), 5)      # beta  per group
    vecs[2, 0:C5] = np.tile(Pn["bcx"], 5)
    vecs[3, 0:C6] = np.concatenate([Pn[f"bl{i}"] for i in range(1, 7)])
    vecs[4, 0:C6] = np.concatenate([Pn[f"g{i}"] for i in range(1, 7)])
    vecs[5, 0:C6] = np.concatenate([Pn[f"e{i}"] for i in range(1, 7)])
    vecs[6, 0:C2] = Pn["bfc"]
    vecs[7, 0:C2] = Pn["g7"]
    vecs[8, 0:C2] = Pn["e7"]
    vecs[9, 0:C] = Pn["bfc2"]
    vecs[10, 0:n_classes] = Pn["bout"]

    bf = lambda a: jnp.asarray(a, jnp.bfloat16)
    return {
        "wconv": bf(wconv), "wcx": bf(wcx), "wbr": bf(wbr), "wsmall": bf(wsmall),
        "chan5": bf(chan5), "chan5t": bf(chan5.T), "blk": bf(blk), "blkt": bf(blkt),
        "vecs": jnp.asarray(vecs, jnp.float32),
    }


# ----------------------------------------------------------------------------
# Wrapper: per-call, data-dependent layout only + pallas_call.
# ----------------------------------------------------------------------------
def exnet_pallas(x, y, p, s, zs, prep, n_classes):
    B, _, C = x.shape
    C5 = 5 * C
    SEG = ((C5 + 127) // 128) * 128
    KPAD = prep["wconv"].shape[0]

    x2d = x[:, 0, :]
    xpad = jnp.pad(x2d, ((0, 0), (2, 2)))
    ypad = jnp.pad(y, ((0, 0), (0, 0), (2, 2)))
    # conv input: per-sample lane block i = [x_pad | y_i_pad]; zero-pad to KPAD lanes.
    cin = jnp.concatenate(
        [jnp.concatenate([xpad, ypad[:, i]], axis=1) for i in range(5)], axis=1)
    cin = jnp.pad(cin, ((0, 0), (0, KPAD - cin.shape[1]))).astype(jnp.bfloat16)

    xr = jnp.tile(x2d, (1, 5))
    yf = y.reshape(B, C5)
    pse = jnp.concatenate([p.reshape(B, -1), s.reshape(B, -1), zs.reshape(B, -1)], axis=1)

    def seg(a):                                   # 128-aligned lane segments
        return jnp.pad(a, ((0, 0), (0, SEG - a.shape[1])))
    dat = jnp.concatenate([seg(xr), seg(yf), seg(pse)], axis=1).astype(jnp.float32)

    vm = pl.BlockSpec(memory_space=pltpu.MemorySpace.VMEM)
    # TODO(synk): for real batch sizes add a batch grid with >=128-row tiles and
    # dimension_semantics=("parallel",) so both v7x TensorCores are used; re-derive
    # tile sizes against v7x's 64 MiB VMEM (BlockSpec double-buffers each input).
    return pl.pallas_call(
        exnet_kernel,
        out_shape=jax.ShapeDtypeStruct((B, n_classes), jnp.float32),
        in_specs=[vm] * 11,
        out_specs=vm,
    )(cin, dat, prep["wconv"], prep["wcx"], prep["wbr"], prep["wsmall"],
      prep["chan5"], prep["chan5t"], prep["blk"], prep["blkt"], prep["vecs"])


# ----------------------------------------------------------------------------
# Pure-JAX reference of the exact PyTorch forward (training-mode BatchNorm).
# mm_dtype controls matmul-operand rounding so the same function acts as the f32
# ground truth and as a "same rounding policy as the kernel" structural check.
# ----------------------------------------------------------------------------
def reference_forward(x, y, p, s, zs, P, mm_dtype=jnp.float32):
    B, _, C = x.shape
    prec = lax.Precision.HIGHEST if mm_dtype == jnp.float32 else lax.Precision.DEFAULT

    def dot(a, b):
        return jnp.dot(a.astype(mm_dtype), b.astype(mm_dtype), precision=prec,
                       preferred_element_type=jnp.float32)

    def conv(inp, W, pad):
        return lax.conv_general_dilated(
            inp.astype(mm_dtype), W.astype(mm_dtype), (1, 1), ((0, 0), (pad, pad)),
            dimension_numbers=("NCHW", "OIHW", "NCHW"),
            preferred_element_type=jnp.float32, precision=prec)

    def bn(v, g, e, axes):
        m = v.mean(axis=axes, keepdims=True)
        var = ((v - m) ** 2).mean(axis=axes, keepdims=True)
        return (v - m) / jnp.sqrt(var + EPS) * g + e

    def conv_branch(x0):                                      # x0: (B, 2, C)
        inp = x0[:, None, :, :]
        c1o = conv(inp, P["W1"], 2)
        c2o = conv(inp, P["W2"], 1)
        gcb = P["gc"].reshape(1, 8, 1, 1)
        bcb = P["bc"].reshape(1, 8, 1, 1)
        a = jnp.concatenate([_leaky(bn(c1o, gcb, bcb, (0, 2, 3))),
                             _leaky(bn(c2o, gcb, bcb, (0, 2, 3)))], axis=1)
        return dot(a.reshape(B, -1), P["Wcx"].T) + P["bcx"]

    x0s = [conv_branch(jnp.concatenate([x, y[:, i:i + 1, :]], axis=1)) for i in range(5)]
    x1 = jnp.concatenate(x0s, axis=1)
    x2 = (y - x).reshape(B, -1)
    xx = jnp.sqrt((x * x).sum(2))
    yy = jnp.sqrt((y * y).sum(2))
    x3 = ((x * y) / (xx * yy)[..., None]).reshape(B, -1)
    x4 = p.reshape(B, -1)
    x5 = s.reshape(B, -1)
    x6 = zs.reshape(B, -1)

    def lbl(v, W, b, g, e):
        h = dot(v, W.T) + b
        return _leaky(bn(h, g[None, :], e[None, :], (0,)))

    x1 = lbl(x1, P["Wl1"], P["bl1"], P["g1"], P["e1"])
    x2 = lbl(x2, P["Wl2"], P["bl2"], P["g2"], P["e2"])
    x3 = lbl(x3, P["Wl3"], P["bl3"], P["g3"], P["e3"])
    x4 = lbl(x4, P["Wl4"], P["bl4"], P["g4"], P["e4"])
    x5 = lbl(x5, P["Wl5"], P["bl5"], P["g5"], P["e5"])
    x6 = lbl(x6, P["Wl6"], P["bl6"], P["g6"], P["e6"])
    nx = jnp.concatenate([x1, x2, x3, x4, x5, x6], axis=1)
    ui = bn(_leaky(dot(nx, P["Wfc"].T) + P["bfc"]), P["g7"][None, :], P["e7"][None, :], (0,))
    nx = _leaky(dot(ui, P["Wfc2"].T) + P["bfc2"])
    return dot(nx, P["Wout"].T) + P["bout"]


# ----------------------------------------------------------------------------
# Deterministic synthetic parameters (PyTorch weight-shape conventions).
# ----------------------------------------------------------------------------
def init_params(C, n_classes, seed=42):
    keys = iter(jax.random.split(jax.random.PRNGKey(seed), 64))

    def w(shape, fan_in):
        return jax.random.normal(next(keys), shape, jnp.float32) / (fan_in ** 0.5)

    def b(shape, scale=0.1):
        return scale * jax.random.normal(next(keys), shape, jnp.float32)

    def g(shape):
        return 1.0 + 0.1 * jax.random.normal(next(keys), shape, jnp.float32)

    return {
        "W1": w((8, 1, 2, 5), 10), "W2": w((8, 1, 2, 3), 6),
        "gc": g((8,)), "bc": b((8,)),
        "Wcx": w((C, 16 * C), 16 * C), "bcx": b((C,)),
        "Wl1": w((C, 5 * C), 5 * C), "bl1": b((C,)),
        "Wl2": w((C, 5 * C), 5 * C), "bl2": b((C,)),
        "Wl3": w((C, 5 * C), 5 * C), "bl3": b((C,)),
        "Wl4": w((C, 15), 15), "bl4": b((C,)),
        "Wl5": w((C, 30), 30), "bl5": b((C,)),
        "Wl6": w((C, 30), 30), "bl6": b((C,)),
        "g1": g((C,)), "e1": b((C,)),
        "g2": g((C,)), "e2": b((C,)),
        "g3": g((C,)), "e3": b((C,)),
        "g4": g((C,)), "e4": b((C,)),
        "g5": g((C,)), "e5": b((C,)),
        "g6": g((C,)), "e6": b((C,)),
        "g7": g((2 * C,)), "e7": b((2 * C,)),
        "Wfc": w((2 * C, 6 * C), 6 * C), "bfc": b((2 * C,)),
        "Wfc2": w((C, 2 * C), 2 * C), "bfc2": b((C,)),
        "Wout": w((n_classes, C), C), "bout": b((n_classes,)),
    }


if __name__ == "__main__":
    B, C, NC = 8, 16, 4   # batch, in_channels, n_classes
    kx, ky, kp, ks, kz = jax.random.split(jax.random.PRNGKey(0), 5)
    x = jax.random.normal(kx, (B, 1, C), jnp.float32)
    y = jax.random.normal(ky, (B, 5, C), jnp.float32)
    p = jax.random.normal(kp, (B, 5, 3), jnp.float32)
    s = jax.random.normal(ks, (B, 5, 6), jnp.float32)
    zs = jax.random.normal(kz, (B, 5, 6), jnp.float32)
    params = init_params(C, NC)

    prep = prepare_params(params, C, NC)              # one-time, cached, host-side
    fwd = jax.jit(exnet_pallas, static_argnums=(6,))
    out = jax.block_until_ready(fwd(x, y, p, s, zs, prep, NC))

    # Structural check: same forward math with the kernel's matmul rounding policy
    # (bf16 operands, f32 accumulation).
    ref_b = jax.block_until_ready(
        reference_forward(x, y, p, s, zs, params, mm_dtype=jnp.bfloat16))
    # Numerics sanity bound vs full-f32 math (bf16 MXU rounding amplified by the
    # small-batch BatchNorms is expected to land around 1e-1 here).
    ref_f = jax.block_until_ready(
        reference_forward(x, y, p, s, zs, params, mm_dtype=jnp.float32))

    assert out.shape == (B, NC) and out.dtype == jnp.float32
    err_struct = float(jnp.max(jnp.abs(out - ref_b)))
    err_f32 = float(jnp.max(jnp.abs(out - ref_f)))
    if not (bool(jnp.all(jnp.isfinite(out))) and err_struct < 3e-2 and err_f32 < 3e-1):
        raise SystemExit(f"mismatch: struct_err={err_struct} f32_err={err_f32}")
    print("KERNEL_OK")
</pallas_src>

<mosaic_0001>
module attributes {stable_mosaic.version = 11 : i64} {
  func.func @exnet_kernel(%arg0: memref<8x256xbf16, #tpu.memory_space<vmem>>, %arg1: memref<8x384xf32, #tpu.memory_space<vmem>>, %arg2: memref<256x1280xbf16, #tpu.memory_space<vmem>>, %arg3: memref<1280x80xbf16, #tpu.memory_space<vmem>>, %arg4: memref<320x96xbf16, #tpu.memory_space<vmem>>, %arg5: memref<144x128xbf16, #tpu.memory_space<vmem>>, %arg6: memref<1280x80xbf16, #tpu.memory_space<vmem>>, %arg7: memref<80x1280xbf16, #tpu.memory_space<vmem>>, %arg8: memref<80x16xbf16, #tpu.memory_space<vmem>>, %arg9: memref<16x80xbf16, #tpu.memory_space<vmem>>, %arg10: memref<16x128xf32, #tpu.memory_space<vmem>>, %arg11: memref<8x4xf32, #tpu.memory_space<vmem>>) attributes {dimension_semantics = [], scalar_prefetch = 0 : i64, scratch_operands = 0 : i64, tpu.core_type = #tpu.core_type<tc>} {
    %c0 = arith.constant 0 : index
    %c0_0 = arith.constant 0 : index
    %0 = vector.load %arg0[%c0, %c0_0] : memref<8x256xbf16, #tpu.memory_space<vmem>>, vector<8x256xbf16>
    %c0_1 = arith.constant 0 : index
    %c0_2 = arith.constant 0 : index
    %1 = vector.load %arg2[%c0_1, %c0_2] : memref<256x1280xbf16, #tpu.memory_space<vmem>>, vector<256x1280xbf16>
    %cst = arith.constant dense<0.000000e+00> : vector<8x1280xf32>
    %2 = tpu.matmul %0, %1, %cst {dimension_numbers = #tpu.dot_dimension_numbers<[1], [0], [0], [1], [0, 0, 1, 1], [], []>} : vector<8x256xbf16>, vector<256x1280xbf16>, vector<8x1280xf32> -> vector<8x1280xf32>
    %cst_3 = arith.constant dense<0.000000e+00> : vector<1280xf32>
    %3 = vector.multi_reduction <add>, %2, %cst_3 [0] : vector<8x1280xf32> to vector<1280xf32>
    %4 = vector.shape_cast %3 : vector<1280xf32> to vector<1x1280xf32>
    %5 = arith.mulf %2, %2 : vector<8x1280xf32>
    %cst_4 = arith.constant dense<0.000000e+00> : vector<1280xf32>
    %6 = vector.multi_reduction <add>, %5, %cst_4 [0] : vector<8x1280xf32> to vector<1280xf32>
    %7 = vector.shape_cast %6 : vector<1280xf32> to vector<1x1280xf32>
    %8 = tpu.concatenate %4, %7 in 0 : vector<1x1280xf32>, vector<1x1280xf32> -> vector<2x1280xf32>
    %c0_5 = arith.constant 0 : index
    %c0_6 = arith.constant 0 : index
    %9 = vector.load %arg6[%c0_5, %c0_6] : memref<1280x80xbf16, #tpu.memory_space<vmem>>, vector<1280x80xbf16>
    %10 = arith.truncf %8 : vector<2x1280xf32> to vector<2x1280xbf16>
    %11 = arith.extf %10 : vector<2x1280xbf16> to vector<2x1280xf32>
    %12 = arith.subf %8, %11 : vector<2x1280xf32>
    %13 = arith.truncf %12 : vector<2x1280xf32> to vector<2x1280xbf16>
    %14 = tpu.concatenate %10, %13 in 0 : vector<2x1280xbf16>, vector<2x1280xbf16> -> vector<4x1280xbf16>
    %cst_7 = arith.constant dense<0.000000e+00> : vector<4x80xf32>
    %15 = tpu.matmul %14, %9, %cst_7 {dimension_numbers = #tpu.dot_dimension_numbers<[1], [0], [0], [1], [0, 0, 1, 1], [], []>} : vector<4x1280xbf16>, vector<1280x80xbf16>, vector<4x80xf32> -> vector<4x80xf32>
    %16 = vector.extract_strided_slice %15 {offsets = [0, 0], sizes = [2, 80], strides = [1, 1]} : vector<4x80xf32> to vector<2x80xf32>
    %17 = vector.extract_strided_slice %15 {offsets = [2, 0], sizes = [2, 80], strides = [1, 1]} : vector<4x80xf32> to vector<2x80xf32>
    %18 = arith.addf %16, %17 : vector<2x80xf32>
    %cst_8 = arith.constant 7.812500e-03 : f32
    %19 = vector.broadcast %cst_8 : f32 to vector<2x80xf32>
    %20 = arith.mulf %18, %19 : vector<2x80xf32>
    %21 = vector.extract_strided_slice %20 {offsets = [0, 0], sizes = [1, 80], strides = [1, 1]} : vector<2x80xf32> to vector<1x80xf32>
    %22 = vector.extract_strided_slice %20 {offsets = [1, 0], sizes = [1, 80], strides = [1, 1]} : vector<2x80xf32> to vector<1x80xf32>
    %23 = arith.mulf %21, %21 : vector<1x80xf32>
    %24 = arith.subf %22, %23 : vector<1x80xf32>
    %c0_9 = arith.constant 0 : index
    %c0_10 = arith.constant 0 : index
    %25 = vector.load %arg10[%c0_9, %c0_10] : memref<16x128xf32, #tpu.memory_space<vmem>>, vector<1x80xf32>
    %cst_11 = arith.constant 9.99999974E-6 : f32
    %26 = vector.broadcast %cst_11 : f32 to vector<1x80xf32>
    %27 = arith.addf %24, %26 : vector<1x80xf32>
    %28 = math.rsqrt %27 : vector<1x80xf32>
    %29 = arith.mulf %25, %28 : vector<1x80xf32>
    %c1 = arith.constant 1 : index
    %c0_12 = arith.constant 0 : index
    %30 = vector.load %arg10[%c1, %c0_12] : memref<16x128xf32, #tpu.memory_space<vmem>>, vector<1x80xf32>
    %31 = arith.mulf %21, %29 : vector<1x80xf32>
    %32 = arith.subf %30, %31 : vector<1x80xf32>
    %33 = tpu.concatenate %29, %32 in 0 : vector<1x80xf32>, vector<1x80xf32> -> vector<2x80xf32>
    %c0_13 = arith.constant 0 : index
    %c0_14 = arith.constant 0 : index
    %34 = vector.load %arg7[%c0_13, %c0_14] : memref<80x1280xbf16, #tpu.memory_space<vmem>>, vector<80x1280xbf16>
    %35 = arith.truncf %33 : vector<2x80xf32> to vector<2x80xbf16>
    %36 = arith.extf %35 : vector<2x80xbf16> to vector<2x80xf32>
    %37 = arith.subf %33, %36 : vector<2x80xf32>
    %38 = arith.truncf %37 : vector<2x80xf32> to vector<2x80xbf16>
    %39 = tpu.concatenate %35, %38 in 0 : vector<2x80xbf16>, vector<2x80xbf16> -> vector<4x80xbf16>
    %cst_15 = arith.constant dense<0.000000e+00> : vector<4x1280xf32>
    %40 = tpu.matmul %39, %34, %cst_15 {dimension_numbers = #tpu.dot_dimension_numbers<[1], [0], [0], [1], [0, 0, 1, 1], [], []>} : vector<4x80xbf16>, vector<80x1280xbf16>, vector<4x1280xf32> -> vector<4x1280xf32>
    %41 = vector.extract_strided_slice %40 {offsets = [0, 0], sizes = [2, 1280], strides = [1, 1]} : vector<4x1280xf32> to vector<2x1280xf32>
    %42 = vector.extract_strided_slice %40 {offsets = [2, 0], sizes = [2, 1280], strides = [1, 1]} : vector<4x1280xf32> to vector<2x1280xf32>
    %43 = arith.addf %41, %42 : vector<2x1280xf32>
    %44 = vector.extract_strided_slice %43 {offsets = [0, 0], sizes = [1, 1280], strides = [1, 1]} : vector<2x1280xf32> to vector<1x1280xf32>
    %45 = vector.broadcast %44 : vector<1x1280xf32> to vector<8x1280xf32>
    %46 = arith.mulf %2, %45 : vector<8x1280xf32>
    %47 = vector.extract_strided_slice %43 {offsets = [1, 0], sizes = [1, 1280], strides = [1, 1]} : vector<2x1280xf32> to vector<1x1280xf32>
    %48 = vector.broadcast %47 : vector<1x1280xf32> to vector<8x1280xf32>
    %49 = arith.addf %46, %48 : vector<8x1280xf32>
    %cst_16 = arith.constant 0.00999999977 : f32
    %50 = vector.broadcast %cst_16 : f32 to vector<8x1280xf32>
    %51 = arith.mulf %50, %49 : vector<8x1280xf32>
    %52 = arith.maximumf %49, %51 : vector<8x1280xf32>
    %c0_17 = arith.constant 0 : index
    %c0_18 = arith.constant 0 : index
    %53 = vector.load %arg3[%c0_17, %c0_18] : memref<1280x80xbf16, #tpu.memory_space<vmem>>, vector<1280x80xbf16>
    %54 = arith.truncf %52 : vector<8x1280xf32> to vector<8x1280xbf16>
    %cst_19 = arith.constant dense<0.000000e+00> : vector<8x80xf32>
    %55 = tpu.matmul %54, %53, %cst_19 {dimension_numbers = #tpu.dot_dimension_numbers<[1], [0], [0], [1], [0, 0, 1, 1], [], []>} : vector<8x1280xbf16>, vector<1280x80xbf16>, vector<8x80xf32> -> vector<8x80xf32>
    %c2 = arith.constant 2 : index
    %c0_20 = arith.constant 0 : index
    %56 = vector.load %arg10[%c2, %c0_20] : memref<16x128xf32, #tpu.memory_space<vmem>>, vector<1x80xf32>
    %57 = vector.broadcast %56 : vector<1x80xf32> to vector<8x80xf32>
    %58 = arith.addf %55, %57 : vector<8x80xf32>
    %c0_21 = arith.constant 0 : index
    %c0_22 = arith.constant 0 : index
    %59 = vector.load %arg1[%c0_21, %c0_22] : memref<8x384xf32, #tpu.memory_space<vmem>>, vector<8x80xf32>
    %c0_23 = arith.constant 0 : index
    %c128 = arith.constant 128 : index
    %60 = vector.load %arg1[%c0_23, %c128] : memref<8x384xf32, #tpu.memory_space<vmem>>, vector<8x80xf32>
    %c0_24 = arith.constant 0 : index
    %c256 = arith.constant 256 : index
    %61 = vector.load %arg1[%c0_24, %c256] : memref<8x384xf32, #tpu.memory_space<vmem>>, vector<8x80xf32>
    %62 = arith.subf %60, %59 : vector<8x80xf32>
    %63 = vector.extract_strided_slice %59 {offsets = [0, 0], sizes = [8, 16], strides = [1, 1]} : vector<8x80xf32> to vector<8x16xf32>
    %64 = arith.mulf %63, %63 : vector<8x16xf32>
    %cst_25 = arith.constant dense<0.000000e+00> : vector<8xf32>
    %65 = vector.multi_reduction <add>, %64, %cst_25 [1] : vector<8x16xf32> to vector<8xf32>
    %66 = vector.shape_cast %65 : vector<8xf32> to vector<8x1xf32>
    %67 = arith.mulf %60, %60 : vector<8x80xf32>
    %c0_26 = arith.constant 0 : index
    %c0_27 = arith.constant 0 : index
    %68 = vector.load %arg8[%c0_26, %c0_27] : memref<80x16xbf16, #tpu.memory_space<vmem>>, vector<80x16xbf16>
    %69 = arith.truncf %67 : vector<8x80xf32> to vector<8x80xbf16>
    %70 = arith.extf %69 : vector<8x80xbf16> to vector<8x80xf32>
    %71 = arith.subf %67, %70 : vector<8x80xf32>
    %72 = arith.truncf %71 : vector<8x80xf32> to vector<8x80xbf16>
    %73 = tpu.concatenate %69, %72 in 0 : vector<8x80xbf16>, vector<8x80xbf16> -> vector<16x80xbf16>
    %cst_28 = arith.constant dense<0.000000e+00> : vector<16x16xf32>
    %74 = tpu.matmul %73, %68, %cst_28 {dimension_numbers = #tpu.dot_dimension_numbers<[1], [0], [0], [1], [0, 0, 1, 1], [], []>} : vector<16x80xbf16>, vector<80x16xbf16>, vector<16x16xf32> -> vector<16x16xf32>
    %75 = vector.extract_strided_slice %74 {offsets = [0, 0], sizes = [8, 16], strides = [1, 1]} : vector<16x16xf32> to vector<8x16xf32>
    %76 = vector.extract_strided_slice %74 {offsets = [8, 0], sizes = [8, 16], strides = [1, 1]} : vector<16x16xf32> to vector<8x16xf32>
    %77 = arith.addf %75, %76 : vector<8x16xf32>
    %78 = vector.broadcast %66 : vector<8x1xf32> to vector<8x16xf32>
    %79 = arith.mulf %78, %77 : vector<8x16xf32>
    %80 = math.rsqrt %79 : vector<8x16xf32>
    %81 = arith.mulf %59, %60 : vector<8x80xf32>
    %c0_29 = arith.constant 0 : index
    %c0_30 = arith.constant 0 : index
    %82 = vector.load %arg9[%c0_29, %c0_30] : memref<16x80xbf16, #tpu.memory_space<vmem>>, vector<16x80xbf16>
    %83 = arith.truncf %80 : vector<8x16xf32> to vector<8x16xbf16>
    %84 = arith.extf %83 : vector<8x16xbf16> to vector<8x16xf32>
    %85 = arith.subf %80, %84 : vector<8x16xf32>
    %86 = arith.truncf %85 : vector<8x16xf32> to vector<8x16xbf16>
    %87 = tpu.concatenate %83, %86 in 0 : vector<8x16xbf16>, vector<8x16xbf16> -> vector<16x16xbf16>
    %cst_31 = arith.constant dense<0.000000e+00> : vector<16x80xf32>
    %88 = tpu.matmul %87, %82, %cst_31 {dimension_numbers = #tpu.dot_dimension_numbers<[1], [0], [0], [1], [0, 0, 1, 1], [], []>} : vector<16x16xbf16>, vector<16x80xbf16>, vector<16x80xf32> -> vector<16x80xf32>
    %89 = vector.extract_strided_slice %88 {offsets = [0, 0], sizes = [8, 80], strides = [1, 1]} : vector<16x80xf32> to vector<8x80xf32>
    %90 = vector.extract_strided_slice %88 {offsets = [8, 0], sizes = [8, 80], strides = [1, 1]} : vector<16x80xf32> to vector<8x80xf32>
    %91 = arith.addf %89, %90 : vector<8x80xf32>
    %92 = arith.mulf %81, %91 : vector<8x80xf32>
    %93 = tpu.concatenate %58, %62, %92, %61 in 1 : vector<8x80xf32>, vector<8x80xf32>, vector<8x80xf32>, vector<8x80xf32> -> vector<8x320xf32>
    %c0_32 = arith.constant 0 : index
    %c0_33 = arith.constant 0 : index
    %94 = vector.load %arg4[%c0_32, %c0_33] : memref<320x96xbf16, #tpu.memory_space<vmem>>, vector<320x96xbf16>
    %95 = arith.truncf %93 : vector<8x320xf32> to vector<8x320xbf16>
    %cst_34 = arith.constant dense<0.000000e+00> : vector<8x96xf32>
    %96 = tpu.matmul %95, %94, %cst_34 {dimension_numbers = #tpu.dot_dimension_numbers<[1], [0], [0], [1], [0, 0, 1, 1], [], []>} : vector<8x320xbf16>, vector<320x96xbf16>, vector<8x96xf32> -> vector<8x96xf32>
    %c3 = arith.constant 3 : index
    %c0_35 = arith.constant 0 : index
    %97 = vector.load %arg10[%c3, %c0_35] : memref<16x128xf32, #tpu.memory_space<vmem>>, vector<1x96xf32>
    %98 = vector.broadcast %97 : vector<1x96xf32> to vector<8x96xf32>
    %99 = arith.addf %96, %98 : vector<8x96xf32>
    %c4 = arith.constant 4 : index
    %c0_36 = arith.constant 0 : index
    %100 = vector.load %arg10[%c4, %c0_36] : memref<16x128xf32, #tpu.memory_space<vmem>>, vector<1x96xf32>
    %c5 = arith.constant 5 : index
    %c0_37 = arith.constant 0 : index
    %101 = vector.load %arg10[%c5, %c0_37] : memref<16x128xf32, #tpu.memory_space<vmem>>, vector<1x96xf32>
    %cst_38 = arith.constant dense<0.000000e+00> : vector<96xf32>
    %102 = vector.multi_reduction <add>, %99, %cst_38 [0] : vector<8x96xf32> to vector<96xf32>
    %103 = vector.shape_cast %102 : vector<96xf32> to vector<1x96xf32>
    %cst_39 = arith.constant 8.000000e+00 : f32
    %104 = vector.broadcast %cst_39 : f32 to vector<1x96xf32>
    %105 = arith.divf %103, %104 : vector<1x96xf32>
    %106 = vector.broadcast %105 : vector<1x96xf32> to vector<8x96xf32>
    %107 = arith.subf %99, %106 : vector<8x96xf32>
    %108 = arith.mulf %107, %107 : vector<8x96xf32>
    %cst_40 = arith.constant dense<0.000000e+00> : vector<96xf32>
    %109 = vector.multi_reduction <add>, %108, %cst_40 [0] : vector<8x96xf32> to vector<96xf32>
    %110 = vector.shape_cast %109 : vector<96xf32> to vector<1x96xf32>
    %cst_41 = arith.constant 8.000000e+00 : f32
    %111 = vector.broadcast %cst_41 : f32 to vector<1x96xf32>
    %112 = arith.divf %110, %111 : vector<1x96xf32>
    %cst_42 = arith.constant 9.99999974E-6 : f32
    %113 = vector.broadcast %cst_42 : f32 to vector<1x96xf32>
    %114 = arith.addf %112, %113 : vector<1x96xf32>
    %115 = math.rsqrt %114 : vector<1x96xf32>
    %116 = arith.mulf %100, %115 : vector<1x96xf32>
    %117 = vector.broadcast %116 : vector<1x96xf32> to vector<8x96xf32>
    %118 = arith.mulf %107, %117 : vector<8x96xf32>
    %119 = vector.broadcast %101 : vector<1x96xf32> to vector<8x96xf32>
    %120 = arith.addf %118, %119 : vector<8x96xf32>
    %cst_43 = arith.constant 0.00999999977 : f32
    %121 = vector.broadcast %cst_43 : f32 to vector<8x96xf32>
    %122 = arith.mulf %121, %120 : vector<8x96xf32>
    %123 = arith.maximumf %120, %122 : vector<8x96xf32>
    %c0_44 = arith.constant 0 : index
    %c0_45 = arith.constant 0 : index
    %124 = vector.load %arg5[%c0_44, %c0_45] : memref<144x128xbf16, #tpu.memory_space<vmem>>, vector<96x32xbf16>
    %125 = arith.truncf %123 : vector<8x96xf32> to vector<8x96xbf16>
    %cst_46 = arith.constant dense<0.000000e+00> : vector<8x32xf32>
    %126 = tpu.matmul %125, %124, %cst_46 {dimension_numbers = #tpu.dot_dimension_numbers<[1], [0], [0], [1], [0, 0, 1, 1], [], []>} : vector<8x96xbf16>, vector<96x32xbf16>, vector<8x32xf32> -> vector<8x32xf32>
    %c6 = arith.constant 6 : index
    %c0_47 = arith.constant 0 : index
    %127 = vector.load %arg10[%c6, %c0_47] : memref<16x128xf32, #tpu.memory_space<vmem>>, vector<1x32xf32>
    %128 = vector.broadcast %127 : vector<1x32xf32> to vector<8x32xf32>
    %129 = arith.addf %126, %128 : vector<8x32xf32>
    %cst_48 = arith.constant 0.00999999977 : f32
    %130 = vector.broadcast %cst_48 : f32 to vector<8x32xf32>
    %131 = arith.mulf %130, %129 : vector<8x32xf32>
    %132 = arith.maximumf %129, %131 : vector<8x32xf32>
    %c7 = arith.constant 7 : index
    %c0_49 = arith.constant 0 : index
    %133 = vector.load %arg10[%c7, %c0_49] : memref<16x128xf32, #tpu.memory_space<vmem>>, vector<1x32xf32>
    %c8 = arith.constant 8 : index
    %c0_50 = arith.constant 0 : index
    %134 = vector.load %arg10[%c8, %c0_50] : memref<16x128xf32, #tpu.memory_space<vmem>>, vector<1x32xf32>
    %cst_51 = arith.constant dense<0.000000e+00> : vector<32xf32>
    %135 = vector.multi_reduction <add>, %132, %cst_51 [0] : vector<8x32xf32> to vector<32xf32>
    %136 = vector.shape_cast %135 : vector<32xf32> to vector<1x32xf32>
    %cst_52 = arith.constant 8.000000e+00 : f32
    %137 = vector.broadcast %cst_52 : f32 to vector<1x32xf32>
    %138 = arith.divf %136, %137 : vector<1x32xf32>
    %139 = vector.broadcast %138 : vector<1x32xf32> to vector<8x32xf32>
    %140 = arith.subf %132, %139 : vector<8x32xf32>
    %141 = arith.mulf %140, %140 : vector<8x32xf32>
    %cst_53 = arith.constant dense<0.000000e+00> : vector<32xf32>
    %142 = vector.multi_reduction <add>, %141, %cst_53 [0] : vector<8x32xf32> to vector<32xf32>
    %143 = vector.shape_cast %142 : vector<32xf32> to vector<1x32xf32>
    %cst_54 = arith.constant 8.000000e+00 : f32
    %144 = vector.broadcast %cst_54 : f32 to vector<1x32xf32>
    %145 = arith.divf %143, %144 : vector<1x32xf32>
    %cst_55 = arith.constant 9.99999974E-6 : f32
    %146 = vector.broadcast %cst_55 : f32 to vector<1x32xf32>
    %147 = arith.addf %145, %146 : vector<1x32xf32>
    %148 = math.rsqrt %147 : vector<1x32xf32>
    %149 = arith.mulf %133, %148 : vector<1x32xf32>
    %150 = vector.broadcast %149 : vector<1x32xf32> to vector<8x32xf32>
    %151 = arith.mulf %140, %150 : vector<8x32xf32>
    %152 = vector.broadcast %134 : vector<1x32xf32> to vector<8x32xf32>
    %153 = arith.addf %151, %152 : vector<8x32xf32>
    %c96 = arith.constant 96 : index
    %c0_56 = arith.constant 0 : index
    %154 = vector.load %arg5[%c96, %c0_56] : memref<144x128xbf16, #tpu.memory_space<vmem>>, vector<32x16xbf16>
    %155 = arith.truncf %153 : vector<8x32xf32> to vector<8x32xbf16>
    %cst_57 = arith.constant dense<0.000000e+00> : vector<8x16xf32>
    %156 = tpu.matmul %155, %154, %cst_57 {dimension_numbers = #tpu.dot_dimension_numbers<[1], [0], [0], [1], [0, 0, 1, 1], [], []>} : vector<8x32xbf16>, vector<32x16xbf16>, vector<8x16xf32> -> vector<8x16xf32>
    %c9 = arith.constant 9 : index
    %c0_58 = arith.constant 0 : index
    %157 = vector.load %arg10[%c9, %c0_58] : memref<16x128xf32, #tpu.memory_space<vmem>>, vector<1x16xf32>
    %158 = vector.broadcast %157 : vector<1x16xf32> to vector<8x16xf32>
    %159 = arith.addf %156, %158 : vector<8x16xf32>
    %cst_59 = arith.constant 0.00999999977 : f32
    %160 = vector.broadcast %cst_59 : f32 to vector<8x16xf32>
    %161 = arith.mulf %160, %159 : vector<8x16xf32>
    %162 = arith.maximumf %159, %161 : vector<8x16xf32>
    %c128_60 = arith.constant 128 : index
    %c0_61 = arith.constant 0 : index
    %163 = vector.load %arg5[%c128_60, %c0_61] : memref<144x128xbf16, #tpu.memory_space<vmem>>, vector<16x4xbf16>
    %164 = arith.truncf %162 : vector<8x16xf32> to vector<8x16xbf16>
    %cst_62 = arith.constant dense<0.000000e+00> : vector<8x4xf32>
    %165 = tpu.matmul %164, %163, %cst_62 {dimension_numbers = #tpu.dot_dimension_numbers<[1], [0], [0], [1], [0, 0, 1, 1], [], []>} : vector<8x16xbf16>, vector<16x4xbf16>, vector<8x4xf32> -> vector<8x4xf32>
    %c10 = arith.constant 10 : index
    %c0_63 = arith.constant 0 : index
    %166 = vector.load %arg10[%c10, %c0_63] : memref<16x128xf32, #tpu.memory_space<vmem>>, vector<1x4xf32>
    %167 = vector.broadcast %166 : vector<1x4xf32> to vector<8x4xf32>
    %168 = arith.addf %165, %167 : vector<8x4xf32>
    %c0_64 = arith.constant 0 : index
    %c0_65 = arith.constant 0 : index
    %169 = vector.load %arg11[%c0_64, %c0_65] : memref<8x4xf32, #tpu.memory_space<vmem>>, vector<8x4xf32>
    tpu.vector_store %arg11[%c0_64, %c0_65], %168 {strides = array<i32>} : memref<8x4xf32, #tpu.memory_space<vmem>>, vector<8x4xf32>,
    return
  }
}

</mosaic_0001>

<bundles_post_ra>
// kernel: tile.7
= control target key start
LH: loop header
LB: loop body
LE: loop exit
PB: predicated region body
PF: predicated region fallthrough
CT: control target
= control target key end

     0   :  { %vm4_vm0 = vcmask 1047556   ;;  %s60_s14 = smov 64   ;;  %s61_s15 = smov 32   ;;  %vm6_vm1 = vcmask 130048   ;;  %vm16_vm2 = vcmask 654848   ;;  %vm26_vm3 = vcmask 523648   ;;  %s124_s0 = inlined_call_operand.vmem [shape: f32[8,5,16], index: 0, kind: input, shape index: {}]   ;;  %s125_s1 = inlined_call_operand.vmem [shape: f32[8,80], index: 1, kind: output, shape index: {}]  }
   0x1   :  { %v48_v0 = vld [vmem:[%s124_s0 + $0x4] ss:$8 sm:$0xf]   ;;  %v52_v3 = vld [vmem:[%s124_s0 + $0x2] ss:$8 sm:$0xf]  }
   0x2   :  { %v49_v1 = vld [vmem:[%s124_s0 + $0x4] ss:$8 sm:$0xf0]   ;;  %v53_v4 = vld [vmem:[%s124_s0 + $0x2] ss:$8 sm:$0xf0]  }
   0x3   :  { %v13_v2 = vsel %vm4_vm0, %v49_v1, %v48_v0  ;;  %v33_v5 = vsel %vm4_vm0, %v53_v4, %v52_v3  ;;  %v50_v6 = vld [vmem:[%s124_s0 + $0x3] ss:$8 sm:$0xf]   ;;  %v54_v8 = vld [vmem:[%s124_s0 + $0x1] ss:$8 sm:$0xf]  }
   0x4   :  { %14 = vrot.lane.b32.xlu0 %v13_v2, %s60_s14  ;;  %34 = vrot.lane.b32.xlu1 %v33_v5, %s61_s15  ;;  %v51_v7 = vld [vmem:[%s124_s0 + $0x3] ss:$8 sm:$0xf0]   ;;  %v55_v9 = vld [vmem:[%s124_s0 + $0x1] ss:$8 sm:$0xf0]  }
   0x5   :  { %v23_v10 = vsel %vm4_vm0, %v51_v7, %v50_v6  ;;  %v43_v11 = vsel %vm4_vm0, %v55_v9, %v54_v8  ;;  %s62_s24 = smov 48   ;;  %s63_s25 = smov 16   ;;  %v2_v12 = vld [vmem:[%s124_s0] ss:$8 sm:$0xf]   ;;  %vm36_vm4 = vcmask 392448  }
   0x6   :  { %v3_v13 = vld [vmem:[%s124_s0] ss:$8 sm:$0xf0]   ;;  %vm46_vm5 = vcmask 261248  }
   0x7   :  { %v5_v14 = vsel %vm4_vm0, %v3_v13, %v2_v12 }
   0x8   :  { %7 = vst.msk [vmem:[%s125_s1] sm:$0xff] %vm6_vm1, %v5_v14  }
   0xc   :  { %24 = vrot.lane.b32.xlu0 %v23_v10, %s62_s24  ;;  %44 = vrot.lane.b32.xlu1 %v43_v11, %s63_s25 }
  0x76   :  { %v15_v15 = vpop.permute.xlu0 %14   ;;  %v35_v16 = vpop.permute.xlu1 %34  }
  0x77   :  { %17 = vst.msk [vmem:[%s125_s1] sm:$0xff] %vm16_vm2, %v15_v15  }
  0x7e   :  { %v25_v17 = vpop.permute.xlu0 %24   ;;  %v45_v18 = vpop.permute.xlu1 %44  }
  0x7f   :  { %27 = vst.msk [vmem:[%s125_s1] sm:$0xff] %vm26_vm3, %v25_v17  }
  0x80   :  { %37 = vst.msk [vmem:[%s125_s1] sm:$0xff] %vm36_vm4, %v35_v16  }
  0x81   :  { %47 = vst.msk [vmem:[%s125_s1] sm:$0xff] %vm46_vm5, %v45_v18  }

// kernel: exnet_pallas.1
= control target key start
LH: loop header
LB: loop body
LE: loop exit
PB: predicated region body
PF: predicated region fallthrough
CT: control target
= control target key end

     0   :  { %vm1397_vm0 = vcmask 1040384   ;;  %vm2652_vm4 = vcmask 654336   ;;  %vm3672_vm5 = vcmask 130048   ;;  %s6301_s22 = smov 80   ;;  %vm3694_vm6 = vcmask 1043456   ;;  %s6302_s30 = smov 112   ;;  %s8454_s2 = inlined_call_operand.vmem [shape: bf16[256,1280], index: 2, kind: input, shape index: {}]   ;;  %s8455_s0 = inlined_call_operand.vmem [shape: bf16[8,256], index: 0, kind: input, shape index: {}]   ;;  %s8456_s6 = inlined_call_operand.vmem [shape: bf16[1280,80], index: 6, kind: input, shape index: {}]   ;;  %s8457_s10 = inlined_call_operand.vmem [shape: f32[16,128], index: 10, kind: input, shape index: {}]   ;;  %s8458_s7 = inlined_call_operand.vmem [shape: bf16[80,1280], index: 7, kind: input, shape index: {}]   ;;  %s8459_s3 = inlined_call_operand.vmem [shape: bf16[1280,80], index: 3, kind: input, shape index: {}]   ;;  %s8460_s1 = inlined_call_operand.vmem [shape: f32[8,384], index: 1, kind: input, shape index: {}]   ;;  %s8461_s8 = inlined_call_operand.vmem [shape: bf16[80,16], index: 8, kind: input, shape index: {}]   ;;  %s8462_s9 = inlined_call_operand.vmem [shape: bf16[16,80], index: 9, kind: input, shape index: {}]   ;;  %s8463_s4 = inlined_call_operand.vmem [shape: bf16[320,96], index: 4, kind: input, shape index: {}]   ;;  %s8464_s5 = inlined_call_operand.vmem [shape: bf16[144,128], index: 5, kind: input, shape index: {}]   ;;  %s8465_s11 = inlined_call_operand.vmem [shape: f32[8,4], index: 11, kind: output, shape index: {}]  }
   0x1   :  { %v4521_v0 = vld [vmem:[%s8454_s2 + $0x230] sm:$0xf]  ;;  %v5950_v1 = vld [vmem:[%s8454_s2 + $0x254] sm:$0xf0]  ;;  %v5945_v5 = vld [vmem:[%s8454_s2 + $0x234] sm:$0xf] }
   0x2   :  { %v4841_v2 = vld [vmem:[%s8454_s2 + $0x4b0] sm:$0xf]  ;;  %v4522_v3 = vor.u32 %v5950_v1, %v4521_v0  ;;  %v6030_v4 = vld [vmem:[%s8454_s2 + $0x4d4] sm:$0xf0]  ;;  %v4523_v6 = vld [vmem:[%s8454_s2 + $0x258] sm:$0xf0] }
   0x3   :  { %v4842_v7 = vor.u32 %v6030_v4, %v4841_v2  ;;  %v4526_v8 = vor.u32 %v5945_v5, %v4523_v6  ;;  %v6025_v9 = vld [vmem:[%s8454_s2 + $0x4b4] sm:$0xf]  ;;  %v4843_v10 = vld [vmem:[%s8454_s2 + $0x4d8] sm:$0xf0]  ;;  %v4481_v11 = vld [vmem:[%s8454_s2 + $0x1e0] sm:$0xf] }
   0x4   :  { %1007 = vmatpush.bf16.msra.mxu0 %v4522_v3  ;;  %v4846_v12 = vor.u32 %v6025_v9, %v4843_v10  ;;  %v5940_v13 = vld [vmem:[%s8454_s2 + $0x204] sm:$0xf0]  ;;  %v4801_v14 = vld [vmem:[%s8454_s2 + $0x460] sm:$0xf]  ;;  %v5935_v18 = vld [vmem:[%s8454_s2 + $0x1e4] sm:$0xf] }
   0x5   :  { %v6020_v15 = vld [vmem:[%s8454_s2 + $0x484] sm:$0xf0]  ;;  %1020 = vmatpush.bf16.msra.mxu1 %v4842_v7  ;;  %1033 = vmatpush.bf16.msra.mxu2 %v4526_v8  ;;  %v4482_v16 = vor.u32 %v5940_v13, %v4481_v11  ;;  %v4483_v19 = vld [vmem:[%s8454_s2 + $0x208] sm:$0xf0]  ;;  %v6015_v20 = vld [vmem:[%s8454_s2 + $0x464] sm:$0xf] }
   0x6   :  { %v4802_v17 = vor.u32 %v6020_v15, %v4801_v14  ;;  %1046 = vmatpush.bf16.msra.mxu3 %v4846_v12  ;;  %v4486_v21 = vor.u32 %v5935_v18, %v4483_v19  ;;  %v4803_v22 = vld [vmem:[%s8454_s2 + $0x488] sm:$0xf0]  ;;  %v4441_v23 = vld [vmem:[%s8454_s2 + $0x190] sm:$0xf]  ;;  %v5930_v24 = vld [vmem:[%s8454_s2 + $0x1b4] sm:$0xf0] }
   0x7   :  { %v4806_v25 = vor.u32 %v6015_v20, %v4803_v22  ;;  %v4761_v26 = vld [vmem:[%s8454_s2 + $0x410] sm:$0xf]  ;;  %v6010_v27 = vld [vmem:[%s8454_s2 + $0x434] sm:$0xf0]  ;;  %v5925_v28 = vld [vmem:[%s8454_s2 + $0x194] sm:$0xf]  ;;  %v4442_v29 = vor.u32 %v5930_v24, %v4441_v23 }
   0x8   :  { %1008 = vmatpush.bf16.msra.mxu0 %v4482_v16  ;;  %v4443_v30 = vld [vmem:[%s8454_s2 + $0x1b8] sm:$0xf0]  ;;  %v6005_v31 = vld [vmem:[%s8454_s2 + $0x414] sm:$0xf]  ;;  %v4762_v33 = vor.u32 %v6010_v27, %v4761_v26  ;;  %v4401_v35 = vld [vmem:[%s8454_s2 + $0x140] sm:$0xf] }
   0x9   :  { %v4763_v32 = vld [vmem:[%s8454_s2 + $0x438] sm:$0xf0]  ;;  %1021 = vmatpush.bf16.msra.mxu1 %v4802_v17  ;;  %1034 = vmatpush.bf16.msra.mxu2 %v4486_v21  ;;  %v4446_v34 = vor.u32 %v5925_v28, %v4443_v30  ;;  %v5920_v36 = vld [vmem:[%s8454_s2 + $0x164] sm:$0xf0]  ;;  %v4721_v37 = vld [vmem:[%s8454_s2 + $0x3c0] sm:$0xf] }
   0xa   :  { %1047 = vmatpush.bf16.msra.mxu3 %v4806_v25  ;;  %v4766_v38 = vor.u32 %v6005_v31, %v4763_v32  ;;  %v6000_v39 = vld [vmem:[%s8454_s2 + $0x3e4] sm:$0xf0]  ;;  %v5915_v40 = vld [vmem:[%s8454_s2 + $0x144] sm:$0xf]  ;;  %v4403_v41 = vld [vmem:[%s8454_s2 + $0x168] sm:$0xf0]  ;;  %v4402_v44 = vor.u32 %v5920_v36, %v4401_v35 }
   0xb   :  { %v5995_v42 = vld [vmem:[%s8454_s2 + $0x3c4] sm:$0xf]  ;;  %v4723_v43 = vld [vmem:[%s8454_s2 + $0x3e8] sm:$0xf0]  ;;  %v4722_v45 = vor.u32 %v6000_v39, %v4721_v37  ;;  %v4406_v46 = vor.u32 %v5915_v40, %v4403_v41  ;;  %v4361_v47 = vld [vmem:[%s8454_s2 + $0xf0] sm:$0xf] }
   0xc   :  { %1009 = vmatpush.bf16.msra.mxu0 %v4442_v29  ;;  %v5910_v48 = vld [vmem:[%s8454_s2 + $0x114] sm:$0xf0]  ;;  %v4681_v49 = vld [vmem:[%s8454_s2 + $0x370] sm:$0xf]  ;;  %v4726_v50 = vor.u32 %v5995_v42, %v4723_v43  ;;  %v5905_v52 = vld [vmem:[%s8454_s2 + $0xf4] sm:$0xf] }
   0xd   :  { %1022 = vmatpush.bf16.msra.mxu1 %v4762_v33  ;;  %1035 = vmatpush.bf16.msra.mxu2 %v4446_v34  ;;  %v5990_v51 = vld [vmem:[%s8454_s2 + $0x394] sm:$0xf0]  ;;  %v4363_v53 = vld [vmem:[%s8454_s2 + $0x118] sm:$0xf0]  ;;  %v5985_v54 = vld [vmem:[%s8454_s2 + $0x374] sm:$0xf]  ;;  %v4362_v56 = vor.u32 %v5910_v48, %v4361_v47 }
   0xe   :  { %1048 = vmatpush.bf16.msra.mxu3 %v4766_v38  ;;  %v4683_v55 = vld [vmem:[%s8454_s2 + $0x398] sm:$0xf0]  ;;  %v4682_v57 = vor.u32 %v5990_v51, %v4681_v49  ;;  %v4366_v58 = vor.u32 %v5905_v52, %v4363_v53  ;;  %v4321_v59 = vld [vmem:[%s8454_s2 + $0xa0] sm:$0xf]  ;;  %v5900_v60 = vld [vmem:[%s8454_s2 + $0xc4] sm:$0xf0] }
   0xf   :  { %v4641_v61 = vld [vmem:[%s8454_s2 + $0x320] sm:$0xf]  ;;  %v4686_v62 = vor.u32 %v5985_v54, %v4683_v55  ;;  %v5980_v63 = vld [vmem:[%s8454_s2 + $0x344] sm:$0xf0]  ;;  %v5895_v0 = vld [vmem:[%s8454_s2 + $0xa4] sm:$0xf]  ;;  %v4322_v4 = vor.u32 %v5900_v60, %v4321_v59 }
  0x10   :  { %1010 = vmatpush.bf16.msra.mxu0 %v4402_v44  ;;  %v4323_v1 = vld [vmem:[%s8454_s2 + $0xc8] sm:$0xf0]  ;;  %v5975_v2 = vld [vmem:[%s8454_s2 + $0x324] sm:$0xf]  ;;  %v4642_v5 = vor.u32 %v5980_v63, %v4641_v61  ;;  %v4281_v7 = vld [vmem:[%s8454_s2 + $0x50] sm:$0xf] }
  0x11   :  { %1023 = vmatpush.bf16.msra.mxu1 %v4722_v45  ;;  %1036 = vmatpush.bf16.msra.mxu2 %v4406_v46  ;;  %v4643_v3 = vld [vmem:[%s8454_s2 + $0x348] sm:$0xf0]  ;;  %v4326_v6 = vor.u32 %v5895_v0, %v4323_v1  ;;  %v5890_v8 = vld [vmem:[%s8454_s2 + $0x74] sm:$0xf0]  ;;  %v4601_v9 = vld [vmem:[%s8454_s2 + $0x2d0] sm:$0xf] }
  0x12   :  { %1049 = vmatpush.bf16.msra.mxu3 %v4726_v50  ;;  %v4646_v10 = vor.u32 %v5975_v2, %v4643_v3  ;;  %v5970_v11 = vld [vmem:[%s8454_s2 + $0x2f4] sm:$0xf0]  ;;  %v5885_v12 = vld [vmem:[%s8454_s2 + $0x54] sm:$0xf]  ;;  %v4283_v13 = vld [vmem:[%s8454_s2 + $0x78] sm:$0xf0]  ;;  %v4282_v16 = vor.u32 %v5890_v8, %v4281_v7 }
  0x13   :  { %v5965_v14 = vld [vmem:[%s8454_s2 + $0x2d4] sm:$0xf]  ;;  %v4603_v15 = vld [vmem:[%s8454_s2 + $0x2f8] sm:$0xf0]  ;;  %v4241_v17 = vld [vmem:[%s8454_s2] sm:$0xf]  ;;  %v4602_v20 = vor.u32 %v5970_v11, %v4601_v9  ;;  %v4286_v21 = vor.u32 %v5885_v12, %v4283_v13 }
  0x14   :  { %1011 = vmatpush.bf16.msra.mxu0 %v4362_v56  ;;  %v5880_v18 = vld [vmem:[%s8454_s2 + $0x24] sm:$0xf0]  ;;  %v4561_v19 = vld [vmem:[%s8454_s2 + $0x280] sm:$0xf]  ;;  %v5875_v23 = vld [vmem:[%s8454_s2 + $0x4] sm:$0xf]  ;;  %v4606_v25 = vor.u32 %v5965_v14, %v4603_v15 }
  0x15   :  { %1024 = vmatpush.bf16.msra.mxu1 %v4682_v57  ;;  %1037 = vmatpush.bf16.msra.mxu2 %v4366_v58  ;;  %v5960_v22 = vld [vmem:[%s8454_s2 + $0x2a4] sm:$0xf0]  ;;  %v4243_v24 = vld [vmem:[%s8454_s2 + $0x28] sm:$0xf0]  ;;  %v5955_v26 = vld [vmem:[%s8454_s2 + $0x284] sm:$0xf]  ;;  %v4242_v32 = vor.u32 %v5880_v18, %v4241_v17 }
  0x16   :  { %1050 = vmatpush.bf16.msra.mxu3 %v4686_v62  ;;  %v4563_v27 = vld [vmem:[%s8454_s2 + $0x2a8] sm:$0xf0]  ;;  %v4529_v28 = vld [vmem:[%s8454_s2 + $0x238] sm:$0xf]  ;;  %v5951_v29 = vld [vmem:[%s8454_s2 + $0x25c] sm:$0xf0]  ;;  %v4562_v37 = vor.u32 %v5960_v22, %v4561_v19  ;;  %v4246_v38 = vor.u32 %v5875_v23, %v4243_v24 }
  0x17   :  { %v4849_v30 = vld [vmem:[%s8454_s2 + $0x4b8] sm:$0xf]  ;;  %v39_v31 = vld [vmem:[%s8455_s0] sm:$0xff]  ;;  %v5946_v34 = vld [vmem:[%s8454_s2 + $0x23c] sm:$0xf]  ;;  %v4566_v42 = vor.u32 %v5955_v26, %v4563_v27  ;;  %v4530_v43 = vor.u32 %v5951_v29, %v4529_v28  ;;  %vm3975_vm10 = vcmask 523264  }
  0x18   :  { %1012 = vmatpush.bf16.msra.mxu0 %v4322_v4  ;;  %v6031_v33 = vld [vmem:[%s8454_s2 + $0x4dc] sm:$0xf0]  ;;  %v4531_v35 = vld [vmem:[%s8454_s2 + $0x260] sm:$0xf0]  ;;  %v201_v36 = vunpack.c.l.b16 %v39_v31  ;;  %v6026_v39 = vld [vmem:[%s8454_s2 + $0x4bc] sm:$0xf]  ;;  %v202_v41 = vunpack.c.h.b16 %v39_v31 }
  0x19   :  { %1025 = vmatpush.bf16.msra.mxu1 %v4642_v5  ;;  %1038 = vmatpush.bf16.msra.mxu2 %v4326_v6  ;;  %v4851_v40 = vld [vmem:[%s8454_s2 + $0x4e0] sm:$0xf0]  ;;  %v4850_v44 = vor.u32 %v6031_v33, %v4849_v30  ;;  %v4534_v45 = vor.u32 %v5946_v34, %v4531_v35  ;;  %v4489_v46 = vld [vmem:[%s8454_s2 + $0x1e8] sm:$0xf]  ;;  %v5941_v47 = vld [vmem:[%s8454_s2 + $0x20c] sm:$0xf0] }
  0x1a   :  { %1051 = vmatpush.bf16.msra.mxu3 %v4646_v10  ;;  %v4809_v48 = vld [vmem:[%s8454_s2 + $0x468] sm:$0xf]  ;;  %v4854_v49 = vor.u32 %v6026_v39, %v4851_v40  ;;  %v6021_v50 = vld [vmem:[%s8454_s2 + $0x48c] sm:$0xf0]  ;;  %v5936_v51 = vld [vmem:[%s8454_s2 + $0x1ec] sm:$0xf]  ;;  %v6602_v53 = vpack.c.b16 %v201_v36, %v201_v36  ;;  %v6610_v56 = vpack.c.b16 %v202_v41, %v202_v41  ;;  %v4490_v57 = vor.u32 %v5941_v47, %v4489_v46 }
  0x1b   :  { %v4491_v52 = vld [vmem:[%s8454_s2 + $0x210] sm:$0xf0]  ;;  %v6016_v54 = vld [vmem:[%s8454_s2 + $0x46c] sm:$0xf]  ;;  %v4810_v58 = vor.u32 %v6021_v50, %v4809_v48  ;;  %v4449_v60 = vld [vmem:[%s8454_s2 + $0x198] sm:$0xf] }
  0x1c   :  { %1013 = vmatpush.bf16.msra.mxu0 %v4282_v16  ;;  %v4811_v55 = vld [vmem:[%s8454_s2 + $0x490] sm:$0xf0]  ;;  %v4494_v59 = vor.u32 %v5936_v51, %v4491_v52  ;;  %v5931_v61 = vld [vmem:[%s8454_s2 + $0x1bc] sm:$0xf0]  ;;  %v4769_v62 = vld [vmem:[%s8454_s2 + $0x418] sm:$0xf] }
  0x1d   :  { %1026 = vmatpush.bf16.msra.mxu1 %v4602_v20  ;;  %1039 = vmatpush.bf16.msra.mxu2 %v4286_v21  ;;  %v4814_v63 = vor.u32 %v6016_v54, %v4811_v55  ;;  %v6011_v0 = vld [vmem:[%s8454_s2 + $0x43c] sm:$0xf0]  ;;  %v5926_v1 = vld [vmem:[%s8454_s2 + $0x19c] sm:$0xf]  ;;  %v4451_v2 = vld [vmem:[%s8454_s2 + $0x1c0] sm:$0xf0]  ;;  %v4450_v5 = vor.u32 %v5931_v61, %v4449_v60 }
  0x1e   :  { %1052 = vmatpush.bf16.msra.mxu3 %v4606_v25  ;;  %v6006_v3 = vld [vmem:[%s8454_s2 + $0x41c] sm:$0xf]  ;;  %v4771_v4 = vld [vmem:[%s8454_s2 + $0x440] sm:$0xf0]  ;;  %v4770_v6 = vor.u32 %v6011_v0, %v4769_v62  ;;  %v4454_v7 = vor.u32 %v5926_v1, %v4451_v2  ;;  %v4409_v8 = vld [vmem:[%s8454_s2 + $0x148] sm:$0xf] }
  0x1f   :  { %v5921_v9 = vld [vmem:[%s8454_s2 + $0x16c] sm:$0xf0]  ;;  %v4729_v10 = vld [vmem:[%s8454_s2 + $0x3c8] sm:$0xf]  ;;  %v4774_v11 = vor.u32 %v6006_v3, %v4771_v4  ;;  %v5916_v13 = vld [vmem:[%s8454_s2 + $0x14c] sm:$0xf] }
  0x20   :  { %1014 = vmatpush.bf16.msra.mxu0 %v4242_v32  ;;  %v6001_v12 = vld [vmem:[%s8454_s2 + $0x3ec] sm:$0xf0]  ;;  %v4411_v14 = vld [vmem:[%s8454_s2 + $0x170] sm:$0xf0]  ;;  %v5996_v15 = vld [vmem:[%s8454_s2 + $0x3cc] sm:$0xf]  ;;  %v4410_v17 = vor.u32 %v5921_v9, %v4409_v8 }
  0x21   :  { %1027 = vmatpush.bf16.msra.mxu1 %v4562_v37  ;;  %1040 = vmatpush.bf16.msra.mxu2 %v4246_v38  ;;  %v4731_v16 = vld [vmem:[%s8454_s2 + $0x3f0] sm:$0xf0]  ;;  %v4730_v18 = vor.u32 %v6001_v12, %v4729_v10  ;;  %v4414_v19 = vor.u32 %v5916_v13, %v4411_v14  ;;  %v4369_v20 = vld [vmem:[%s8454_s2 + $0xf8] sm:$0xf]  ;;  %v5911_v21 = vld [vmem:[%s8454_s2 + $0x11c] sm:$0xf0] }
  0x22   :  { %1053 = vmatpush.bf16.msra.mxu3 %v4566_v42  ;;  %v4689_v22 = vld [vmem:[%s8454_s2 + $0x378] sm:$0xf]  ;;  %v4734_v23 = vor.u32 %v5996_v15, %v4731_v16  ;;  %v5991_v24 = vld [vmem:[%s8454_s2 + $0x39c] sm:$0xf0]  ;;  %v5906_v25 = vld [vmem:[%s8454_s2 + $0xfc] sm:$0xf]  ;;  %v4370_v29 = vor.u32 %v5911_v21, %v4369_v20 }
  0x23   :  { %1015 = vmatmul.bf16.vlgmr.msra.gmra.mxu0 %v6602_v53  ;;  %v4371_v26 = vld [vmem:[%s8454_s2 + $0x120] sm:$0xf0]  ;;  %v5986_v27 = vld [vmem:[%s8454_s2 + $0x37c] sm:$0xf]  ;;  %v4690_v30 = vor.u32 %v5991_v24, %v4689_v22  ;;  %v4329_v32 = vld [vmem:[%s8454_s2 + $0xa8] sm:$0xf] }
  0x24   :  { %1059 = vmatpush.bf16.msrb.mxu0 %v4530_v43  ;;  %1041 = vmatmul.bf16.vlgmr.msra.gmra.mxu2 %v6602_v53  ;;  %v4691_v28 = vld [vmem:[%s8454_s2 + $0x3a0] sm:$0xf0]  ;;  %v4374_v31 = vor.u32 %v5906_v25, %v4371_v26  ;;  %v5901_v33 = vld [vmem:[%s8454_s2 + $0xcc] sm:$0xf0]  ;;  %v4649_v34 = vld [vmem:[%s8454_s2 + $0x328] sm:$0xf] }
  0x25   :  { %1072 = vmatpush.bf16.msrb.mxu1 %v4850_v44  ;;  %1085 = vmatpush.bf16.msrb.mxu2 %v4534_v45  ;;  %v4694_v35 = vor.u32 %v5986_v27, %v4691_v28  ;;  %v5981_v36 = vld [vmem:[%s8454_s2 + $0x34c] sm:$0xf0]  ;;  %v5896_v37 = vld [vmem:[%s8454_s2 + $0xac] sm:$0xf]  ;;  %v4331_v38 = vld [vmem:[%s8454_s2 + $0xd0] sm:$0xf0]  ;;  %v4330_v41 = vor.u32 %v5901_v33, %v4329_v32 }
  0x26   :  { %1098 = vmatpush.bf16.msrb.mxu3 %v4854_v49  ;;  %1028 = vmatmul.bf16.vlgmr.msra.gmra.mxu1 %v6610_v56  ;;  %v5976_v39 = vld [vmem:[%s8454_s2 + $0x32c] sm:$0xf]  ;;  %v4651_v40 = vld [vmem:[%s8454_s2 + $0x350] sm:$0xf0]  ;;  %v4650_v42 = vor.u32 %v5981_v36, %v4649_v34  ;;  %v4334_v43 = vor.u32 %v5896_v37, %v4331_v38  ;;  %v4289_v44 = vld [vmem:[%s8454_s2 + $0x58] sm:$0xf] }
  0x27   :  { %1054 = vmatmul.bf16.vlgmr.msra.gmra.mxu3 %v6610_v56  ;;  %v5891_v45 = vld [vmem:[%s8454_s2 + $0x7c] sm:$0xf0]  ;;  %v4609_v46 = vld [vmem:[%s8454_s2 + $0x2d8] sm:$0xf]  ;;  %v4654_v47 = vor.u32 %v5976_v39, %v4651_v40  ;;  %v5886_v49 = vld [vmem:[%s8454_s2 + $0x5c] sm:$0xf] }
  0x28   :  { %1060 = vmatpush.bf16.msrb.mxu0 %v4490_v57  ;;  %v5971_v48 = vld [vmem:[%s8454_s2 + $0x2fc] sm:$0xf0]  ;;  %v4291_v50 = vld [vmem:[%s8454_s2 + $0x80] sm:$0xf0]  ;;  %v5966_v51 = vld [vmem:[%s8454_s2 + $0x2dc] sm:$0xf]  ;;  %v4290_v54 = vor.u32 %v5891_v45, %v4289_v44 }
  0x29   :  { %1073 = vmatpush.bf16.msrb.mxu1 %v4810_v58  ;;  %1086 = vmatpush.bf16.msrb.mxu2 %v4494_v59  ;;  %v4611_v52 = vld [vmem:[%s8454_s2 + $0x300] sm:$0xf0]  ;;  %v4249_v55 = vld [vmem:[%s8454_s2 + $0x8] sm:$0xf]  ;;  %v5881_v57 = vld [vmem:[%s8454_s2 + $0x2c] sm:$0xf0]  ;;  %v4610_v58 = vor.u32 %v5971_v48, %v4609_v46  ;;  %v4294_v59 = vor.u32 %v5886_v49, %v4291_v50 }
  0x2a   :  { %1099 = vmatpush.bf16.msrb.mxu3 %v4814_v63  ;;  %v4569_v60 = vld [vmem:[%s8454_s2 + $0x288] sm:$0xf]  ;;  %v5961_v61 = vld [vmem:[%s8454_s2 + $0x2ac] sm:$0xf0]  ;;  %v5876_v62 = vld [vmem:[%s8454_s2 + $0xc] sm:$0xf]  ;;  %v4614_v63 = vor.u32 %v5966_v51, %v4611_v52 }
  0x2b   :  { %v4251_v0 = vld [vmem:[%s8454_s2 + $0x30] sm:$0xf0]  ;;  %v5956_v1 = vld [vmem:[%s8454_s2 + $0x28c] sm:$0xf]  ;;  %v4537_v3 = vld [vmem:[%s8454_s2 + $0x240] sm:$0xf]  ;;  %v4570_v10 = vor.u32 %v5961_v61, %v4569_v60 }
  0x2c   :  { %1061 = vmatpush.bf16.msrb.mxu0 %v4450_v5  ;;  %v4571_v2 = vld [vmem:[%s8454_s2 + $0x2b0] sm:$0xf0]  ;;  %v5952_v4 = vld [vmem:[%s8454_s2 + $0x264] sm:$0xf0]  ;;  %v4857_v5 = vld [vmem:[%s8454_s2 + $0x4c0] sm:$0xf] }
  0x2d   :  { %1074 = vmatpush.bf16.msrb.mxu1 %v4770_v6  ;;  %1087 = vmatpush.bf16.msrb.mxu2 %v4454_v7  ;;  %v4250_v6 = vor.u32 %v5881_v57, %v4249_v55  ;;  %v6032_v7 = vld [vmem:[%s8454_s2 + $0x4e4] sm:$0xf0]  ;;  %v5947_v8 = vld [vmem:[%s8454_s2 + $0x244] sm:$0xf]  ;;  %v4539_v9 = vld [vmem:[%s8454_s2 + $0x268] sm:$0xf0]  ;;  %v4574_v14 = vor.u32 %v5956_v1, %v4571_v2  ;;  %v4538_v15 = vor.u32 %v5952_v4, %v4537_v3 }
  0x2e   :  { %1100 = vmatpush.bf16.msrb.mxu3 %v4774_v11  ;;  %v4254_v11 = vor.u32 %v5876_v62, %v4251_v0  ;;  %v6027_v12 = vld [vmem:[%s8454_s2 + $0x4c4] sm:$0xf]  ;;  %v4859_v13 = vld [vmem:[%s8454_s2 + $0x4e8] sm:$0xf0]  ;;  %v4858_v16 = vor.u32 %v6032_v7, %v4857_v5  ;;  %v4817_v20 = vld [vmem:[%s8454_s2 + $0x470] sm:$0xf] }
  0x2f   :  { %v4862_v21 = vor.u32 %v6027_v12, %v4859_v13  ;;  %v6022_v22 = vld [vmem:[%s8454_s2 + $0x494] sm:$0xf0]  ;;  %v4499_v24 = vld [vmem:[%s8454_s2 + $0x218] sm:$0xf0]  ;;  %v6017_v25 = vld [vmem:[%s8454_s2 + $0x474] sm:$0xf] }
  0x30   :  { %1062 = vmatpush.bf16.msrb.mxu0 %v4410_v17  ;;  %v4542_v17 = vor.u32 %v5947_v8, %v4539_v9  ;;  %v4819_v26 = vld [vmem:[%s8454_s2 + $0x498] sm:$0xf0]  ;;  %v4818_v28 = vor.u32 %v6022_v22, %v4817_v20  ;;  %v4777_v32 = vld [vmem:[%s8454_s2 + $0x420] sm:$0xf]  ;;  %v6012_v34 = vld [vmem:[%s8454_s2 + $0x444] sm:$0xf0] }
  0x31   :  { %1075 = vmatpush.bf16.msrb.mxu1 %v4730_v18  ;;  %1088 = vmatpush.bf16.msrb.mxu2 %v4414_v19  ;;  %v4497_v18 = vld [vmem:[%s8454_s2 + $0x1f0] sm:$0xf]  ;;  %v5942_v19 = vld [vmem:[%s8454_s2 + $0x214] sm:$0xf0]  ;;  %v4822_v33 = vor.u32 %v6017_v25, %v4819_v26  ;;  %v4459_v36 = vld [vmem:[%s8454_s2 + $0x1c8] sm:$0xf0]  ;;  %v4778_v40 = vor.u32 %v6012_v34, %v4777_v32 }
  0x32   :  { %1101 = vmatpush.bf16.msrb.mxu3 %v4734_v23  ;;  %v5937_v23 = vld [vmem:[%s8454_s2 + $0x1f4] sm:$0xf]  ;;  %v4498_v27 = vor.u32 %v5942_v19, %v4497_v18  ;;  %v6007_v37 = vld [vmem:[%s8454_s2 + $0x424] sm:$0xf]  ;;  %v4779_v38 = vld [vmem:[%s8454_s2 + $0x448] sm:$0xf0] }
  0x33   :  { %v4737_v44 = vld [vmem:[%s8454_s2 + $0x3d0] sm:$0xf]  ;;  %v4782_v45 = vor.u32 %v6007_v37, %v4779_v38  ;;  %v6002_v46 = vld [vmem:[%s8454_s2 + $0x3f4] sm:$0xf0]  ;;  %v4419_v48 = vld [vmem:[%s8454_s2 + $0x178] sm:$0xf0] }
  0x34   :  { %1063 = vmatpush.bf16.msrb.mxu0 %v4370_v29  ;;  %v4502_v29 = vor.u32 %v5937_v23, %v4499_v24  ;;  %v5997_v49 = vld [vmem:[%s8454_s2 + $0x3d4] sm:$0xf]  ;;  %v4739_v50 = vld [vmem:[%s8454_s2 + $0x3f8] sm:$0xf0]  ;;  %v4738_v52 = vor.u32 %v6002_v46, %v4737_v44  ;;  %v4377_v55 = vld [vmem:[%s8454_s2 + $0x100] sm:$0xf] }
  0x35   :  { %1076 = vmatpush.bf16.msrb.mxu1 %v4690_v30  ;;  %1089 = vmatpush.bf16.msrb.mxu2 %v4374_v31  ;;  %v4457_v30 = vld [vmem:[%s8454_s2 + $0x1a0] sm:$0xf]  ;;  %v5932_v31 = vld [vmem:[%s8454_s2 + $0x1c4] sm:$0xf0]  ;;  %v5907_v61 = vld [vmem:[%s8454_s2 + $0x104] sm:$0xf] }
  0x36   :  { %1102 = vmatpush.bf16.msrb.mxu3 %v4694_v35  ;;  %v5927_v35 = vld [vmem:[%s8454_s2 + $0x1a4] sm:$0xf]  ;;  %v4458_v39 = vor.u32 %v5932_v31, %v4457_v30  ;;  %v5912_v57 = vld [vmem:[%s8454_s2 + $0x124] sm:$0xf0]  ;;  %v4379_v62 = vld [vmem:[%s8454_s2 + $0x128] sm:$0xf0] }
  0x37   :  { %v5992_v60 = vld [vmem:[%s8454_s2 + $0x3a4] sm:$0xf0]  ;;  %v4699_v0 = vld [vmem:[%s8454_s2 + $0x3a8] sm:$0xf0]  ;;  %v4378_v1 = vor.u32 %v5912_v57, %v4377_v55  ;;  %v4382_v3 = vor.u32 %v5907_v61, %v4379_v62  ;;  %v4337_v4 = vld [vmem:[%s8454_s2 + $0xb0] sm:$0xf] }
  0x38   :  { %1064 = vmatpush.bf16.msrb.mxu0 %v4330_v41  ;;  %v4462_v41 = vor.u32 %v5927_v35, %v4459_v36  ;;  %v5902_v5 = vld [vmem:[%s8454_s2 + $0xd4] sm:$0xf0]  ;;  %v5897_v9 = vld [vmem:[%s8454_s2 + $0xb4] sm:$0xf]  ;;  %v4659_v12 = vld [vmem:[%s8454_s2 + $0x358] sm:$0xf0] }
  0x39   :  { %1077 = vmatpush.bf16.msrb.mxu1 %v4650_v42  ;;  %1090 = vmatpush.bf16.msrb.mxu2 %v4334_v43  ;;  %v4417_v42 = vld [vmem:[%s8454_s2 + $0x150] sm:$0xf]  ;;  %v5922_v43 = vld [vmem:[%s8454_s2 + $0x174] sm:$0xf0]  ;;  %v4338_v13 = vor.u32 %v5902_v5, %v4337_v4  ;;  %v4617_v18 = vld [vmem:[%s8454_s2 + $0x2e0] sm:$0xf] }
  0x3a   :  { %1103 = vmatpush.bf16.msrb.mxu3 %v4654_v47  ;;  %v5917_v47 = vld [vmem:[%s8454_s2 + $0x154] sm:$0xf]  ;;  %v4418_v51 = vor.u32 %v5922_v43, %v4417_v42  ;;  %v5982_v8 = vld [vmem:[%s8454_s2 + $0x354] sm:$0xf0]  ;;  %v5972_v20 = vld [vmem:[%s8454_s2 + $0x304] sm:$0xf0] }
  0x3b   :  { %v4299_v22 = vld [vmem:[%s8454_s2 + $0x88] sm:$0xf0]  ;;  %v5967_v23 = vld [vmem:[%s8454_s2 + $0x2e4] sm:$0xf]  ;;  %v4257_v26 = vld [vmem:[%s8454_s2 + $0x10] sm:$0xf] }
  0x3c   :  { %1065 = vmatpush.bf16.msrb.mxu0 %v4290_v54  ;;  %v4422_v54 = vor.u32 %v5917_v47, %v4419_v48  ;;  %v4619_v24 = vld [vmem:[%s8454_s2 + $0x308] sm:$0xf0]  ;;  %v4577_v30 = vld [vmem:[%s8454_s2 + $0x290] sm:$0xf]  ;;  %v5962_v31 = vld [vmem:[%s8454_s2 + $0x2b4] sm:$0xf0] }
  0x3d   :  { %1078 = vmatpush.bf16.msrb.mxu1 %v4610_v58  ;;  %1091 = vmatpush.bf16.msrb.mxu2 %v4294_v59  ;;  %v4697_v58 = vld [vmem:[%s8454_s2 + $0x380] sm:$0xf]  ;;  %v4742_v59 = vor.u32 %v5997_v49, %v4739_v50  ;;  %v5877_v32 = vld [vmem:[%s8454_s2 + $0x14] sm:$0xf]  ;;  %v4259_v34 = vld [vmem:[%s8454_s2 + $0x38] sm:$0xf0]  ;;  %v4578_v44 = vor.u32 %v5962_v31, %v4577_v30 }
  0x3e   :  { %1104 = vmatpush.bf16.msrb.mxu3 %v4614_v63  ;;  %v5987_v63 = vld [vmem:[%s8454_s2 + $0x384] sm:$0xf]  ;;  %v4698_v2 = vor.u32 %v5992_v60, %v4697_v58  ;;  %v5957_v35 = vld [vmem:[%s8454_s2 + $0x294] sm:$0xf]  ;;  %v4579_v36 = vld [vmem:[%s8454_s2 + $0x2b8] sm:$0xf0] }
  0x3f   :  { %v4702_v7 = vor.u32 %v5987_v63, %v4699_v0  ;;  %v4545_v37 = vld [vmem:[%s8454_s2 + $0x248] sm:$0xf]  ;;  %v5953_v38 = vld [vmem:[%s8454_s2 + $0x26c] sm:$0xf0]  ;;  %v5948_v42 = vld [vmem:[%s8454_s2 + $0x24c] sm:$0xf]  ;;  %v4582_v48 = vor.u32 %v5957_v35, %v4579_v36 }
  0x40   :  { %1066 = vmatpush.bf16.msrb.mxu0 %v4250_v6  ;;  %v4657_v6 = vld [vmem:[%s8454_s2 + $0x330] sm:$0xf]  ;;  %v4547_v43 = vld [vmem:[%s8454_s2 + $0x270] sm:$0xf0]  ;;  %v6028_v46 = vld [vmem:[%s8454_s2 + $0x4cc] sm:$0xf]  ;;  %v4546_v49 = vor.u32 %v5953_v38, %v4545_v37 }
  0x41   :  { %1079 = vmatpush.bf16.msrb.mxu1 %v4570_v10  ;;  %1092 = vmatpush.bf16.msrb.mxu2 %v4254_v11  ;;  %v4339_v10 = vld [vmem:[%s8454_s2 + $0xd8] sm:$0xf0]  ;;  %v5977_v11 = vld [vmem:[%s8454_s2 + $0x334] sm:$0xf]  ;;  %v4825_v55 = vld [vmem:[%s8454_s2 + $0x478] sm:$0xf] }
  0x42   :  { %1105 = vmatpush.bf16.msrb.mxu3 %v4574_v14  ;;  %v4658_v14 = vor.u32 %v5982_v8, %v4657_v6  ;;  %v4662_v19 = vor.u32 %v5977_v11, %v4659_v12  ;;  %v4867_v47 = vld [vmem:[%s8454_s2 + $0x4f0] sm:$0xf0]  ;;  %v6023_v58 = vld [vmem:[%s8454_s2 + $0x49c] sm:$0xf0]  ;;  %v4507_v60 = vld [vmem:[%s8454_s2 + $0x220] sm:$0xf0] }
  0x43   :  { %1067 = vmatmul.bf16.vlgmr.msrb.gmra.mxu0 %v6602_v53  ;;  %v4870_v57 = vor.u32 %v6028_v46, %v4867_v47  ;;  %v6018_v61 = vld [vmem:[%s8454_s2 + $0x47c] sm:$0xf]  ;;  %v4827_v62 = vld [vmem:[%s8454_s2 + $0x4a0] sm:$0xf0]  ;;  %v4826_v0 = vor.u32 %v6023_v58, %v4825_v55  ;;  %v4785_v4 = vld [vmem:[%s8454_s2 + $0x428] sm:$0xf] }
  0x44   :  { %1111 = vmatpush.bf16.msra.mxu0 %v4538_v15  ;;  %1093 = vmatmul.bf16.vlgmr.msrb.gmra.mxu2 %v6602_v53  ;;  %v4342_v15 = vor.u32 %v5897_v9, %v4339_v10  ;;  %v4830_v5 = vor.u32 %v6018_v61, %v4827_v62  ;;  %v6013_v6 = vld [vmem:[%s8454_s2 + $0x44c] sm:$0xf0]  ;;  %v4467_v8 = vld [vmem:[%s8454_s2 + $0x1d0] sm:$0xf0]  ;;  %v6008_v9 = vld [vmem:[%s8454_s2 + $0x42c] sm:$0xf] }
  0x45   :  { %1124 = vmatpush.bf16.msra.mxu1 %v4858_v16  ;;  %1137 = vmatpush.bf16.msra.mxu2 %v4542_v17  ;;  %v4297_v16 = vld [vmem:[%s8454_s2 + $0x60] sm:$0xf]  ;;  %v5892_v17 = vld [vmem:[%s8454_s2 + $0x84] sm:$0xf0]  ;;  %v4787_v10 = vld [vmem:[%s8454_s2 + $0x450] sm:$0xf0]  ;;  %v4786_v12 = vor.u32 %v6013_v6, %v4785_v4 }
  0x46   :  { %1150 = vmatpush.bf16.msra.mxu3 %v4862_v21  ;;  %1080 = vmatmul.bf16.vlgmr.msrb.gmra.mxu1 %v6610_v56  ;;  %v5887_v21 = vld [vmem:[%s8454_s2 + $0x64] sm:$0xf]  ;;  %v4298_v25 = vor.u32 %v5892_v17, %v4297_v16  ;;  %v4745_v16 = vld [vmem:[%s8454_s2 + $0x3d8] sm:$0xf]  ;;  %v4790_v17 = vor.u32 %v6008_v9, %v4787_v10  ;;  %v5993_v30 = vld [vmem:[%s8454_s2 + $0x3ac] sm:$0xf0] }
  0x47   :  { %1106 = vmatmul.bf16.vlgmr.msrb.gmra.mxu3 %v6610_v56  ;;  %v5908_v31 = vld [vmem:[%s8454_s2 + $0x10c] sm:$0xf]  ;;  %v4345_v38 = vld [vmem:[%s8454_s2 + $0xb8] sm:$0xf]  ;;  %v4667_v46 = vld [vmem:[%s8454_s2 + $0x360] sm:$0xf0] }
  0x48   :  { %1112 = vmatpush.bf16.msra.mxu0 %v4498_v27  ;;  %v5882_v27 = vld [vmem:[%s8454_s2 + $0x34] sm:$0xf0]  ;;  %v5973_v55 = vld [vmem:[%s8454_s2 + $0x30c] sm:$0xf0]  ;;  %v4307_v58 = vld [vmem:[%s8454_s2 + $0x90] sm:$0xf0] }
  0x49   :  { %1125 = vmatpush.bf16.msra.mxu1 %v4818_v28  ;;  %1138 = vmatpush.bf16.msra.mxu2 %v4502_v29  ;;  %v4618_v28 = vor.u32 %v5972_v20, %v4617_v18  ;;  %v4302_v29 = vor.u32 %v5887_v21, %v4299_v22  ;;  %v6003_v18 = vld [vmem:[%s8454_s2 + $0x3fc] sm:$0xf0]  ;;  %v4427_v20 = vld [vmem:[%s8454_s2 + $0x180] sm:$0xf0]  ;;  %v5998_v21 = vld [vmem:[%s8454_s2 + $0x3dc] sm:$0xf] }
  0x4a   :  { %1151 = vmatpush.bf16.msra.mxu3 %v4822_v33  ;;  %v4622_v33 = vor.u32 %v5967_v23, %v4619_v24  ;;  %v4747_v22 = vld [vmem:[%s8454_s2 + $0x400] sm:$0xf0]  ;;  %v4746_v24 = vor.u32 %v6003_v18, %v4745_v16  ;;  %v4265_v62 = vld [vmem:[%s8454_s2 + $0x18] sm:$0xf]  ;;  %v5878_v4 = vld [vmem:[%s8454_s2 + $0x1c] sm:$0xf] }
  0x4b   :  { %v4267_v6 = vld [vmem:[%s8454_s2 + $0x40] sm:$0xf0]  ;;  %v4553_v9 = vld [vmem:[%s8454_s2 + $0x250] sm:$0xf]  ;;  %v5954_v10 = vld [vmem:[%s8454_s2 + $0x274] sm:$0xf0] }
  0x4c   :  { %1113 = vmatpush.bf16.msra.mxu0 %v4458_v39  ;;  %v4865_v39 = vld [vmem:[%s8454_s2 + $0x4c8] sm:$0xf]  ;;  %v6029_v18 = vld [vmem:[%s8454_s2 + $0x4d4] sm:$0xf]  ;;  %vm3806_vm11 = vcmask 261120   ;;  %vm3808_vm12 = vcmask 916480  }
  0x4d   :  { %1126 = vmatpush.bf16.msra.mxu1 %v4778_v40  ;;  %1139 = vmatpush.bf16.msra.mxu2 %v4462_v41  ;;  %v4258_v40 = vor.u32 %v5882_v27, %v4257_v26  ;;  %v6033_v41 = vld [vmem:[%s8454_s2 + $0x4ec] sm:$0xf0]  ;;  %v4385_v26 = vld [vmem:[%s8454_s2 + $0x108] sm:$0xf]  ;;  %vm4020_vm13 = vcmask 785408  }
  0x4e   :  { %1152 = vmatpush.bf16.msra.mxu3 %v4782_v45  ;;  %v4262_v45 = vor.u32 %v5877_v32, %v4259_v34  ;;  %v4866_v50 = vor.u32 %v6033_v41, %v4865_v39  ;;  %v5913_v27 = vld [vmem:[%s8454_s2 + $0x12c] sm:$0xf0]  ;;  %v4387_v32 = vld [vmem:[%s8454_s2 + $0x130] sm:$0xf0]  ;;  %v5903_v39 = vld [vmem:[%s8454_s2 + $0xdc] sm:$0xf0] }
  0x4f   :  { %v4707_v34 = vld [vmem:[%s8454_s2 + $0x3b0] sm:$0xf0]  ;;  %v4386_v35 = vor.u32 %v5913_v27, %v4385_v26  ;;  %v4390_v37 = vor.u32 %v5908_v31, %v4387_v32  ;;  %v4346_v47 = vor.u32 %v5903_v39, %v4345_v38  ;;  %v4833_v26 = vld [vmem:[%s8454_s2 + $0x480] sm:$0xf]  ;;  %v6019_v31 = vld [vmem:[%s8454_s2 + $0x484] sm:$0xf] }
  0x50   :  { %1114 = vmatpush.bf16.msra.mxu0 %v4418_v51  ;;  %v4550_v51 = vor.u32 %v5948_v42, %v4547_v43  ;;  %v5983_v42 = vld [vmem:[%s8454_s2 + $0x35c] sm:$0xf0]  ;;  %v5898_v43 = vld [vmem:[%s8454_s2 + $0xbc] sm:$0xf]  ;;  %v4835_v32 = vld [vmem:[%s8454_s2 + $0x4a8] sm:$0xf0] }
  0x51   :  { %1127 = vmatpush.bf16.msra.mxu1 %v4738_v52  ;;  %1140 = vmatpush.bf16.msra.mxu2 %v4422_v54  ;;  %v4505_v52 = vld [vmem:[%s8454_s2 + $0x1f8] sm:$0xf]  ;;  %v5943_v54 = vld [vmem:[%s8454_s2 + $0x21c] sm:$0xf0]  ;;  %v4793_v38 = vld [vmem:[%s8454_s2 + $0x430] sm:$0xf]  ;;  %v4838_v39 = vor.u32 %v6019_v31, %v4835_v32 }
  0x52   :  { %1153 = vmatpush.bf16.msra.mxu3 %v4742_v59  ;;  %v5938_v59 = vld [vmem:[%s8454_s2 + $0x1fc] sm:$0xf]  ;;  %v4506_v63 = vor.u32 %v5943_v54, %v4505_v52  ;;  %v4625_v52 = vld [vmem:[%s8454_s2 + $0x2e8] sm:$0xf] }
  0x54   :  { %1115 = vmatpush.bf16.msra.mxu0 %v4378_v1  ;;  %v4510_v1 = vor.u32 %v5938_v59, %v4507_v60  ;;  %v5968_v59 = vld [vmem:[%s8454_s2 + $0x2ec] sm:$0xf]  ;;  %v4627_v60 = vld [vmem:[%s8454_s2 + $0x310] sm:$0xf0] }
  0x55   :  { %1128 = vmatpush.bf16.msra.mxu1 %v4698_v2  ;;  %1141 = vmatpush.bf16.msra.mxu2 %v4382_v3  ;;  %v4465_v2 = vld [vmem:[%s8454_s2 + $0x1a8] sm:$0xf]  ;;  %v5933_v3 = vld [vmem:[%s8454_s2 + $0x1cc] sm:$0xf0] }
  0x56   :  { %1154 = vmatpush.bf16.msra.mxu3 %v4702_v7  ;;  %v5928_v7 = vld [vmem:[%s8454_s2 + $0x1ac] sm:$0xf]  ;;  %v4466_v11 = vor.u32 %v5933_v3, %v4465_v2  ;;  %v4585_v2 = vld [vmem:[%s8454_s2 + $0x298] sm:$0xf]  ;;  %v5963_v3 = vld [vmem:[%s8454_s2 + $0x2bc] sm:$0xf0] }
  0x57   :  { %v4586_v16 = vor.u32 %v5963_v3, %v4585_v2  ;;  %v5994_v2 = vld [vmem:[%s8454_s2 + $0x3b4] sm:$0xf0]  ;;  %v5909_v3 = vld [vmem:[%s8454_s2 + $0x114] sm:$0xf] }
  0x58   :  { %1116 = vmatpush.bf16.msra.mxu0 %v4338_v13  ;;  %v4470_v13 = vor.u32 %v5928_v7, %v4467_v8  ;;  %v5958_v7 = vld [vmem:[%s8454_s2 + $0x29c] sm:$0xf]  ;;  %v4587_v8 = vld [vmem:[%s8454_s2 + $0x2c0] sm:$0xf0] }
  0x59   :  { %1129 = vmatpush.bf16.msra.mxu1 %v4658_v14  ;;  %1142 = vmatpush.bf16.msra.mxu2 %v4342_v15  ;;  %v4425_v14 = vld [vmem:[%s8454_s2 + $0x158] sm:$0xf]  ;;  %v5923_v15 = vld [vmem:[%s8454_s2 + $0x17c] sm:$0xf0] }
  0x5a   :  { %1155 = vmatpush.bf16.msra.mxu3 %v4662_v19  ;;  %v5918_v19 = vld [vmem:[%s8454_s2 + $0x15c] sm:$0xf]  ;;  %v4426_v23 = vor.u32 %v5923_v15, %v4425_v14  ;;  %v5949_v14 = vld [vmem:[%s8454_s2 + $0x254] sm:$0xf] }
  0x5b   :  { %v4555_v15 = vld [vmem:[%s8454_s2 + $0x278] sm:$0xf0] }
  0x5c   :  { %1117 = vmatpush.bf16.msra.mxu0 %v4298_v25  ;;  %v4430_v25 = vor.u32 %v5918_v19, %v4427_v20  ;;  %v4875_v19 = vld [vmem:[%s8454_s2 + $0x4f8] sm:$0xf0]  ;;  %v4590_v20 = vor.u32 %v5958_v7, %v4587_v8 }
  0x5d   :  { %1130 = vmatpush.bf16.msra.mxu1 %v4618_v28  ;;  %1143 = vmatpush.bf16.msra.mxu2 %v4302_v29  ;;  %v4705_v28 = vld [vmem:[%s8454_s2 + $0x388] sm:$0xf]  ;;  %v4750_v29 = vor.u32 %v5998_v21, %v4747_v22  ;;  %v4554_v21 = vor.u32 %v5954_v10, %v4553_v9  ;;  %v4878_v27 = vor.u32 %v6029_v18, %v4875_v19  ;;  %v4353_v10 = vld [vmem:[%s8454_s2 + $0xc0] sm:$0xf]  ;;  %v4675_v18 = vld [vmem:[%s8454_s2 + $0x368] sm:$0xf0] }
  0x5e   :  { %1156 = vmatpush.bf16.msra.mxu3 %v4622_v33  ;;  %v5988_v33 = vld [vmem:[%s8454_s2 + $0x38c] sm:$0xf]  ;;  %v4706_v36 = vor.u32 %v5993_v30, %v4705_v28  ;;  %v6024_v28 = vld [vmem:[%s8454_s2 + $0x4a4] sm:$0xf0] }
  0x5f   :  { %v4710_v41 = vor.u32 %v5988_v33, %v4707_v34  ;;  %v4515_v30 = vld [vmem:[%s8454_s2 + $0x228] sm:$0xf0]  ;;  %v4834_v34 = vor.u32 %v6024_v28, %v4833_v26  ;;  %v5974_v26 = vld [vmem:[%s8454_s2 + $0x314] sm:$0xf0]  ;;  %v4315_v28 = vld [vmem:[%s8454_s2 + $0x98] sm:$0xf0] }
  0x60   :  { %1118 = vmatpush.bf16.msra.mxu0 %v4258_v40  ;;  %v4665_v40 = vld [vmem:[%s8454_s2 + $0x338] sm:$0xf] }
  0x61   :  { %1131 = vmatpush.bf16.msra.mxu1 %v4578_v44  ;;  %1144 = vmatpush.bf16.msra.mxu2 %v4262_v45  ;;  %v4347_v44 = vld [vmem:[%s8454_s2 + $0xe0] sm:$0xf0]  ;;  %v5978_v45 = vld [vmem:[%s8454_s2 + $0x33c] sm:$0xf] }
  0x62   :  { %1157 = vmatpush.bf16.msra.mxu3 %v4582_v48  ;;  %v4666_v48 = vor.u32 %v5983_v42, %v4665_v40  ;;  %v4670_v54 = vor.u32 %v5978_v45, %v4667_v46  ;;  %v6014_v40 = vld [vmem:[%s8454_s2 + $0x454] sm:$0xf0]  ;;  %v4475_v42 = vld [vmem:[%s8454_s2 + $0x1d8] sm:$0xf0] }
  0x63   :  { %1119 = vmatmul.bf16.vlgmr.msra.gmra.mxu0 %v6602_v53  ;;  %v4794_v46 = vor.u32 %v6014_v40, %v4793_v38  ;;  %v5964_v38 = vld [vmem:[%s8454_s2 + $0x2c4] sm:$0xf0]  ;;  %v4275_v40 = vld [vmem:[%s8454_s2 + $0x48] sm:$0xf0] }
  0x64   :  { %1163 = vmatpush.bf16.msrb.mxu0 %v4546_v49  ;;  %1145 = vmatmul.bf16.vlgmr.msra.gmra.mxu2 %v6602_v53  ;;  %v4350_v49 = vor.u32 %v5898_v43, %v4347_v44  ;;  %v6009_v43 = vld [vmem:[%s8454_s2 + $0x434] sm:$0xf]  ;;  %v4795_v44 = vld [vmem:[%s8454_s2 + $0x458] sm:$0xf0] }
  0x65   :  { %1176 = vmatpush.bf16.msrb.mxu1 %v4866_v50  ;;  %1189 = vmatpush.bf16.msrb.mxu2 %v4550_v51  ;;  %v4305_v50 = vld [vmem:[%s8454_s2 + $0x68] sm:$0xf]  ;;  %v5893_v51 = vld [vmem:[%s8454_s2 + $0x8c] sm:$0xf0] }
  0x66   :  { %1202 = vmatpush.bf16.msrb.mxu3 %v4870_v57  ;;  %1132 = vmatmul.bf16.vlgmr.msra.gmra.mxu1 %v6610_v56  ;;  %v5888_v57 = vld [vmem:[%s8454_s2 + $0x6c] sm:$0xf]  ;;  %v4306_v61 = vor.u32 %v5893_v51, %v4305_v50  ;;  %v4753_v50 = vld [vmem:[%s8454_s2 + $0x3e0] sm:$0xf]  ;;  %v4798_v51 = vor.u32 %v6009_v43, %v4795_v44 }
  0x67   :  { %1158 = vmatmul.bf16.vlgmr.msra.gmra.mxu3 %v6610_v56 }
  0x68   :  { %1164 = vmatpush.bf16.msrb.mxu0 %v4506_v63  ;;  %v5883_v63 = vld [vmem:[%s8454_s2 + $0x3c] sm:$0xf0] }
  0x69   :  { %1177 = vmatpush.bf16.msrb.mxu1 %v4826_v0  ;;  %1190 = vmatpush.bf16.msrb.mxu2 %v4510_v1  ;;  %v4626_v0 = vor.u32 %v5973_v55, %v4625_v52  ;;  %v4310_v1 = vor.u32 %v5888_v57, %v4307_v58  ;;  %v6004_v52 = vld [vmem:[%s8454_s2 + $0x404] sm:$0xf0]  ;;  %v4435_v55 = vld [vmem:[%s8454_s2 + $0x188] sm:$0xf0]  ;;  %v5999_v57 = vld [vmem:[%s8454_s2 + $0x3e4] sm:$0xf] }
  0x6a   :  { %1203 = vmatpush.bf16.msrb.mxu3 %v4830_v5  ;;  %v4630_v5 = vor.u32 %v5968_v59, %v4627_v60  ;;  %v4755_v58 = vld [vmem:[%s8454_s2 + $0x408] sm:$0xf0]  ;;  %v4754_v60 = vor.u32 %v6004_v52, %v4753_v50  ;;  %v6049_v50 = vld [vmem:[%s8456_s6 + $0x70] sm:$0xff] }
  0x6b   :  { %v6048_v52 = vld [vmem:[%s8456_s6 + $0x68] sm:$0xff] }
  0x6c   :  { %1165 = vmatpush.bf16.msrb.mxu0 %v4466_v11  ;;  %v4873_v11 = vld [vmem:[%s8454_s2 + $0x4d0] sm:$0xf] }
  0x6d   :  { %1178 = vmatpush.bf16.msrb.mxu1 %v4786_v12  ;;  %1191 = vmatpush.bf16.msrb.mxu2 %v4470_v13  ;;  %v4266_v12 = vor.u32 %v5883_v63, %v4265_v62  ;;  %v6034_v13 = vld [vmem:[%s8454_s2 + $0x4f4] sm:$0xf0]  ;;  %v4393_v62 = vld [vmem:[%s8454_s2 + $0x110] sm:$0xf] }
  0x6e   :  { %1204 = vmatpush.bf16.msrb.mxu3 %v4790_v17  ;;  %v4270_v17 = vor.u32 %v5878_v4, %v4267_v6  ;;  %v4874_v22 = vor.u32 %v6034_v13, %v4873_v11  ;;  %v5914_v63 = vld [vmem:[%s8454_s2 + $0x134] sm:$0xf0]  ;;  %v4395_v4 = vld [vmem:[%s8454_s2 + $0x138] sm:$0xf0]  ;;  %v5904_v11 = vld [vmem:[%s8454_s2 + $0xe4] sm:$0xf0] }
  0x6f   :  { %v4715_v6 = vld [vmem:[%s8454_s2 + $0x3b8] sm:$0xf0]  ;;  %v4394_v7 = vor.u32 %v5914_v63, %v4393_v62  ;;  %v4398_v9 = vor.u32 %v5909_v3, %v4395_v4  ;;  %v4354_v19 = vor.u32 %v5904_v11, %v4353_v10  ;;  %v6045_v11 = vld [vmem:[%s8456_s6 + $0x50] sm:$0xff] }
  0x70   :  { %1166 = vmatpush.bf16.msrb.mxu0 %v4426_v23  ;;  %v4558_v23 = vor.u32 %v5949_v14, %v4555_v15  ;;  %v5984_v14 = vld [vmem:[%s8454_s2 + $0x364] sm:$0xf0]  ;;  %v5899_v15 = vld [vmem:[%s8454_s2 + $0xc4] sm:$0xf]  ;;  %v6046_v62 = vld [vmem:[%s8456_s6 + $0x58] sm:$0xff] }
  0x71   :  { %1179 = vmatpush.bf16.msrb.mxu1 %v4746_v24  ;;  %1192 = vmatpush.bf16.msrb.mxu2 %v4430_v25  ;;  %v4513_v24 = vld [vmem:[%s8454_s2 + $0x200] sm:$0xf]  ;;  %v5944_v25 = vld [vmem:[%s8454_s2 + $0x224] sm:$0xf0]  ;;  %v6058_v3 = vld [vmem:[%s8456_s6 + $0xb8] sm:$0xff] }
  0x72   :  { %1205 = vmatpush.bf16.msrb.mxu3 %v4750_v29  ;;  %v5939_v29 = vld [vmem:[%s8454_s2 + $0x204] sm:$0xf]  ;;  %v4514_v33 = vor.u32 %v5944_v25, %v4513_v24  ;;  %v4633_v24 = vld [vmem:[%s8454_s2 + $0x2f0] sm:$0xf] }
  0x73   :  { %v4634_v32 = vor.u32 %v5974_v26, %v4633_v24  ;;  %v6044_v24 = vld [vmem:[%s8456_s6 + $0x48] sm:$0xff] }
  0x74   :  { %1167 = vmatpush.bf16.msrb.mxu0 %v4386_v35  ;;  %v4518_v35 = vor.u32 %v5939_v29, %v4515_v30  ;;  %v5969_v29 = vld [vmem:[%s8454_s2 + $0x2f4] sm:$0xf]  ;;  %v4635_v30 = vld [vmem:[%s8454_s2 + $0x318] sm:$0xf0] }
  0x75   :  { %1180 = vmatpush.bf16.msrb.mxu1 %v4706_v36  ;;  %1193 = vmatpush.bf16.msrb.mxu2 %v4390_v37  ;;  %v4473_v36 = vld [vmem:[%s8454_s2 + $0x1b0] sm:$0xf]  ;;  %v5934_v37 = vld [vmem:[%s8454_s2 + $0x1d4] sm:$0xf0] }
  0x76   :  { %1206 = vmatpush.bf16.msrb.mxu3 %v4710_v41  ;;  %v5929_v41 = vld [vmem:[%s8454_s2 + $0x1b4] sm:$0xf]  ;;  %v4474_v45 = vor.u32 %v5934_v37, %v4473_v36  ;;  %v4593_v36 = vld [vmem:[%s8454_s2 + $0x2a0] sm:$0xf]  ;;  %v4638_v37 = vor.u32 %v5969_v29, %v4635_v30  ;;  %v6056_v30 = vld [vmem:[%s8456_s6 + $0xa8] sm:$0xff] }
  0x77   :  { %v4594_v44 = vor.u32 %v5964_v38, %v4593_v36  ;;  %v6043_v36 = vld [vmem:[%s8456_s6 + $0x40] sm:$0xff] }
  0x78   :  { %1168 = vmatpush.bf16.msrb.mxu0 %v4346_v47  ;;  %v4478_v47 = vor.u32 %v5929_v41, %v4475_v42  ;;  %v5959_v41 = vld [vmem:[%s8454_s2 + $0x2a4] sm:$0xf]  ;;  %v4595_v42 = vld [vmem:[%s8454_s2 + $0x2c8] sm:$0xf0] }
  0x79   :  { %1181 = vmatpush.bf16.msrb.mxu1 %v4666_v48  ;;  %1194 = vmatpush.bf16.msrb.mxu2 %v4350_v49  ;;  %v4433_v48 = vld [vmem:[%s8454_s2 + $0x160] sm:$0xf]  ;;  %v5924_v49 = vld [vmem:[%s8454_s2 + $0x184] sm:$0xf0] }
  0x7a   :  { %1207 = vmatpush.bf16.msrb.mxu3 %v4670_v54  ;;  %v5919_v54 = vld [vmem:[%s8454_s2 + $0x164] sm:$0xf]  ;;  %v4434_v59 = vor.u32 %v5924_v49, %v4433_v48  ;;  %v6050_v48 = vld [vmem:[%s8456_s6 + $0x78] sm:$0xff]  ;;  %v6041_v49 = vld [vmem:[%s8456_s6 + $0x30] sm:$0xff] }
  0x7c   :  { %1169 = vmatpush.bf16.msrb.mxu0 %v4306_v61  ;;  %v4438_v61 = vor.u32 %v5919_v54, %v4435_v55  ;;  %v6039_v55 = vld [vmem:[%s8456_s6 + $0x20] sm:$0xff] }
  0x7d   :  { %1182 = vmatpush.bf16.msrb.mxu1 %v4626_v0  ;;  %1195 = vmatpush.bf16.msrb.mxu2 %v4310_v1  ;;  %v4713_v0 = vld [vmem:[%s8454_s2 + $0x390] sm:$0xf]  ;;  %v4758_v1 = vor.u32 %v5999_v57, %v4755_v58 }
  0x7e   :  { %1208 = vmatpush.bf16.msrb.mxu3 %v4630_v5  ;;  %v5989_v5 = vld [vmem:[%s8454_s2 + $0x394] sm:$0xf]  ;;  %v4714_v8 = vor.u32 %v5994_v2, %v4713_v0 }
  0x7f   :  { %v4718_v13 = vor.u32 %v5989_v5, %v4715_v6 }
  0x80   :  { %1170 = vmatpush.bf16.msrb.mxu0 %v4266_v12  ;;  %v4673_v12 = vld [vmem:[%s8454_s2 + $0x340] sm:$0xf] }
  0x81   :  { %1183 = vmatpush.bf16.msrb.mxu1 %v4586_v16  ;;  %1196 = vmatpush.bf16.msrb.mxu2 %v4270_v17  ;;  %v4355_v16 = vld [vmem:[%s8454_s2 + $0xe8] sm:$0xf0]  ;;  %v5979_v17 = vld [vmem:[%s8454_s2 + $0x344] sm:$0xf] }
  0x82   :  { %1209 = vmatpush.bf16.msrb.mxu3 %v4590_v20  ;;  %v4674_v20 = vor.u32 %v5984_v14, %v4673_v12  ;;  %v4678_v25 = vor.u32 %v5979_v17, %v4675_v18  ;;  %v6066_v12 = vld [vmem:[%s8456_s6 + $0xf8] sm:$0xff]  ;;  %v6057_v17 = vld [vmem:[%s8456_s6 + $0xb0] sm:$0xff] }
  0x83   :  { %1171 = vmatmul.bf16.vlgmr.msrb.gmra.mxu0 %v6602_v53 }
  0x84   :  { %1215 = vmatpush.bf16.msra.mxu0 %v4554_v21  ;;  %1197 = vmatmul.bf16.vlgmr.msrb.gmra.mxu2 %v6602_v53  ;;  %v4358_v21 = vor.u32 %v5899_v15, %v4355_v16 }
  0x85   :  { %1228 = vmatpush.bf16.msra.mxu1 %v4874_v22  ;;  %1241 = vmatpush.bf16.msra.mxu2 %v4558_v23  ;;  %v4313_v22 = vld [vmem:[%s8454_s2 + $0x70] sm:$0xf]  ;;  %v5894_v23 = vld [vmem:[%s8454_s2 + $0x94] sm:$0xf0] }
  0x86   :  { %1254 = vmatpush.bf16.msra.mxu3 %v4878_v27  ;;  %1184 = vmatmul.bf16.vlgmr.msrb.gmra.mxu1 %v6610_v56  ;;  %v5889_v27 = vld [vmem:[%s8454_s2 + $0x74] sm:$0xf]  ;;  %v4314_v31 = vor.u32 %v5894_v23, %v4313_v22 }
  0x87   :  { %1210 = vmatmul.bf16.vlgmr.msrb.gmra.mxu3 %v6610_v56 }
  0x88   :  { %1216 = vmatpush.bf16.msra.mxu0 %v4514_v33  ;;  %v4318_v33 = vor.u32 %v5889_v27, %v4315_v28 }
  0x89   :  { %1229 = vmatpush.bf16.msra.mxu1 %v4834_v34  ;;  %1242 = vmatpush.bf16.msra.mxu2 %v4518_v35  ;;  %v4273_v34 = vld [vmem:[%s8454_s2 + $0x20] sm:$0xf]  ;;  %v5884_v35 = vld [vmem:[%s8454_s2 + $0x44] sm:$0xf0] }
  0x8a   :  { %1255 = vmatpush.bf16.msra.mxu3 %v4838_v39  ;;  %v5879_v39 = vld [vmem:[%s8454_s2 + $0x24] sm:$0xf]  ;;  %v4274_v43 = vor.u32 %v5884_v35, %v4273_v34 }
  0x8c   :  { %1217 = vmatpush.bf16.msra.mxu0 %v4474_v45  ;;  %v4278_v45 = vor.u32 %v5879_v39, %v4275_v40  ;;  %v6055_v40 = vld [vmem:[%s8456_s6 + $0xa0] sm:$0xff] }
  0x8d   :  { %1230 = vmatpush.bf16.msra.mxu1 %v4794_v46  ;;  %1243 = vmatpush.bf16.msra.mxu2 %v4478_v47  ;;  %v4598_v46 = vor.u32 %v5959_v41, %v4595_v42  ;;  %v6042_v47 = vld [vmem:[%s8456_s6 + $0x38] sm:$0xff]  ;;  %v6063_v41 = vld [vmem:[%s8456_s6 + $0xe0] sm:$0xff] }
  0x8e   :  { %1256 = vmatpush.bf16.msra.mxu3 %v4798_v51  ;;  %v6040_v51 = vld [vmem:[%s8456_s6 + $0x28] sm:$0xff] }
  0x90   :  { %1218 = vmatpush.bf16.msra.mxu0 %v4434_v59 }
  0x91   :  { %1231 = vmatpush.bf16.msra.mxu1 %v4754_v60  ;;  %1244 = vmatpush.bf16.msra.mxu2 %v4438_v61  ;;  %v6038_v60 = vld [vmem:[%s8456_s6 + $0x18] sm:$0xff] }
  0x92   :  { %1257 = vmatpush.bf16.msra.mxu3 %v4758_v1 }
  0x94   :  { %1219 = vmatpush.bf16.msra.mxu0 %v4394_v7  ;;  %v6037_v7 = vld [vmem:[%s8456_s6 + $0x10] sm:$0xff] }
  0x95   :  { %1232 = vmatpush.bf16.msra.mxu1 %v4714_v8  ;;  %1245 = vmatpush.bf16.msra.mxu2 %v4398_v9 }
  0x96   :  { %1258 = vmatpush.bf16.msra.mxu3 %v4718_v13 }
  0x98   :  { %1220 = vmatpush.bf16.msra.mxu0 %v4354_v19  ;;  %v6036_v19 = vld [vmem:[%s8456_s6 + $0x8] sm:$0xff] }
  0x99   :  { %1233 = vmatpush.bf16.msra.mxu1 %v4674_v20  ;;  %1246 = vmatpush.bf16.msra.mxu2 %v4358_v21 }
  0x9a   :  { %1259 = vmatpush.bf16.msra.mxu3 %v4678_v25  ;;  %v6065_v25 = vld [vmem:[%s8456_s6 + $0xf0] sm:$0xff] }
  0x9c   :  { %1221 = vmatpush.bf16.msra.mxu0 %v4314_v31  ;;  %v6035_v31 = vld [vmem:[%s8456_s6] sm:$0xff] }
  0x9d   :  { %1234 = vmatpush.bf16.msra.mxu1 %v4634_v32  ;;  %1247 = vmatpush.bf16.msra.mxu2 %v4318_v33 }
  0x9e   :  { %1260 = vmatpush.bf16.msra.mxu3 %v4638_v37  ;;  %v6064_v37 = vld [vmem:[%s8456_s6 + $0xe8] sm:$0xff] }
  0xa0   :  { %1222 = vmatpush.bf16.msra.mxu0 %v4274_v43  ;;  %v1016_v54 = vpop.f32.mrf.mxu0 }
  0xa1   :  { %1235 = vmatpush.bf16.msra.mxu1 %v4594_v44  ;;  %1248 = vmatpush.bf16.msra.mxu2 %v4278_v45  ;;  %v6054_v44 = vld [vmem:[%s8456_s6 + $0x98] sm:$0xff] }
  0xa2   :  { %1261 = vmatpush.bf16.msra.mxu3 %v4598_v46  ;;  %v6062_v46 = vld [vmem:[%s8456_s6 + $0xd8] sm:$0xff] }
  0xa3   :  { %1223 = vmatmul.bf16.vlgmr.msra.gmra.mxu0 %v6602_v53  ;;  %v1029_v57 = vpop.f32.mrf.mxu1 }
  0xa4   :  { %2178 = vmatpush.bf16.msrb.mxu0 %v6042_v47  ;;  %1236 = vmatmul.bf16.vlgmr.msra.gmra.mxu1 %v6610_v56 }
  0xa5   :  { %2191 = vmatpush.bf16.msrb.mxu1 %v6050_v48  ;;  %1249 = vmatmul.bf16.vlgmr.msra.gmra.mxu2 %v6602_v53  ;;  %v6047_v53 = vld [vmem:[%s8456_s6 + $0x60] sm:$0xff]  ;;  %v6053_v48 = vld [vmem:[%s8456_s6 + $0x90] sm:$0xff] }
  0xa6   :  { %1262 = vmatmul.bf16.vlgmr.msra.gmra.mxu3 %v6610_v56  ;;  %v7376_v56 = vadd.f32 %v1029_v57, %v1016_v54  ;;  %2204 = vmatpush.bf16.msrb.mxu2 %v6058_v3 }
  0xa7   :  { %v1042_v61 = vpop.f32.mrf.mxu2  ;;  %2217 = vmatpush.bf16.msrb.mxu3 %v6066_v12 }
  0xa8   :  { %2179 = vmatpush.bf16.msrb.mxu0 %v6041_v49  ;;  %v1267_v58 = vrot.slane %v7376_v56, 4  ;;  %v1327_v59 = vmul.f32 %v7376_v56, %v7376_v56  ;;  %v1018_v6 = vpop.f32.mrf.mxu0 }
  0xa9   :  { %2192 = vmatpush.bf16.msrb.mxu1 %v6049_v50 }
  0xaa   :  { %v1268_v63 = vadd.f32 %v1267_v58, %v7376_v56  ;;  %v1337_v0 = vrot.slane %v1327_v59, 4  ;;  %v1055_v1 = vpop.f32.mrf.mxu3  ;;  %2205 = vmatpush.bf16.msrb.mxu2 %v6057_v17  ;;  %v6059_v17 = vld [vmem:[%s8456_s6 + $0xc0] sm:$0xff] }
  0xab   :  { %v7388_v2 = vadd.f32 %v1055_v1, %v1042_v61  ;;  %v1031_v10 = vpop.f32.mrf.mxu1  ;;  %2218 = vmatpush.bf16.msrb.mxu3 %v6065_v25  ;;  %v6060_v61 = vld [vmem:[%s8456_s6 + $0xc8] sm:$0xff] }
  0xac   :  { %2180 = vmatpush.bf16.msrb.mxu0 %v6040_v51  ;;  %v1269_v4 = vrot.slane %v1268_v63, 2  ;;  %v1338_v5 = vadd.f32 %v1337_v0, %v1327_v59  ;;  %v6061_v51 = vld [vmem:[%s8456_s6 + $0xd0] sm:$0xff] }
  0xad   :  { %2193 = vmatpush.bf16.msrb.mxu1 %v6048_v52  ;;  %v1273_v8 = vrot.slane %v7388_v2, 4  ;;  %v1328_v9 = vmul.f32 %v7388_v2, %v7388_v2 }
  0xae   :  { %v1270_v13 = vadd.f32 %v1269_v4, %v1268_v63  ;;  %v1339_v14 = vrot.slane %v1338_v5, 2  ;;  %2206 = vmatpush.bf16.msrb.mxu2 %v6056_v30 }
  0xaf   :  { %v1274_v15 = vadd.f32 %v1273_v8, %v7388_v2  ;;  %v1343_v16 = vrot.slane %v1328_v9, 4  ;;  %v1044_v23 = vpop.f32.mrf.mxu2  ;;  %2219 = vmatpush.bf16.msrb.mxu3 %v6064_v37 }
  0xb0   :  { %2181 = vmatpush.bf16.msrb.mxu0 %v6039_v55  ;;  %v1340_v18 = vadd.f32 %v1339_v14, %v1338_v5  ;;  %v1271_v20 = vrot.slane %v1270_v13, 1  ;;  %v6082_v23 = vld [vmem:[%s8456_s6 + $0x178] sm:$0xff] }
  0xb1   :  { %2194 = vmatpush.bf16.msrb.mxu1 %v6047_v53  ;;  %v1275_v21 = vrot.slane %v1274_v15, 2  ;;  %v1344_v22 = vadd.f32 %v1343_v16, %v1328_v9  ;;  %v6052_v53 = vld [vmem:[%s8456_s6 + $0x88] sm:$0xff]  ;;  %v6051_v9 = vld [vmem:[%s8456_s6 + $0x80] sm:$0xff] }
  0xb2   :  { %v1341_v26 = vrot.slane %v1340_v18, 1  ;;  %v1057_v27 = vpop.f32.mrf.mxu3  ;;  %v1272_v32 = vadd.f32 %v1271_v20, %v1270_v13  ;;  %2207 = vmatpush.bf16.msrb.mxu2 %v6055_v40  ;;  %v6072_v40 = vld [vmem:[%s8456_s6 + $0x128] sm:$0xff] }
  0xb3   :  { %v1276_v28 = vadd.f32 %v1275_v21, %v1274_v15  ;;  %v1345_v29 = vrot.slane %v1344_v22, 2  ;;  %2220 = vmatpush.bf16.msrb.mxu3 %v6063_v41  ;;  %v6074_v15 = vld [vmem:[%s8456_s6 + $0x138] sm:$0xff] }
  0xb4   :  { %2182 = vmatpush.bf16.msrb.mxu0 %v6038_v60  ;;  %v1342_v33 = vadd.f32 %v1341_v26, %v1340_v18 }
  0xb5   :  { %2195 = vmatpush.bf16.msrb.mxu1 %v6046_v62  ;;  %v1277_v34 = vrot.slane %v1276_v28, 1  ;;  %v1346_v35 = vadd.f32 %v1345_v29, %v1344_v22  ;;  %v6073_v29 = vld [vmem:[%s8456_s6 + $0x130] sm:$0xff] }
  0xb6   :  { %v1398_v43 = vsel %vm1397_vm0, %v1272_v32, %v1342_v33  ;;  %2208 = vmatpush.bf16.msrb.mxu2 %v6054_v44  ;;  %v6081_v33 = vld [vmem:[%s8456_s6 + $0x170] sm:$0xff] }
  0xb7   :  { %v1278_v38 = vadd.f32 %v1277_v34, %v1276_v28  ;;  %v1347_v39 = vrot.slane %v1346_v35, 1  ;;  %2221 = vmatpush.bf16.msrb.mxu3 %v6062_v46 }
  0xb8   :  { %2183 = vmatpush.bf16.msrb.mxu0 %v6037_v7 }
  0xb9   :  { %2196 = vmatpush.bf16.msrb.mxu1 %v6045_v11  ;;  %v1348_v42 = vadd.f32 %v1347_v39, %v1346_v35 }
  0xba   :  { %2209 = vmatpush.bf16.msrb.mxu2 %v6053_v48  ;;  %v6071_v48 = vld [vmem:[%s8456_s6 + $0x120] sm:$0xff] }
  0xbb   :  { %v1399_v45 = vsel %vm1397_vm0, %v1278_v38, %v1348_v42  ;;  %2222 = vmatpush.bf16.msrb.mxu3 %v6061_v51  ;;  %v6079_v51 = vld [vmem:[%s8456_s6 + $0x160] sm:$0xff] }
  0xbc   :  { %2184 = vmatpush.bf16.msrb.mxu0 %v6036_v19  ;;  %v1568_v47 = vpack.c.bf16 %v1399_v45, %v1398_v43 }
  0xbd   :  { %2197 = vmatpush.bf16.msrb.mxu1 %v6044_v24 }
  0xbe   :  { %v1573_v49 = vunpack.c.l.bf16 %v1568_v47  ;;  %v1574_v50 = vunpack.c.h.bf16 %v1568_v47  ;;  %v1603_v55 = vunpack.c.l.b16 %v1568_v47  ;;  %v1604_v57 = vunpack.c.h.b16 %v1568_v47  ;;  %2210 = vmatpush.bf16.msrb.mxu2 %v6052_v53 }
  0xbf   :  { %2223 = vmatpush.bf16.msrb.mxu3 %v6060_v61 }
  0xc0   :  { %2185 = vmatpush.bf16.msrb.mxu0 %v6035_v31  ;;  %v1583_v52 = vsub.f32 %v1398_v43, %v1573_v49  ;;  %v1584_v54 = vsub.f32 %v1399_v45, %v1574_v50  ;;  %v1068_v58 = vpop.f32.mrf.mxu0  ;;  %v1613_v1 = vpack.c.b16 %v1603_v55, %v1603_v55  ;;  %v1614_v3 = vpack.c.b16 %v1604_v57, %v1604_v57  ;;  %v6080_v43 = vld [vmem:[%s8456_s6 + $0x168] sm:$0xff]  ;;  %v6078_v57 = vld [vmem:[%s8456_s6 + $0x158] sm:$0xff] }
  0xc1   :  { %2198 = vmatpush.bf16.msrb.mxu1 %v6043_v36 }
  0xc2   :  { %v1593_v59 = vpack.c.bf16 %v1584_v54, %v1583_v52  ;;  %2211 = vmatpush.bf16.msrb.mxu2 %v6051_v9  ;;  %v6070_v52 = vld [vmem:[%s8456_s6 + $0x118] sm:$0xff] }
  0xc3   :  { %v1081_v60 = vpop.f32.mrf.mxu1  ;;  %2224 = vmatpush.bf16.msrb.mxu3 %v6059_v17 }
  0xc4   :  { %v7456_v62 = vadd.f32 %v1081_v60, %v1068_v58  ;;  %v1628_v63 = vunpack.c.l.b16 %v1593_v59  ;;  %v1629_v0 = vunpack.c.h.b16 %v1593_v59  ;;  %2230 = vmatpush.bf16.msra.mxu0 %v6074_v15  ;;  %v6069_v59 = vld [vmem:[%s8456_s6 + $0x110] sm:$0xff] }
  0xc5   :  { %2243 = vmatpush.bf16.msra.mxu1 %v6082_v23  ;;  %v6098_v23 = vld [vmem:[%s8456_s6 + $0x1f8] sm:$0xff] }
  0xc6   :  { %v1279_v4 = vrot.slane %v7456_v62, 4  ;;  %v1329_v5 = vmul.f32 %v7456_v62, %v7456_v62  ;;  %v1638_v6 = vpack.c.b16 %v1628_v63, %v1628_v63  ;;  %v1639_v7 = vpack.c.b16 %v1629_v0, %v1629_v0  ;;  %v6077_v63 = vld [vmem:[%s8456_s6 + $0x150] sm:$0xff] }
  0xc7   :  { %v1094_v8 = vpop.f32.mrf.mxu2  ;;  %2269 = vmatpush.bf16.msra.mxu3 %v6098_v23 }
  0xc8   :  { %v1280_v10 = vadd.f32 %v1279_v4, %v7456_v62  ;;  %v1349_v11 = vrot.slane %v1329_v5, 4  ;;  %v1648_v13 = vrot.slane %v1638_v6, 7  ;;  %v1649_v14 = vrot.slane %v1639_v7, 7  ;;  %v1070_v22 = vpop.f32.mrf.mxu0  ;;  %2231 = vmatpush.bf16.msra.mxu0 %v6073_v29  ;;  %v6075_v29 = vld [vmem:[%s8456_s6 + $0x140] sm:$0xff] }
  0xc9   :  { %2244 = vmatpush.bf16.msra.mxu1 %v6081_v33  ;;  %v6090_v22 = vld [vmem:[%s8456_s6 + $0x1b8] sm:$0xff] }
  0xca   :  { %v1107_v12 = vpop.f32.mrf.mxu3  ;;  %v1281_v18 = vrot.slane %v1280_v10, 2  ;;  %v1350_v19 = vadd.f32 %v1349_v11, %v1329_v5  ;;  %v1660_v20 = vsel %vm1397_vm0, %v1613_v1, %v1648_v13  ;;  %v1664_v21 = vsel %vm1397_vm0, %v1614_v3, %v1649_v14  ;;  %v6068_v3 = vld [vmem:[%s8456_s6 + $0x108] sm:$0xff]  ;;  %2256 = vmatpush.bf16.msra.mxu2 %v6090_v22 }
  0xcb   :  { %v7468_v16 = vadd.f32 %v1107_v12, %v1094_v8  ;;  %2186 = vmatmul.bf16.vlgmr.msrb.gmra.mxu0 %v1660_v20  ;;  %2199 = vmatmul.bf16.vlgmr.msrb.gmra.mxu1 %v1664_v21  ;;  %v1083_v26 = vpop.f32.mrf.mxu1  ;;  %v6076_v8 = vld [vmem:[%s8456_s6 + $0x148] sm:$0xff]  ;;  %v6067_v20 = vld [vmem:[%s8456_s6 + $0x100] sm:$0xff] }
  0xcc   :  { %v1282_v27 = vadd.f32 %v1281_v18, %v1280_v10  ;;  %v1351_v28 = vrot.slane %v1350_v19, 2  ;;  %2232 = vmatpush.bf16.msra.mxu0 %v6072_v40  ;;  %v6097_v40 = vld [vmem:[%s8456_s6 + $0x1f0] sm:$0xff] }
  0xcd   :  { %v1285_v24 = vrot.slane %v7468_v16, 4  ;;  %v1330_v25 = vmul.f32 %v7468_v16, %v7468_v16  ;;  %2245 = vmatpush.bf16.msra.mxu1 %v6080_v43  ;;  %2270 = vmatpush.bf16.msra.mxu3 %v6097_v40 }
  0xce   :  { %v1352_v32 = vadd.f32 %v1351_v28, %v1350_v19  ;;  %v1283_v34 = vrot.slane %v1282_v27, 1 }
  0xcf   :  { %v1286_v30 = vadd.f32 %v1285_v24, %v7468_v16  ;;  %v1355_v31 = vrot.slane %v1330_v25, 4  ;;  %v1096_v37 = vpop.f32.mrf.mxu2 }
  0xd0   :  { %v1353_v38 = vrot.slane %v1352_v32, 1  ;;  %v1284_v44 = vadd.f32 %v1283_v34, %v1282_v27  ;;  %2233 = vmatpush.bf16.msra.mxu0 %v6071_v48 }
  0xd1   :  { %v1287_v35 = vrot.slane %v1286_v30, 2  ;;  %v1356_v36 = vadd.f32 %v1355_v31, %v1330_v25  ;;  %2246 = vmatpush.bf16.msra.mxu1 %v6079_v51  ;;  %v6096_v51 = vld [vmem:[%s8456_s6 + $0x1e8] sm:$0xff] }
  0xd2   :  { %v1109_v39 = vpop.f32.mrf.mxu3  ;;  %v1354_v45 = vadd.f32 %v1353_v38, %v1352_v32  ;;  %2271 = vmatpush.bf16.msra.mxu3 %v6096_v51  ;;  %v6113_v51 = vld [vmem:[%s8456_s6 + $0x270] sm:$0xff] }
  0xd3   :  { %v1288_v41 = vadd.f32 %v1287_v35, %v1286_v30  ;;  %v1357_v42 = vrot.slane %v1356_v36, 2  ;;  %v6089_v39 = vld [vmem:[%s8456_s6 + $0x1b0] sm:$0xff] }
  0xd4   :  { %v1400_v55 = vsel %vm1397_vm0, %v1284_v44, %v1354_v45  ;;  %2234 = vmatpush.bf16.msra.mxu0 %v6070_v52  ;;  %2257 = vmatpush.bf16.msra.mxu2 %v6089_v39 }
  0xd5   :  { %v1289_v46 = vrot.slane %v1288_v41, 1  ;;  %v1358_v47 = vadd.f32 %v1357_v42, %v1356_v36  ;;  %2247 = vmatpush.bf16.msra.mxu1 %v6078_v57 }
  0xd7   :  { %v1290_v49 = vadd.f32 %v1289_v46, %v1288_v41  ;;  %v1359_v50 = vrot.slane %v1358_v47, 1 }
  0xd8   :  { %2235 = vmatpush.bf16.msra.mxu0 %v6069_v59 }
  0xd9   :  { %v1360_v54 = vadd.f32 %v1359_v50, %v1358_v47  ;;  %2248 = vmatpush.bf16.msra.mxu1 %v6077_v63  ;;  %v6088_v50 = vld [vmem:[%s8456_s6 + $0x1a8] sm:$0xff]  ;;  %v6095_v63 = vld [vmem:[%s8456_s6 + $0x1e0] sm:$0xff] }
  0xda   :  { %2258 = vmatpush.bf16.msra.mxu2 %v6088_v50  ;;  %2272 = vmatpush.bf16.msra.mxu3 %v6095_v63  ;;  %v6105_v50 = vld [vmem:[%s8456_s6 + $0x230] sm:$0xff]  ;;  %v6112_v63 = vld [vmem:[%s8456_s6 + $0x268] sm:$0xff] }
  0xdb   :  { %v1401_v53 = vsel %vm1397_vm0, %v1290_v49, %v1360_v54 }
  0xdc   :  { %v1569_v58 = vpack.c.bf16 %v1401_v53, %v1400_v55  ;;  %2236 = vmatpush.bf16.msra.mxu0 %v6068_v3  ;;  %v6086_v3 = vld [vmem:[%s8456_s6 + $0x198] sm:$0xff] }
  0xdd   :  { %2249 = vmatpush.bf16.msra.mxu1 %v6076_v8  ;;  %v6085_v8 = vld [vmem:[%s8456_s6 + $0x190] sm:$0xff] }
  0xde   :  { %v1575_v60 = vunpack.c.l.bf16 %v1569_v58  ;;  %v1576_v61 = vunpack.c.h.bf16 %v1569_v58  ;;  %v1605_v4 = vunpack.c.l.b16 %v1569_v58  ;;  %v1606_v5 = vunpack.c.h.b16 %v1569_v58 }
  0xe0   :  { %v1585_v0 = vsub.f32 %v1400_v55, %v1575_v60  ;;  %v1586_v1 = vsub.f32 %v1401_v53, %v1576_v61  ;;  %v1120_v6 = vpop.f32.mrf.mxu0  ;;  %v1615_v13 = vpack.c.b16 %v1605_v4, %v1605_v4  ;;  %v1616_v14 = vpack.c.b16 %v1606_v5, %v1606_v5  ;;  %2237 = vmatpush.bf16.msra.mxu0 %v6067_v20  ;;  %v6087_v61 = vld [vmem:[%s8456_s6 + $0x1a0] sm:$0xff]  ;;  %v6094_v4 = vld [vmem:[%s8456_s6 + $0x1d8] sm:$0xff]  ;;  %v6092_v20 = vld [vmem:[%s8456_s6 + $0x1c8] sm:$0xff] }
  0xe1   :  { %2250 = vmatpush.bf16.msra.mxu1 %v6075_v29  ;;  %2259 = vmatpush.bf16.msra.mxu2 %v6087_v61  ;;  %v6083_v29 = vld [vmem:[%s8456_s6 + $0x180] sm:$0xff]  ;;  %v6104_v61 = vld [vmem:[%s8456_s6 + $0x228] sm:$0xff] }
  0xe2   :  { %v1594_v7 = vpack.c.bf16 %v1586_v1, %v1585_v0  ;;  %2273 = vmatpush.bf16.msra.mxu3 %v6094_v4 }
  0xe3   :  { %v1133_v9 = vpop.f32.mrf.mxu1 }
  0xe4   :  { %v7520_v10 = vadd.f32 %v1133_v9, %v1120_v6  ;;  %v1630_v11 = vunpack.c.l.b16 %v1594_v7  ;;  %v1631_v12 = vunpack.c.h.b16 %v1594_v7  ;;  %v6093_v9 = vld [vmem:[%s8456_s6 + $0x1d0] sm:$0xff] }
  0xe5   :  { %2260 = vmatpush.bf16.msra.mxu2 %v6086_v3 }
  0xe6   :  { %v1291_v15 = vrot.slane %v7520_v10, 4  ;;  %v1331_v17 = vmul.f32 %v7520_v10, %v7520_v10  ;;  %v1640_v18 = vpack.c.b16 %v1630_v11, %v1630_v11  ;;  %v1641_v19 = vpack.c.b16 %v1631_v12, %v1631_v12  ;;  %2274 = vmatpush.bf16.msra.mxu3 %v6093_v9  ;;  %v6103_v9 = vld [vmem:[%s8456_s6 + $0x220] sm:$0xff] }
  0xe7   :  { %v1146_v21 = vpop.f32.mrf.mxu2 }
  0xe8   :  { %v1292_v24 = vadd.f32 %v1291_v15, %v7520_v10  ;;  %v1361_v25 = vrot.slane %v1331_v17, 4  ;;  %v1650_v27 = vrot.slane %v1640_v18, 7  ;;  %v1651_v28 = vrot.slane %v1641_v19, 7  ;;  %v1122_v35 = vpop.f32.mrf.mxu0  ;;  %v6084_v19 = vld [vmem:[%s8456_s6 + $0x188] sm:$0xff] }
  0xe9   :  { %2261 = vmatpush.bf16.msra.mxu2 %v6085_v8 }
  0xea   :  { %v1159_v26 = vpop.f32.mrf.mxu3  ;;  %v1293_v31 = vrot.slane %v1292_v24, 2  ;;  %v1362_v32 = vadd.f32 %v1361_v25, %v1331_v17  ;;  %v1668_v33 = vsel %vm1397_vm0, %v1615_v13, %v1650_v27  ;;  %v1672_v34 = vsel %vm1397_vm0, %v1616_v14, %v1651_v28  ;;  %2275 = vmatpush.bf16.msra.mxu3 %v6092_v20  ;;  %v6110_v20 = vld [vmem:[%s8456_s6 + $0x258] sm:$0xff] }
  0xeb   :  { %v7538_v30 = vadd.f32 %v1159_v26, %v1146_v21  ;;  %2212 = vmatmul.bf16.vlgmr.msrb.gmra.mxu2 %v1668_v33  ;;  %2225 = vmatmul.bf16.vlgmr.msrb.gmra.mxu3 %v1672_v34  ;;  %v1135_v38 = vpop.f32.mrf.mxu1 }
  0xec   :  { %v1294_v41 = vadd.f32 %v1293_v31, %v1292_v24  ;;  %v1363_v42 = vrot.slane %v1362_v32, 2  ;;  %v6091_v31 = vld [vmem:[%s8456_s6 + $0x1c0] sm:$0xff] }
  0xed   :  { %v1297_v36 = vrot.slane %v7538_v30, 4  ;;  %v1332_v37 = vmul.f32 %v7538_v30, %v7538_v30  ;;  %2262 = vmatpush.bf16.msra.mxu2 %v6084_v19  ;;  %v6102_v19 = vld [vmem:[%s8456_s6 + $0x218] sm:$0xff] }
  0xee   :  { %v1364_v45 = vadd.f32 %v1363_v42, %v1362_v32  ;;  %v1295_v46 = vrot.slane %v1294_v41, 1  ;;  %2276 = vmatpush.bf16.msra.mxu3 %v6091_v31  ;;  %v6100_v31 = vld [vmem:[%s8456_s6 + $0x208] sm:$0xff] }
  0xef   :  { %v1298_v43 = vadd.f32 %v1297_v36, %v7538_v30  ;;  %v1367_v44 = vrot.slane %v1332_v37, 4  ;;  %v1148_v49 = vpop.f32.mrf.mxu2  ;;  %v6106_v36 = vld [vmem:[%s8456_s6 + $0x238] sm:$0xff] }
  0xf0   :  { %v1365_v52 = vrot.slane %v1364_v45, 1  ;;  %v1296_v53 = vadd.f32 %v1295_v46, %v1294_v41  ;;  %2282 = vmatpush.bf16.msrb.mxu0 %v6106_v36 }
  0xf1   :  { %v1299_v47 = vrot.slane %v1298_v43, 2  ;;  %v1368_v48 = vadd.f32 %v1367_v44, %v1332_v37  ;;  %v6114_v37 = vld [vmem:[%s8456_s6 + $0x278] sm:$0xff]  ;;  %2263 = vmatpush.bf16.msra.mxu2 %v6083_v29 }
  0xf2   :  { %v1161_v54 = vpop.f32.mrf.mxu3  ;;  %v1366_v58 = vadd.f32 %v1365_v52, %v1364_v45  ;;  %2295 = vmatpush.bf16.msrb.mxu1 %v6114_v37 }
  0xf3   :  { %v1300_v55 = vadd.f32 %v1299_v47, %v1298_v43  ;;  %v1369_v57 = vrot.slane %v1368_v48, 2 }
  0xf4   :  { %v1402_v6 = vsel %vm1397_vm0, %v1296_v53, %v1366_v58  ;;  %2283 = vmatpush.bf16.msrb.mxu0 %v6105_v50 }
  0xf5   :  { %v1301_v59 = vrot.slane %v1300_v55, 1  ;;  %v1370_v60 = vadd.f32 %v1369_v57, %v1368_v48 }
  0xf6   :  { %2296 = vmatpush.bf16.msrb.mxu1 %v6113_v51 }
  0xf7   :  { %v1302_v0 = vadd.f32 %v1301_v59, %v1300_v55  ;;  %v1371_v1 = vrot.slane %v1370_v60, 1 }
  0xf8   :  { %2284 = vmatpush.bf16.msrb.mxu0 %v6104_v61 }
  0xf9   :  { %v1372_v5 = vadd.f32 %v1371_v1, %v1370_v60 }
  0xfa   :  { %2297 = vmatpush.bf16.msrb.mxu1 %v6112_v63 }
  0xfb   :  { %v1403_v7 = vsel %vm1397_vm0, %v1302_v0, %v1372_v5 }
  0xfc   :  { %v1570_v11 = vpack.c.bf16 %v1403_v7, %v1402_v6  ;;  %2285 = vmatpush.bf16.msrb.mxu0 %v6103_v9 }
  0xfe   :  { %v1577_v12 = vunpack.c.l.bf16 %v1570_v11  ;;  %v1578_v13 = vunpack.c.h.bf16 %v1570_v11  ;;  %v1607_v17 = vunpack.c.l.b16 %v1570_v11  ;;  %v1608_v18 = vunpack.c.h.b16 %v1570_v11  ;;  %v6111_v11 = vld [vmem:[%s8456_s6 + $0x260] sm:$0xff] }
  0xff   :  { %2298 = vmatpush.bf16.msrb.mxu1 %v6111_v11 }
 0x100   :  { %v1587_v14 = vsub.f32 %v1402_v6, %v1577_v12  ;;  %v1588_v15 = vsub.f32 %v1403_v7, %v1578_v13  ;;  %v1172_v21 = vpop.f32.mrf.mxu0  ;;  %v1617_v27 = vpack.c.b16 %v1607_v17, %v1607_v17  ;;  %v1618_v28 = vpack.c.b16 %v1608_v18, %v1608_v18  ;;  %2286 = vmatpush.bf16.msrb.mxu0 %v6102_v19 }
 0x102   :  { %v1595_v22 = vpack.c.bf16 %v1588_v15, %v1587_v14 }
 0x103   :  { %v1185_v23 = vpop.f32.mrf.mxu1  ;;  %2299 = vmatpush.bf16.msrb.mxu1 %v6110_v20 }
 0x104   :  { %v7584_v24 = vadd.f32 %v1185_v23, %v1172_v21  ;;  %v1632_v25 = vunpack.c.l.b16 %v1595_v22  ;;  %v1633_v26 = vunpack.c.h.b16 %v1595_v22  ;;  %v6101_v23 = vld [vmem:[%s8456_s6 + $0x210] sm:$0xff] }
 0x105   :  { %2287 = vmatpush.bf16.msrb.mxu0 %v6101_v23 }
 0x106   :  { %v1303_v32 = vrot.slane %v7584_v24, 4  ;;  %v1333_v33 = vmul.f32 %v7584_v24, %v7584_v24  ;;  %v1642_v34 = vpack.c.b16 %v1632_v25, %v1632_v25  ;;  %v1643_v35 = vpack.c.b16 %v1633_v26, %v1633_v26  ;;  %v6109_v25 = vld [vmem:[%s8456_s6 + $0x250] sm:$0xff] }
 0x107   :  { %v1198_v38 = vpop.f32.mrf.mxu2  ;;  %2300 = vmatpush.bf16.msrb.mxu1 %v6109_v25 }
 0x108   :  { %v1304_v39 = vadd.f32 %v1303_v32, %v7584_v24  ;;  %v1373_v40 = vrot.slane %v1333_v33, 4  ;;  %v1652_v42 = vrot.slane %v1642_v34, 7  ;;  %v1653_v43 = vrot.slane %v1643_v35, 7  ;;  %v1174_v49 = vpop.f32.mrf.mxu0  ;;  %v6108_v32 = vld [vmem:[%s8456_s6 + $0x248] sm:$0xff] }
 0x109   :  { %2288 = vmatpush.bf16.msrb.mxu0 %v6100_v31 }
 0x10a   :  { %v1211_v41 = vpop.f32.mrf.mxu3  ;;  %v1305_v45 = vrot.slane %v1304_v39, 2  ;;  %v1374_v46 = vadd.f32 %v1373_v40, %v1333_v33  ;;  %v1676_v47 = vsel %vm1397_vm0, %v1617_v27, %v1652_v42  ;;  %v1680_v48 = vsel %vm1397_vm0, %v1618_v28, %v1653_v43  ;;  %v6107_v40 = vld [vmem:[%s8456_s6 + $0x240] sm:$0xff] }
 0x10b   :  { %v7602_v44 = vadd.f32 %v1211_v41, %v1198_v38  ;;  %2238 = vmatmul.bf16.vlgmr.msra.gmra.mxu0 %v1676_v47  ;;  %2251 = vmatmul.bf16.vlgmr.msra.gmra.mxu1 %v1680_v48  ;;  %v1187_v55 = vpop.f32.mrf.mxu1 }
 0x10c   :  { %v1306_v57 = vadd.f32 %v1305_v45, %v1304_v39  ;;  %v1375_v53 = vrot.slane %v1374_v46, 2  ;;  %2301 = vmatpush.bf16.msrb.mxu1 %v6108_v32  ;;  %v6099_v39 = vld [vmem:[%s8456_s6 + $0x200] sm:$0xff] }
 0x10d   :  { %v1309_v52 = vrot.slane %v7602_v44, 4  ;;  %v1334_v54 = vmul.f32 %v7602_v44, %v7602_v44  ;;  %2289 = vmatpush.bf16.msrb.mxu0 %v6099_v39 }
 0x10e   :  { %v1376_v60 = vadd.f32 %v1375_v53, %v1374_v46  ;;  %v1307_v0 = vrot.slane %v1306_v57, 1 }
 0x10f   :  { %v1310_v58 = vadd.f32 %v1309_v52, %v7602_v44  ;;  %v1379_v59 = vrot.slane %v1334_v54, 4  ;;  %v1200_v4 = vpop.f32.mrf.mxu2 }
 0x110   :  { %v1377_v5 = vrot.slane %v1376_v60, 1  ;;  %v1308_v12 = vadd.f32 %v1307_v0, %v1306_v57  ;;  %2302 = vmatpush.bf16.msrb.mxu1 %v6107_v40 }
 0x111   :  { %v1311_v1 = vrot.slane %v1310_v58, 2  ;;  %v1380_v3 = vadd.f32 %v1379_v59, %v1334_v54 }
 0x112   :  { %v1213_v6 = vpop.f32.mrf.mxu3  ;;  %v1378_v13 = vadd.f32 %v1377_v5, %v1376_v60 }
 0x113   :  { %v1312_v7 = vadd.f32 %v1311_v1, %v1310_v58  ;;  %v1381_v8 = vrot.slane %v1380_v3, 2 }
 0x114   :  { %v1404_v22 = vsel %vm1397_vm0, %v1308_v12, %v1378_v13 }
 0x115   :  { %v1313_v14 = vrot.slane %v1312_v7, 1  ;;  %v1382_v15 = vadd.f32 %v1381_v8, %v1380_v3 }
 0x117   :  { %v1314_v17 = vadd.f32 %v1313_v14, %v1312_v7  ;;  %v1383_v18 = vrot.slane %v1382_v15, 1 }
 0x119   :  { %v1384_v21 = vadd.f32 %v1383_v18, %v1382_v15 }
 0x11b   :  { %v1405_v26 = vsel %vm1397_vm0, %v1314_v17, %v1384_v21 }
 0x11c   :  { %v1571_v27 = vpack.c.bf16 %v1405_v26, %v1404_v22 }
 0x11e   :  { %v1579_v28 = vunpack.c.l.bf16 %v1571_v27  ;;  %v1580_v29 = vunpack.c.h.bf16 %v1571_v27  ;;  %v1609_v41 = vunpack.c.l.b16 %v1571_v27  ;;  %v1610_v42 = vunpack.c.h.b16 %v1571_v27 }
 0x120   :  { %v1224_v33 = vpop.f32.mrf.mxu0  ;;  %v1589_v34 = vsub.f32 %v1404_v22, %v1579_v28  ;;  %v1590_v35 = vsub.f32 %v1405_v26, %v1580_v29  ;;  %v1619_v54 = vpack.c.b16 %v1609_v41, %v1609_v41  ;;  %v1620_v59 = vpack.c.b16 %v1610_v42, %v1610_v42 }
 0x121   :  { %v1237_v36 = vpop.f32.mrf.mxu1 }
 0x122   :  { %v7648_v37 = vadd.f32 %v1237_v36, %v1224_v33  ;;  %v1596_v38 = vpack.c.bf16 %v1590_v35, %v1589_v34 }
 0x124   :  { %v1315_v43 = vrot.slane %v7648_v37, 4  ;;  %v1335_v45 = vmul.f32 %v7648_v37, %v7648_v37  ;;  %v1634_v46 = vunpack.c.l.b16 %v1596_v38  ;;  %v1635_v47 = vunpack.c.h.b16 %v1596_v38 }
 0x126   :  { %v1385_v48 = vrot.slane %v1335_v45, 4  ;;  %v1644_v49 = vpack.c.b16 %v1634_v46, %v1634_v46  ;;  %v1645_v50 = vpack.c.b16 %v1635_v47, %v1635_v47  ;;  %v1316_v51 = vadd.f32 %v1315_v43, %v7648_v37 }
 0x128   :  { %v1250_v52 = vpop.f32.mrf.mxu2  ;;  %v1386_v55 = vadd.f32 %v1385_v48, %v1335_v45  ;;  %v1226_v53 = vpop.f32.mrf.mxu0  ;;  %v1654_v58 = vrot.slane %v1644_v49, 7  ;;  %v1655_v60 = vrot.slane %v1645_v50, 7  ;;  %v1317_v4 = vrot.slane %v1316_v51, 2 }
 0x129   :  { %v1263_v57 = vpop.f32.mrf.mxu3  ;;  %v1239_v63 = vpop.f32.mrf.mxu1 }
 0x12a   :  { %v7660_v61 = vadd.f32 %v1263_v57, %v1250_v52  ;;  %v1387_v0 = vrot.slane %v1386_v55, 2  ;;  %v1684_v1 = vsel %vm1397_vm0, %v1619_v54, %v1654_v58  ;;  %v1688_v3 = vsel %vm1397_vm0, %v1620_v59, %v1655_v60 }
 0x12b   :  { %2264 = vmatmul.bf16.vlgmr.msra.gmra.mxu2 %v1684_v1  ;;  %2277 = vmatmul.bf16.vlgmr.msra.gmra.mxu3 %v1688_v3  ;;  %v1318_v11 = vadd.f32 %v1317_v4, %v1316_v51 }
 0x12c   :  { %v1321_v5 = vrot.slane %v7660_v61, 4  ;;  %v1336_v6 = vmul.f32 %v7660_v61, %v7660_v61  ;;  %v1388_v7 = vadd.f32 %v1387_v0, %v1386_v55 }
 0x12d   :  { %v1319_v20 = vrot.slane %v1318_v11, 1 }
 0x12e   :  { %v1322_v8 = vadd.f32 %v1321_v5, %v7660_v61  ;;  %v1391_v9 = vrot.slane %v1336_v6, 4  ;;  %v1389_v17 = vrot.slane %v1388_v7, 1 }
 0x12f   :  { %v1320_v26 = vadd.f32 %v1319_v20, %v1318_v11 }
 0x130   :  { %v1323_v12 = vrot.slane %v1322_v8, 2  ;;  %v1392_v13 = vadd.f32 %v1391_v9, %v1336_v6  ;;  %v1252_v14 = vpop.f32.mrf.mxu2  ;;  %v1390_v23 = vadd.f32 %v1389_v17, %v1388_v7 }
 0x131   :  { %v1265_v15 = vpop.f32.mrf.mxu3 }
 0x132   :  { %v1324_v18 = vadd.f32 %v1323_v12, %v1322_v8  ;;  %v1393_v19 = vrot.slane %v1392_v13, 2  ;;  %v1406_v29 = vsel %vm1397_vm0, %v1320_v26, %v1390_v23  ;;  %v5361_v23 = vld [vmem:[%s8458_s7 + $0x140] sm:$0xf] }
 0x134   :  { %v1325_v21 = vrot.slane %v1324_v18, 1  ;;  %v1394_v22 = vadd.f32 %v1393_v19, %v1392_v13 }
 0x136   :  { %v1395_v25 = vrot.slane %v1394_v22, 1  ;;  %v1326_v27 = vadd.f32 %v1325_v21, %v1324_v18 }
 0x138   :  { %v1396_v28 = vadd.f32 %v1395_v25, %v1394_v22  ;;  %v6160_v25 = vld [vmem:[%s8458_s7 + $0x164] sm:$0xf0] }
 0x13a   :  { %v1407_v31 = vsel %vm1397_vm0, %v1326_v27, %v1396_v28  ;;  %v5362_v28 = vor.u32 %v6160_v25, %v5361_v23  ;;  %v5201_v25 = vld [vmem:[%s8458_s7] sm:$0xf] }
 0x13b   :  { %v1572_v32 = vpack.c.bf16 %v1407_v31, %v1406_v29 }
 0x13c   :  { %2658 = vmatpush.bf16.msrb.mxu2 %v5362_v28 }
 0x13d   :  { %v1581_v33 = vunpack.c.l.bf16 %v1572_v32  ;;  %v1582_v34 = vunpack.c.h.bf16 %v1572_v32  ;;  %v1611_v39 = vunpack.c.l.b16 %v1572_v32  ;;  %v1612_v41 = vunpack.c.h.b16 %v1572_v32  ;;  %v5377_v32 = vld [vmem:[%s8458_s7 + $0x150] sm:$0xf] }
 0x13f   :  { %v1591_v35 = vsub.f32 %v1406_v29, %v1581_v33  ;;  %v1592_v36 = vsub.f32 %v1407_v31, %v1582_v34  ;;  %v1621_v46 = vpack.c.b16 %v1611_v39, %v1611_v39  ;;  %v1622_v48 = vpack.c.b16 %v1612_v41, %v1612_v41  ;;  %v6155_v29 = vld [vmem:[%s8458_s7 + $0x144] sm:$0xf]  ;;  %v5363_v31 = vld [vmem:[%s8458_s7 + $0x168] sm:$0xf0]  ;;  %v5379_v39 = vld [vmem:[%s8458_s7 + $0x178] sm:$0xf0] }
 0x140   :  { %v5366_v34 = vor.u32 %v6155_v29, %v5363_v31  ;;  %v5203_v29 = vld [vmem:[%s8458_s7 + $0x28] sm:$0xf0]  ;;  %v5369_v31 = vld [vmem:[%s8458_s7 + $0x148] sm:$0xf] }
 0x141   :  { %v1597_v38 = vpack.c.bf16 %v1592_v36, %v1591_v35  ;;  %v6162_v35 = vld [vmem:[%s8458_s7 + $0x174] sm:$0xf0]  ;;  %v6157_v36 = vld [vmem:[%s8458_s7 + $0x154] sm:$0xf] }
 0x142   :  { %2671 = vmatpush.bf16.msrb.mxu3 %v5366_v34  ;;  %v5382_v41 = vor.u32 %v6157_v36, %v5379_v39  ;;  %v5371_v39 = vld [vmem:[%s8458_s7 + $0x170] sm:$0xf0] }
 0x143   :  { %v1636_v40 = vunpack.c.l.b16 %v1597_v38  ;;  %v1637_v42 = vunpack.c.h.b16 %v1597_v38  ;;  %v5378_v38 = vor.u32 %v6162_v35, %v5377_v32  ;;  %v6161_v32 = vld [vmem:[%s8458_s7 + $0x16c] sm:$0xf0] }
 0x144   :  { %2723 = vmatpush.bf16.msra.mxu1 %v5382_v41  ;;  %v5370_v36 = vor.u32 %v6161_v32, %v5369_v31  ;;  %v6126_v31 = vld [vmem:[%s8458_s7 + $0x5c] sm:$0xf] }
 0x145   :  { %v1646_v43 = vpack.c.b16 %v1636_v40, %v1636_v40  ;;  %v1647_v45 = vpack.c.b16 %v1637_v42, %v1637_v42  ;;  %v5321_v42 = vld [vmem:[%s8458_s7 + $0xf0] sm:$0xf]  ;;  %2710 = vmatpush.bf16.msra.mxu0 %v5378_v38  ;;  %v6156_v38 = vld [vmem:[%s8458_s7 + $0x14c] sm:$0xf] }
 0x147   :  { %v1656_v47 = vrot.slane %v1646_v43, 7  ;;  %v1657_v49 = vrot.slane %v1647_v45, 7  ;;  %v6150_v43 = vld [vmem:[%s8458_s7 + $0x114] sm:$0xf0]  ;;  %v6145_v45 = vld [vmem:[%s8458_s7 + $0xf4] sm:$0xf] }
 0x148   :  { %v2187_v52 = vpop.f32.mrf.mxu0  ;;  %v2200_v54 = vpop.f32.mrf.mxu1 }
 0x149   :  { %v1692_v50 = vsel %vm1397_vm0, %v1621_v46, %v1656_v47  ;;  %v1696_v51 = vsel %vm1397_vm0, %v1622_v48, %v1657_v49  ;;  %v2201_v55 = vadd.f32 %v2200_v54, %v2187_v52  ;;  %v5322_v46 = vor.u32 %v6150_v43, %v5321_v42  ;;  %v5323_v47 = vld [vmem:[%s8458_s7 + $0x118] sm:$0xf0]  ;;  %v5337_v48 = vld [vmem:[%s8458_s7 + $0x100] sm:$0xf]  ;;  %v6152_v49 = vld [vmem:[%s8458_s7 + $0x124] sm:$0xf0] }
 0x14a   :  { %2290 = vmatmul.bf16.vlgmr.msrb.gmra.mxu0 %v1692_v50  ;;  %2303 = vmatmul.bf16.vlgmr.msrb.gmra.mxu1 %v1696_v51  ;;  %v5326_v51 = vor.u32 %v6145_v45, %v5323_v47  ;;  %v5338_v52 = vor.u32 %v6152_v49, %v5337_v48  ;;  %v6147_v54 = vld [vmem:[%s8458_s7 + $0x104] sm:$0xf]  ;;  %v5374_v42 = vor.u32 %v6156_v38, %v5371_v39  ;;  %v6122_v43 = vld [vmem:[%s8458_s7 + $0x34] sm:$0xf0]  ;;  %v6117_v45 = vld [vmem:[%s8458_s7 + $0x14] sm:$0xf] }
 0x14b   :  { %2659 = vmatpush.bf16.msrb.mxu2 %v5322_v46  ;;  %v5219_v46 = vld [vmem:[%s8458_s7 + $0x38] sm:$0xf0]  ;;  %v5393_v49 = vld [vmem:[%s8458_s7 + $0x160] sm:$0xf]  ;;  %v5273_v38 = vld [vmem:[%s8458_s7 + $0x70] sm:$0xf] }
 0x14c   :  { %2672 = vmatpush.bf16.msrb.mxu3 %v5326_v51  ;;  %2711 = vmatpush.bf16.msra.mxu0 %v5338_v52  ;;  %v5222_v48 = vor.u32 %v6117_v45, %v5219_v46  ;;  %v6134_v39 = vld [vmem:[%s8458_s7 + $0x94] sm:$0xf0]  ;;  %v5209_v45 = vld [vmem:[%s8458_s7 + $0x8] sm:$0xf]  ;;  %v6121_v46 = vld [vmem:[%s8458_s7 + $0x2c] sm:$0xf0] }
 0x150   :  { %v2189_v57 = vpop.f32.mrf.mxu0  ;;  %v2202_v53 = vpop.f32.mrf.mxu1 }
 0x16e   :  { %v2213_v58 = vpop.f32.mrf.mxu2  ;;  %v2226_v59 = vpop.f32.mrf.mxu3 }
 0x16f   :  { %v2214_v60 = vadd.f32 %v2213_v58, %v2201_v55  ;;  %v5339_v55 = vld [vmem:[%s8458_s7 + $0x128] sm:$0xf0]  ;;  %v5281_v58 = vld [vmem:[%s8458_s7 + $0xa0] sm:$0xf] }
 0x170   :  { %v5342_v57 = vor.u32 %v6147_v54, %v5339_v55  ;;  %v6159_v54 = vld [vmem:[%s8458_s7 + $0x164] sm:$0xf]  ;;  %v5395_v55 = vld [vmem:[%s8458_s7 + $0x188] sm:$0xf0] }
 0x171   :  { %v2227_v63 = vadd.f32 %v2226_v59, %v2214_v60  ;;  %v6140_v59 = vld [vmem:[%s8458_s7 + $0xc4] sm:$0xf0]  ;;  %v6135_v60 = vld [vmem:[%s8458_s7 + $0xa4] sm:$0xf] }
 0x172   :  { %2724 = vmatpush.bf16.msra.mxu1 %v5342_v57  ;;  %v5329_v57 = vld [vmem:[%s8458_s7 + $0xf8] sm:$0xf] }
 0x176   :  { %v2215_v0 = vpop.f32.mrf.mxu2  ;;  %v2228_v1 = vpop.f32.mrf.mxu3 }
 0x177   :  { %v5283_v0 = vld [vmem:[%s8458_s7 + $0xc8] sm:$0xf0]  ;;  %v5297_v1 = vld [vmem:[%s8458_s7 + $0xb0] sm:$0xf] }
 0x188   :  { %v2239_v3 = vpop.f32.mrf.mxu0  ;;  %v2252_v4 = vpop.f32.mrf.mxu1 }
 0x189   :  { %v2240_v12 = vadd.f32 %v2239_v3, %v2227_v63  ;;  %v5282_v63 = vor.u32 %v6140_v59, %v5281_v58  ;;  %v6142_v3 = vld [vmem:[%s8458_s7 + $0xd4] sm:$0xf0]  ;;  %v6151_v58 = vld [vmem:[%s8458_s7 + $0x11c] sm:$0xf0]  ;;  %v6146_v59 = vld [vmem:[%s8458_s7 + $0xfc] sm:$0xf] }
 0x18b   :  { %v2253_v13 = vadd.f32 %v2252_v4, %v2240_v12  ;;  %2660 = vmatpush.bf16.msrb.mxu2 %v5282_v63  ;;  %v6130_v12 = vld [vmem:[%s8458_s7 + $0x74] sm:$0xf0] }
 0x190   :  { %v2241_v5 = vpop.f32.mrf.mxu0  ;;  %v2254_v6 = vpop.f32.mrf.mxu1 }
 0x191   :  { %v5286_v5 = vor.u32 %v6135_v60, %v5283_v0  ;;  %v5298_v6 = vor.u32 %v6142_v3, %v5297_v1  ;;  %v5331_v60 = vld [vmem:[%s8458_s7 + $0x120] sm:$0xf0]  ;;  %v5330_v0 = vor.u32 %v6151_v58, %v5329_v57  ;;  %v5353_v3 = vld [vmem:[%s8458_s7 + $0x110] sm:$0xf] }
 0x192   :  { %v5334_v1 = vor.u32 %v6146_v59, %v5331_v60  ;;  %v6119_v58 = vld [vmem:[%s8458_s7 + $0x24] sm:$0xf]  ;;  %v5235_v59 = vld [vmem:[%s8458_s7 + $0x48] sm:$0xf0] }
 0x193   :  { %2673 = vmatpush.bf16.msrb.mxu3 %v5286_v5  ;;  %2712 = vmatpush.bf16.msra.mxu0 %v5298_v6  ;;  %v6154_v5 = vld [vmem:[%s8458_s7 + $0x134] sm:$0xf0] }
 0x194   :  { %v5354_v6 = vor.u32 %v6154_v5, %v5353_v3 }
 0x1ae   :  { %v2265_v7 = vpop.f32.mrf.mxu2  ;;  %v2278_v8 = vpop.f32.mrf.mxu3 }
 0x1af   :  { %v2266_v14 = vadd.f32 %v2265_v7, %v2253_v13  ;;  %v6137_v7 = vld [vmem:[%s8458_s7 + $0xb4] sm:$0xf] }
 0x1b0   :  { %v6125_v13 = vld [vmem:[%s8458_s7 + $0x54] sm:$0xf] }
 0x1b1   :  { %v2279_v15 = vadd.f32 %v2278_v8, %v2266_v14  ;;  %v5299_v8 = vld [vmem:[%s8458_s7 + $0xd8] sm:$0xf0] }
 0x1b6   :  { %v2267_v9 = vpop.f32.mrf.mxu2  ;;  %v2280_v11 = vpop.f32.mrf.mxu3 }
 0x1b7   :  { %v5302_v9 = vor.u32 %v6137_v7, %v5299_v8  ;;  %v5241_v11 = vld [vmem:[%s8458_s7 + $0x50] sm:$0xf]  ;;  %v6149_v7 = vld [vmem:[%s8458_s7 + $0x114] sm:$0xf]  ;;  %v5355_v8 = vld [vmem:[%s8458_s7 + $0x138] sm:$0xf0] }
 0x1b8   :  { %v5242_v14 = vor.u32 %v6130_v12, %v5241_v11  ;;  %v5289_v12 = vld [vmem:[%s8458_s7 + $0xa8] sm:$0xf] }
 0x1b9   :  { %2725 = vmatpush.bf16.msra.mxu1 %v5302_v9 }
 0x1ba   :  { %2661 = vmatpush.bf16.msrb.mxu2 %v5242_v14 }
 0x1c7   :  { %v2291_v17 = vpop.f32.mrf.mxu0  ;;  %v2304_v18 = vpop.f32.mrf.mxu1 }
 0x1c8   :  { %v2292_v19 = vadd.f32 %v2291_v17, %v2279_v15  ;;  %v5243_v15 = vld [vmem:[%s8458_s7 + $0x78] sm:$0xf0]  ;;  %v5257_v17 = vld [vmem:[%s8458_s7 + $0x60] sm:$0xf] }
 0x1ca   :  { %v2305_v20 = vadd.f32 %v2304_v18, %v2292_v19  ;;  %v6132_v18 = vld [vmem:[%s8458_s7 + $0x84] sm:$0xf0]  ;;  %v5246_v19 = vor.u32 %v6125_v13, %v5243_v15  ;;  %v6141_v13 = vld [vmem:[%s8458_s7 + $0xcc] sm:$0xf0]  ;;  %v6136_v15 = vld [vmem:[%s8458_s7 + $0xac] sm:$0xf] }
 0x1cb   :  { %v5290_v14 = vor.u32 %v6141_v13, %v5289_v12  ;;  %v6158_v12 = vld [vmem:[%s8458_s7 + $0x15c] sm:$0xf]  ;;  %v5387_v13 = vld [vmem:[%s8458_s7 + $0x180] sm:$0xf0] }
 0x1cc   :  { %v2309_v21 = vrot.slane %v2305_v20, 2  ;;  %2674 = vmatpush.bf16.msrb.mxu3 %v5246_v19  ;;  %v2318_v19 = vld [vmem:[%s8457_s10] sm:$0x1] }
 0x1ce   :  { %v2311_v22 = vadd.f32 %v2309_v21, %v2305_v20  ;;  %v5258_v20 = vor.u32 %v6132_v18, %v5257_v17  ;;  %v6127_v21 = vld [vmem:[%s8458_s7 + $0x64] sm:$0xf]  ;;  %v5291_v17 = vld [vmem:[%s8458_s7 + $0xd0] sm:$0xf0]  ;;  %v5313_v18 = vld [vmem:[%s8458_s7 + $0xc0] sm:$0xf] }
 0x1cf   :  { %v2293_v26 = vpop.f32.mrf.mxu0  ;;  %v2306_v27 = vpop.f32.mrf.mxu1 }
 0x1d0   :  { %v7687_v33 = vmul.f32 0.0078125, %v2311_v22  ;;  %v5259_v22 = vld [vmem:[%s8458_s7 + $0x88] sm:$0xf0]  ;;  %v6120_v26 = vld [vmem:[%s8458_s7 + $0x24] sm:$0xf0]  ;;  %2713 = vmatpush.bf16.msra.mxu0 %v5258_v20 }
 0x1d1   :  { %v5262_v23 = vor.u32 %v6127_v21, %v5259_v22  ;;  %v6115_v27 = vld [vmem:[%s8458_s7 + $0x4] sm:$0xf]  ;;  %v5202_v28 = vor.u32 %v6120_v26, %v5201_v25  ;;  %v5294_v21 = vor.u32 %v6136_v15, %v5291_v17  ;;  %v6144_v22 = vld [vmem:[%s8458_s7 + $0xe4] sm:$0xf0]  ;;  %v5315_v25 = vld [vmem:[%s8458_s7 + $0xe8] sm:$0xf0]  ;;  %v5390_v17 = vor.u32 %v6158_v12, %v5387_v13 }
 0x1d2   :  { %v2313_v40 = vmul.f32 %v7687_v33, %v7687_v33  ;;  %v5206_v35 = vor.u32 %v6115_v27, %v5203_v29  ;;  %v5314_v26 = vor.u32 %v6144_v22, %v5313_v18  ;;  %v6131_v29 = vld [vmem:[%s8458_s7 + $0x7c] sm:$0xf0]  ;;  %v5345_v18 = vld [vmem:[%s8458_s7 + $0x108] sm:$0xf]  ;;  %v5347_v22 = vld [vmem:[%s8458_s7 + $0x130] sm:$0xf0] }
 0x1d3   :  { %2726 = vmatpush.bf16.msra.mxu1 %v5262_v23  ;;  %2662 = vmatpush.bf16.msrb.mxu2 %v5202_v28  ;;  %v6139_v23 = vld [vmem:[%s8458_s7 + $0xc4] sm:$0xf]  ;;  %v5249_v28 = vld [vmem:[%s8458_s7 + $0x58] sm:$0xf]  ;;  %v6186_v12 = vld [vmem:[%s8459_s3 + $0xa8] sm:$0xff] }
 0x1d4   :  { %v2315_v50 = vrot.slane %v2313_v40, 7  ;;  %v5217_v40 = vld [vmem:[%s8458_s7 + $0x10] sm:$0xf]  ;;  %2675 = vmatpush.bf16.msrb.mxu3 %v5206_v35  ;;  %v5318_v27 = vor.u32 %v6139_v23, %v5315_v25  ;;  %v5250_v35 = vor.u32 %v6131_v29, %v5249_v28  ;;  %v6138_v28 = vld [vmem:[%s8458_s7 + $0xbc] sm:$0xf]  ;;  %v6194_v13 = vld [vmem:[%s8459_s3 + $0xe8] sm:$0xff] }
 0x1d5   :  { %v5218_v47 = vor.u32 %v6122_v43, %v5217_v40  ;;  %v5274_v43 = vor.u32 %v6134_v39, %v5273_v38  ;;  %v5307_v29 = vld [vmem:[%s8458_s7 + $0xe0] sm:$0xf0]  ;;  %v6128_v38 = vld [vmem:[%s8458_s7 + $0x6c] sm:$0xf]  ;;  %v5267_v39 = vld [vmem:[%s8458_s7 + $0x90] sm:$0xf0] }
 0x1d6   :  { %v2317_v53 = vsub.f32 %v7687_v33, %v2315_v50  ;;  %v6164_v50 = vld [vmem:[%s8458_s7 + $0x184] sm:$0xf0] }
 0x1d7   :  { %2684 = vmatpush.bf16.msra.mxu2 %v5370_v36  ;;  %v5394_v52 = vor.u32 %v6164_v50, %v5393_v49  ;;  %2714 = vmatpush.bf16.msra.mxu0 %v5218_v47  ;;  %v5251_v36 = vld [vmem:[%s8458_s7 + $0x80] sm:$0xf0]  ;;  %v6116_v47 = vld [vmem:[%s8458_s7 + $0xc] sm:$0xf]  ;;  %v5211_v50 = vld [vmem:[%s8458_s7 + $0x30] sm:$0xf0] }
 0x1d8   :  { %v7743_v4 = vadd.f32 1e-05, %v2317_v53  ;;  %2697 = vmatpush.bf16.msra.mxu3 %v5374_v42  ;;  %2727 = vmatpush.bf16.msra.mxu1 %v5222_v48  ;;  %v5398_v53 = vor.u32 %v6159_v54, %v5395_v55  ;;  %v5275_v42 = vld [vmem:[%s8458_s7 + $0x98] sm:$0xf0]  ;;  %v5214_v54 = vor.u32 %v6116_v47, %v5211_v50  ;;  %v5233_v55 = vld [vmem:[%s8458_s7 + $0x20] sm:$0xf] }
 0x1d9   :  { %v6188_v50 = vld [vmem:[%s8459_s3 + $0xb8] sm:$0xff] }
 0x1da   :  { %6291 = vrsqrt.f32 %v7743_v4  ;;  %vm2326_vm2 = vweird.f32 %v7743_v4 }
 0x1db   :  { %2762 = vmatpush.bf16.msrb.mxu0 %v5394_v52  ;;  %2685 = vmatpush.bf16.msra.mxu2 %v5330_v0  ;;  %v5210_v52 = vor.u32 %v6121_v46, %v5209_v45  ;;  %v5238_v0 = vor.u32 %v6119_v58, %v5235_v59  ;;  %v5227_v45 = vld [vmem:[%s8458_s7 + $0x40] sm:$0xf0]  ;;  %v6178_v58 = vld [vmem:[%s8459_s3 + $0x68] sm:$0xff] }
 0x1dc   :  { %2775 = vmatpush.bf16.msrb.mxu1 %v5398_v53  ;;  %2698 = vmatpush.bf16.msra.mxu3 %v5334_v1  ;;  %v6124_v53 = vld [vmem:[%s8458_s7 + $0x44] sm:$0xf0]  ;;  %v6169_v59 = vld [vmem:[%s8459_s3 + $0x20] sm:$0xff] }
 0x1dd   :  { %v5234_v60 = vor.u32 %v6124_v53, %v5233_v55  ;;  %v6187_v55 = vld [vmem:[%s8459_s3 + $0xb0] sm:$0xff]  ;;  %v6170_v53 = vld [vmem:[%s8459_s3 + $0x28] sm:$0xff] }
 0x1df   :  { %2763 = vmatpush.bf16.msrb.mxu0 %v5354_v6  ;;  %2686 = vmatpush.bf16.msra.mxu2 %v5290_v14 }
 0x1e0   :  { %v7794_v34 = vpop.eup %6291  ;;  %2699 = vmatpush.bf16.msra.mxu3 %v5294_v21  ;;  %v6148_v21 = vld [vmem:[%s8458_s7 + $0x10c] sm:$0xf] }
 0x1e1   :  { %v2321_v41 = vmul.f32 %v7794_v34, %v7743_v4  ;;  %vm2327_vm1 = vweird.f32 %v7794_v34  ;;  %v5358_v4 = vor.u32 %v6149_v7, %v5355_v8  ;;  %v5350_v25 = vor.u32 %v6148_v21, %v5347_v22  ;;  %v6184_v21 = vld [vmem:[%s8459_s3 + $0x98] sm:$0xff] }
 0x1e2   :  { %vm7857_vm3 = vmor %vm2326_vm2, %vm2327_vm1  ;;  %v6192_v22 = vld [vmem:[%s8459_s3 + $0xd8] sm:$0xff] }
 0x1e3   :  { %v2322_v51 = vmul.f32 %v7794_v34, %v2321_v41  ;;  %2776 = vmatpush.bf16.msrb.mxu1 %v5358_v4  ;;  %v5254_v41 = vor.u32 %v6126_v31, %v5251_v36  ;;  %2764 = vmatpush.bf16.msrb.mxu0 %v5314_v26  ;;  %v6163_v4 = vld [vmem:[%s8458_s7 + $0x17c] sm:$0xf0]  ;;  %v5305_v26 = vld [vmem:[%s8458_s7 + $0xb8] sm:$0xf]  ;;  %v6133_v36 = vld [vmem:[%s8458_s7 + $0x8c] sm:$0xf0] }
 0x1e4   :  { %2687 = vmatpush.bf16.msra.mxu2 %v5250_v35  ;;  %v5265_v35 = vld [vmem:[%s8458_s7 + $0x68] sm:$0xf] }
 0x1e5   :  { %v2323_v63 = vmul.f32 0.5, %v2322_v51  ;;  %v2334_v51 = vld [vmem:[%s8457_s10 + $0x1] sm:$0x1]  ;;  %2700 = vmatpush.bf16.msra.mxu3 %v5254_v41  ;;  %v5270_v41 = vor.u32 %v6128_v38, %v5267_v39 }
 0x1e6   :  { %v6181_v38 = vld [vmem:[%s8459_s3 + $0x80] sm:$0xff] }
 0x1e7   :  { %v2324_v9 = vsub.f32 1.5, %v2323_v63  ;;  %2777 = vmatpush.bf16.msrb.mxu1 %v5318_v27  ;;  %2765 = vmatpush.bf16.msrb.mxu0 %v5274_v43  ;;  %v6143_v27 = vld [vmem:[%s8458_s7 + $0xdc] sm:$0xf0]  ;;  %v6118_v43 = vld [vmem:[%s8458_s7 + $0x1c] sm:$0xf] }
 0x1e8   :  { %2688 = vmatpush.bf16.msra.mxu2 %v5210_v52  ;;  %v5306_v31 = vor.u32 %v6143_v27, %v5305_v26  ;;  %v5230_v47 = vor.u32 %v6118_v43, %v5227_v45  ;;  %v6171_v52 = vld [vmem:[%s8459_s3 + $0x30] sm:$0xff]  ;;  %v6189_v39 = vld [vmem:[%s8459_s3 + $0xc0] sm:$0xff] }
 0x1e9   :  { %v2325_v20 = vmul.f32 %v7794_v34, %v2324_v9  ;;  %2701 = vmatpush.bf16.msra.mxu3 %v5214_v54  ;;  %v5385_v9 = vld [vmem:[%s8458_s7 + $0x158] sm:$0xf]  ;;  %v6179_v54 = vld [vmem:[%s8459_s3 + $0x70] sm:$0xff] }
 0x1ea   :  { %v5386_v15 = vor.u32 %v6163_v4, %v5385_v9  ;;  %v6212_v9 = vld [vmem:[%s8459_s3 + $0x178] sm:$0xff]  ;;  %v6211_v4 = vld [vmem:[%s8459_s3 + $0x170] sm:$0xff] }
 0x1eb   :  { %v2329_v32 = vsel %vm7857_vm3, %v7794_v34, %v2325_v20  ;;  %v6129_v34 = vld [vmem:[%s8458_s7 + $0x74] sm:$0xf]  ;;  %2766 = vmatpush.bf16.msrb.mxu0 %v5234_v60  ;;  %v6153_v20 = vld [vmem:[%s8458_s7 + $0x12c] sm:$0xf0]  ;;  %v6177_v60 = vld [vmem:[%s8459_s3 + $0x60] sm:$0xff] }
 0x1ec   :  { %v2331_v40 = vrot.slane %v2329_v32, 1  ;;  %v5278_v49 = vor.u32 %v6129_v34, %v5275_v42  ;;  %v5346_v23 = vor.u32 %v6153_v20, %v5345_v18  ;;  %v5310_v32 = vor.u32 %v6138_v28, %v5307_v29  ;;  %v5225_v34 = vld [vmem:[%s8458_s7 + $0x18] sm:$0xf]  ;;  %v6123_v42 = vld [vmem:[%s8458_s7 + $0x3c] sm:$0xf0]  ;;  %v6183_v26 = vld [vmem:[%s8459_s3 + $0x90] sm:$0xff] }
 0x1ed   :  { %v5226_v46 = vor.u32 %v6123_v42, %v5225_v34  ;;  %v6193_v18 = vld [vmem:[%s8459_s3 + $0xe0] sm:$0xff]  ;;  %v6191_v27 = vld [vmem:[%s8459_s3 + $0xd0] sm:$0xff]  ;;  %v6220_v34 = vld [vmem:[%s8459_s3 + $0x1b8] sm:$0xff] }
 0x1ee   :  { %v2333_v48 = vmul.f32 %v2331_v40, %v2318_v19  ;;  %2778 = vmatpush.bf16.msrb.mxu1 %v5278_v49  ;;  %v5266_v40 = vor.u32 %v6133_v36, %v5265_v35  ;;  %v6180_v49 = vld [vmem:[%s8459_s3 + $0x78] sm:$0xff]  ;;  %v6209_v20 = vld [vmem:[%s8459_s3 + $0x160] sm:$0xff]  ;;  %v6199_v28 = vld [vmem:[%s8459_s3 + $0x110] sm:$0xff] }
 0x1ef   :  { %v6207_v29 = vld [vmem:[%s8459_s3 + $0x150] sm:$0xff]  ;;  %v6198_v35 = vld [vmem:[%s8459_s3 + $0x108] sm:$0xff]  ;;  %v6228_v42 = vld [vmem:[%s8459_s3 + $0x1f8] sm:$0xff] }
 0x1f0   :  { %v2335_v57 = vmul.f32 %v2333_v48, %v7687_v33  ;;  %v6206_v36 = vld [vmem:[%s8459_s3 + $0x148] sm:$0xff]  ;;  %v6219_v43 = vld [vmem:[%s8459_s3 + $0x1b0] sm:$0xff] }
 0x1f1   :  { %v6227_v45 = vld [vmem:[%s8459_s3 + $0x1f0] sm:$0xff] }
 0x1f2   :  { %v2336_v63 = vsub.f32 %v2334_v51, %v2335_v57  ;;  %2779 = vmatpush.bf16.msrb.mxu1 %v5238_v0  ;;  %v6196_v51 = vld [vmem:[%s8459_s3 + $0xf8] sm:$0xff]  ;;  %v6195_v57 = vld [vmem:[%s8459_s3 + $0xf0] sm:$0xff] }
 0x1f3   :  { %v6176_v0 = vld [vmem:[%s8459_s3 + $0x58] sm:$0xff] }
 0x1f4   :  { %v2338_v33 = vrot.slane %v2336_v63, 7  ;;  %v6168_v63 = vld [vmem:[%s8459_s3 + $0x18] sm:$0xff] }
 0x1f6   :  { %v2340_v1 = vsel %vm1397_vm0, %v2333_v48, %v2338_v33  ;;  %v6172_v48 = vld [vmem:[%s8459_s3 + $0x38] sm:$0xff]  ;;  %v6167_v33 = vld [vmem:[%s8459_s3 + $0x10] sm:$0xff] }
 0x1f7   :  { %v2391_v3 = vpack.c.bf16 %v2340_v1, %v2340_v1 }
 0x1f9   :  { %v2392_v5 = vunpack.c.l.bf16 %v2391_v3 }
 0x1fb   :  { %v2393_v6 = vsub.f32 %v2340_v1, %v2392_v5  ;;  %v6175_v1 = vld [vmem:[%s8459_s3 + $0x50] sm:$0xff]  ;;  %v6174_v5 = vld [vmem:[%s8459_s3 + $0x48] sm:$0xff] }
 0x1fd   :  { %v2394_v7 = vpack.c.bf16 %v2393_v6, %v2393_v6  ;;  %v6165_v6 = vld [vmem:[%s8459_s3] sm:$0xff] }
 0x1ff   :  { %v2396_v8 = vunpack.c.l.b16 %v2394_v7  ;;  %v6173_v7 = vld [vmem:[%s8459_s3 + $0x40] sm:$0xff] }
 0x201   :  { %v2397_v11 = vpack.c.b16 %v2396_v8, %v2396_v8  ;;  %v6204_v8 = vld [vmem:[%s8459_s3 + $0x138] sm:$0xff] }
 0x203   :  { %v2398_v14 = vrot.slane %v2397_v11, 7  ;;  %v6203_v11 = vld [vmem:[%s8459_s3 + $0x130] sm:$0xff] }
 0x205   :  { %v7961_v19 = vsel %vm1397_vm0, %v2391_v3, %v2398_v14  ;;  %v6166_v3 = vld [vmem:[%s8459_s3 + $0x8] sm:$0xff] }
 0x206   :  { %5399 = vmatmul.msk.bf16.vlgmr.msrb.gmra.mxu2 %vm2652_vm4, %v7961_v19  ;;  %5400 = vmatmul.msk.bf16.vlgmr.msrb.gmra.mxu3 %vm2652_vm4, %v7961_v19  ;;  %v6202_v14 = vld [vmem:[%s8459_s3 + $0x128] sm:$0xff] }
 0x207   :  { %5403 = vmatmul.msk.bf16.vlgmr.msra.gmra.mxu0 %vm2652_vm4, %v7961_v19  ;;  %5404 = vmatmul.msk.bf16.vlgmr.msra.gmra.mxu1 %vm2652_vm4, %v7961_v19 }
 0x208   :  { %2736 = vmatpush.bf16.msrb.mxu2 %v5386_v15  ;;  %2749 = vmatpush.bf16.msrb.mxu3 %v5390_v17  ;;  %v6210_v15 = vld [vmem:[%s8459_s3 + $0x168] sm:$0xff]  ;;  %v6185_v17 = vld [vmem:[%s8459_s3 + $0xa0] sm:$0xff] }
 0x209   :  { %3563 = vmatpush.bf16.msra.mxu0 %v6188_v50  ;;  %3576 = vmatpush.bf16.msra.mxu1 %v6196_v51  ;;  %v6217_v50 = vld [vmem:[%s8459_s3 + $0x1a0] sm:$0xff] }
 0x20a   :  { %v6225_v51 = vld [vmem:[%s8459_s3 + $0x1e0] sm:$0xff] }
 0x20c   :  { %2737 = vmatpush.bf16.msrb.mxu2 %v5346_v23  ;;  %2750 = vmatpush.bf16.msrb.mxu3 %v5350_v25  ;;  %v6200_v23 = vld [vmem:[%s8459_s3 + $0x118] sm:$0xff] }
 0x20d   :  { %3564 = vmatpush.bf16.msra.mxu0 %v6187_v55  ;;  %3577 = vmatpush.bf16.msra.mxu1 %v6195_v57  ;;  %v6208_v25 = vld [vmem:[%s8459_s3 + $0x158] sm:$0xff] }
 0x20e   :  { %v6216_v55 = vld [vmem:[%s8459_s3 + $0x198] sm:$0xff] }
 0x210   :  { %2738 = vmatpush.bf16.msrb.mxu2 %v5306_v31  ;;  %2751 = vmatpush.bf16.msrb.mxu3 %v5310_v32  ;;  %v6182_v31 = vld [vmem:[%s8459_s3 + $0x88] sm:$0xff] }
 0x211   :  { %3565 = vmatpush.bf16.msra.mxu0 %v6186_v12  ;;  %3578 = vmatpush.bf16.msra.mxu1 %v6194_v13  ;;  %v6190_v32 = vld [vmem:[%s8459_s3 + $0xc8] sm:$0xff] }
 0x214   :  { %2739 = vmatpush.bf16.msrb.mxu2 %v5266_v40  ;;  %2752 = vmatpush.bf16.msrb.mxu3 %v5270_v41  ;;  %v6197_v40 = vld [vmem:[%s8459_s3 + $0x100] sm:$0xff] }
 0x215   :  { %3566 = vmatpush.bf16.msra.mxu0 %v6185_v17  ;;  %3579 = vmatpush.bf16.msra.mxu1 %v6193_v18  ;;  %v6205_v41 = vld [vmem:[%s8459_s3 + $0x140] sm:$0xff]  ;;  %v6214_v17 = vld [vmem:[%s8459_s3 + $0x188] sm:$0xff] }
 0x216   :  { %5401 = vmatmul.msk.bf16.vlgmr.msra.gmra.mxu2 %vm2652_vm4, %v7961_v19  ;;  %5402 = vmatmul.msk.bf16.vlgmr.msra.gmra.mxu3 %vm2652_vm4, %v7961_v19 }
 0x217   :  { %5407 = vmatmul.msk.bf16.vlgmr.msrb.gmra.mxu0 %vm2652_vm4, %v7961_v19  ;;  %5408 = vmatmul.msk.bf16.vlgmr.msrb.gmra.mxu1 %vm2652_vm4, %v7961_v19 }
 0x218   :  { %2740 = vmatpush.bf16.msrb.mxu2 %v5226_v46  ;;  %2753 = vmatpush.bf16.msrb.mxu3 %v5230_v47  ;;  %v6218_v46 = vld [vmem:[%s8459_s3 + $0x1a8] sm:$0xff] }
 0x219   :  { %3567 = vmatpush.bf16.msra.mxu0 %v6184_v21  ;;  %3580 = vmatpush.bf16.msra.mxu1 %v6192_v22  ;;  %v6226_v47 = vld [vmem:[%s8459_s3 + $0x1e8] sm:$0xff] }
 0x21c   :  { %3537 = vmatpush.bf16.msra.mxu2 %v6172_v48  ;;  %3550 = vmatpush.bf16.msra.mxu3 %v6180_v49 }
 0x21d   :  { %3568 = vmatpush.bf16.msra.mxu0 %v6183_v26  ;;  %3581 = vmatpush.bf16.msra.mxu1 %v6191_v27  ;;  %v6213_v26 = vld [vmem:[%s8459_s3 + $0x180] sm:$0xff] }
 0x220   :  { %3538 = vmatpush.bf16.msra.mxu2 %v6171_v52  ;;  %3551 = vmatpush.bf16.msra.mxu3 %v6179_v54 }
 0x221   :  { %3569 = vmatpush.bf16.msra.mxu0 %v6182_v31  ;;  %3582 = vmatpush.bf16.msra.mxu1 %v6190_v32  ;;  %v6236_v31 = vld [vmem:[%s8459_s3 + $0x238] sm:$0xff] }
 0x222   :  { %v6244_v32 = vld [vmem:[%s8459_s3 + $0x278] sm:$0xff] }
 0x224   :  { %3539 = vmatpush.bf16.msra.mxu2 %v6170_v53  ;;  %3552 = vmatpush.bf16.msra.mxu3 %v6178_v58  ;;  %v6224_v58 = vld [vmem:[%s8459_s3 + $0x1d8] sm:$0xff] }
 0x225   :  { %3570 = vmatpush.bf16.msra.mxu0 %v6181_v38  ;;  %3583 = vmatpush.bf16.msra.mxu1 %v6189_v39 }
 0x226   :  { %5405 = vmatmul.msk.bf16.vlgmr.msrb.gmra.mxu2 %vm2652_vm4, %v7961_v19  ;;  %5406 = vmatmul.msk.bf16.vlgmr.msrb.gmra.mxu3 %vm2652_vm4, %v7961_v19  ;;  %v6201_v19 = vld [vmem:[%s8459_s3 + $0x120] sm:$0xff] }
 0x228   :  { %3540 = vmatpush.bf16.msra.mxu2 %v6169_v59  ;;  %3553 = vmatpush.bf16.msra.mxu3 %v6177_v60 }
 0x229   :  { %3615 = vmatpush.bf16.msrb.mxu0 %v6220_v34  ;;  %3628 = vmatpush.bf16.msrb.mxu1 %v6228_v42 }
 0x22c   :  { %3541 = vmatpush.bf16.msra.mxu2 %v6168_v63  ;;  %3554 = vmatpush.bf16.msra.mxu3 %v6176_v0 }
 0x22d   :  { %3616 = vmatpush.bf16.msrb.mxu0 %v6219_v43  ;;  %3629 = vmatpush.bf16.msrb.mxu1 %v6227_v45 }
 0x230   :  { %3542 = vmatpush.bf16.msra.mxu2 %v6167_v33  ;;  %3555 = vmatpush.bf16.msra.mxu3 %v6175_v1 }
 0x231   :  { %3617 = vmatpush.bf16.msrb.mxu0 %v6218_v46  ;;  %3630 = vmatpush.bf16.msrb.mxu1 %v6226_v47  ;;  %v6235_v46 = vld [vmem:[%s8459_s3 + $0x230] sm:$0xff] }
 0x234   :  { %3543 = vmatpush.bf16.msra.mxu2 %v6166_v3  ;;  %3556 = vmatpush.bf16.msra.mxu3 %v6174_v5  ;;  %v6215_v3 = vld [vmem:[%s8459_s3 + $0x190] sm:$0xff] }
 0x235   :  { %3618 = vmatpush.bf16.msrb.mxu0 %v6217_v50  ;;  %3631 = vmatpush.bf16.msrb.mxu1 %v6225_v51 }
 0x238   :  { %3544 = vmatpush.bf16.msra.mxu2 %v6165_v6  ;;  %3557 = vmatpush.bf16.msra.mxu3 %v6173_v7  ;;  %v6223_v7 = vld [vmem:[%s8459_s3 + $0x1d0] sm:$0xff] }
 0x239   :  { %3619 = vmatpush.bf16.msrb.mxu0 %v6216_v55  ;;  %3632 = vmatpush.bf16.msrb.mxu1 %v6224_v58  ;;  %v6242_v58 = vld [vmem:[%s8459_s3 + $0x268] sm:$0xff] }
 0x23c   :  { %3589 = vmatpush.bf16.msrb.mxu2 %v6204_v8  ;;  %3602 = vmatpush.bf16.msrb.mxu3 %v6212_v9 }
 0x23d   :  { %3620 = vmatpush.bf16.msrb.mxu0 %v6215_v3  ;;  %3633 = vmatpush.bf16.msrb.mxu1 %v6223_v7 }
 0x240   :  { %3590 = vmatpush.bf16.msrb.mxu2 %v6203_v11  ;;  %3603 = vmatpush.bf16.msrb.mxu3 %v6211_v4 }
 0x241   :  { %3621 = vmatpush.bf16.msrb.mxu0 %v6214_v17 }
 0x244   :  { %3591 = vmatpush.bf16.msrb.mxu2 %v6202_v14  ;;  %3604 = vmatpush.bf16.msrb.mxu3 %v6210_v15 }
 0x245   :  { %3622 = vmatpush.bf16.msrb.mxu0 %v6213_v26 }
 0x248   :  { %3592 = vmatpush.bf16.msrb.mxu2 %v6201_v19  ;;  %3605 = vmatpush.bf16.msrb.mxu3 %v6209_v20 }
 0x24c   :  { %3593 = vmatpush.bf16.msrb.mxu2 %v6200_v23  ;;  %3606 = vmatpush.bf16.msrb.mxu3 %v6208_v25 }
 0x250   :  { %3594 = vmatpush.bf16.msrb.mxu2 %v6199_v28  ;;  %3607 = vmatpush.bf16.msrb.mxu3 %v6207_v29  ;;  %v6221_v29 = vld [vmem:[%s8459_s3 + $0x1c0] sm:$0xff] }
 0x254   :  { %3595 = vmatpush.bf16.msrb.mxu2 %v6198_v35  ;;  %3608 = vmatpush.bf16.msrb.mxu3 %v6206_v36 }
 0x258   :  { %3596 = vmatpush.bf16.msrb.mxu2 %v6197_v40  ;;  %3609 = vmatpush.bf16.msrb.mxu3 %v6205_v41 }
 0x284   :  { %v2716_v48 = vpop.f32.mrf.mxu0  ;;  %v2729_v49 = vpop.f32.mrf.mxu1 }
 0x285   :  { %v2799_v33 = vrot.slane %v2716_v48, 2  ;;  %v2800_v1 = vrot.slane %v2729_v49, 2 }
 0x287   :  { %v2819_v12 = vadd.f32 %v2799_v33, %v2716_v48  ;;  %v2820_v13 = vadd.f32 %v2800_v1, %v2729_v49 }
 0x289   :  { %v2664_v52 = vpop.f32.mrf.mxu2  ;;  %v2677_v54 = vpop.f32.mrf.mxu3  ;;  %v2829_v23 = vperm.slane %v2819_v12, 0  ;;  %v2830_v25 = vperm.slane %v2820_v13, 0  ;;  %v2849_v43 = vperm.slane %v2819_v12, 1  ;;  %v2850_v45 = vperm.slane %v2820_v13, 1 }
 0x28a   :  { %v2795_v57 = vrot.slane %v2664_v52, 2  ;;  %v2796_v53 = vrot.slane %v2677_v54, 2 }
 0x28b   :  { %v2839_v38 = vmul.f32 %v2829_v23, %v7520_v10  ;;  %v2840_v39 = vmul.f32 %v2830_v25, %v7538_v30  ;;  %v6243_v10 = vld [vmem:[%s8459_s3 + $0x270] sm:$0xff] }
 0x28c   :  { %v2815_v59 = vadd.f32 %v2795_v57, %v2664_v52  ;;  %v2816_v60 = vadd.f32 %v2796_v53, %v2677_v54  ;;  %v2718_v63 = vpop.f32.mrf.mxu0  ;;  %v2731_v0 = vpop.f32.mrf.mxu1  ;;  %v6234_v53 = vld [vmem:[%s8459_s3 + $0x228] sm:$0xff] }
 0x28d   :  { %v2859_v50 = vadd.f32 %v2849_v43, %v2839_v38  ;;  %v2860_v51 = vadd.f32 %v2850_v45, %v2840_v39 }
 0x28e   :  { %v2825_v5 = vperm.slane %v2815_v59, 0  ;;  %v2826_v6 = vperm.slane %v2816_v60, 0  ;;  %v2845_v9 = vperm.slane %v2815_v59, 1  ;;  %v2846_v4 = vperm.slane %v2816_v60, 1 }
 0x28f   :  { %v2869_v33 = vmul.f32 0.01, %v2859_v50  ;;  %v2870_v1 = vmul.f32 0.01, %v2860_v51 }
 0x290   :  { %v2835_v8 = vmul.f32 %v2825_v5, %v7376_v56  ;;  %v2836_v11 = vmul.f32 %v2826_v6, %v7388_v2  ;;  %v6222_v56 = vld [vmem:[%s8459_s3 + $0x1c8] sm:$0xff] }
 0x291   :  { %v2666_v14 = vpop.f32.mrf.mxu2  ;;  %v2679_v15 = vpop.f32.mrf.mxu3  ;;  %3634 = vmatpush.bf16.msrb.mxu1 %v6222_v56  ;;  %v2879_v12 = vmax.f32 %v2859_v50, %v2869_v33  ;;  %v2880_v13 = vmax.f32 %v2860_v51, %v2870_v1  ;;  %v6229_v1 = vld [vmem:[%s8459_s3 + $0x200] sm:$0xff] }
 0x292   :  { %v2855_v18 = vadd.f32 %v2845_v9, %v2835_v8  ;;  %v2856_v19 = vadd.f32 %v2846_v4, %v2836_v11  ;;  %v6233_v11 = vld [vmem:[%s8459_s3 + $0x220] sm:$0xff] }
 0x294   :  { %v2865_v20 = vmul.f32 0.01, %v2855_v18  ;;  %v2866_v21 = vmul.f32 0.01, %v2856_v19  ;;  %v2768_v2 = vpop.f32.mrf.mxu0  ;;  %v2781_v22 = vpop.f32.mrf.mxu1 }
 0x295   :  { %3635 = vmatpush.bf16.msrb.mxu1 %v6221_v29  ;;  %v2803_v52 = vrot.slane %v2768_v2, 2  ;;  %v2804_v54 = vrot.slane %v2781_v22, 2  ;;  %v6249_v29 = vld [vmem:[%s8461_s8 + $0x20] sm:$0xff] }
 0x296   :  { %v2875_v27 = vmax.f32 %v2855_v18, %v2865_v20  ;;  %v2876_v28 = vmax.f32 %v2856_v19, %v2866_v21  ;;  %v6232_v20 = vld [vmem:[%s8459_s3 + $0x218] sm:$0xff] }
 0x297   :  { %v2823_v3 = vadd.f32 %v2803_v52, %v2768_v2  ;;  %v2824_v5 = vadd.f32 %v2804_v54, %v2781_v22  ;;  %v6240_v21 = vld [vmem:[%s8459_s3 + $0x258] sm:$0xff]  ;;  %v8259_v2 = vld [vmem:[%s8460_s1 + $0x8] sm:$0xff] }
 0x298   :  { %v3045_v35 = vpack.c.bf16 %v2875_v27, %v2875_v27  ;;  %v3046_v36 = vpack.c.bf16 %v2876_v28, %v2876_v28  ;;  %v3049_v27 = vpack.c.bf16 %v2879_v12, %v2879_v12  ;;  %v3050_v28 = vpack.c.bf16 %v2880_v13, %v2880_v13  ;;  %v6230_v54 = vld [vmem:[%s8459_s3 + $0x208] sm:$0xff]  ;;  %v6245_v13 = vld [vmem:[%s8461_s8] sm:$0xff] }
 0x299   :  { %v2690_v40 = vpop.f32.mrf.mxu2  ;;  %v2703_v41 = vpop.f32.mrf.mxu3  ;;  %v2833_v14 = vperm.slane %v2823_v3, 0  ;;  %v2834_v15 = vperm.slane %v2824_v5, 0 }
 0x29a   :  { %v2797_v34 = vrot.slane %v2690_v40, 2  ;;  %v2798_v42 = vrot.slane %v2703_v41, 2  ;;  %3545 = vmatmul.bf16.vlgmr.msra.gmra.mxu2 %v3045_v35  ;;  %3558 = vmatmul.bf16.vlgmr.msra.gmra.mxu3 %v3046_v36  ;;  %v8269_v36 = vld [vmem:[%s8460_s1] sm:$0xff] }
 0x29b   :  { %3641 = vmatpush.bf16.msra.mxu2 %v6236_v31  ;;  %3654 = vmatpush.bf16.msra.mxu3 %v6244_v32  ;;  %v2843_v22 = vmul.f32 %v2833_v14, %v7648_v37  ;;  %v2844_v23 = vmul.f32 %v2834_v15, %v7660_v61  ;;  %v2853_v31 = vperm.slane %v2823_v3, 1  ;;  %v2854_v37 = vperm.slane %v2824_v5, 1  ;;  %v6237_v3 = vld [vmem:[%s8459_s3 + $0x240] sm:$0xff] }
 0x29c   :  { %v2817_v30 = vadd.f32 %v2797_v34, %v2690_v40  ;;  %v2818_v47 = vadd.f32 %v2798_v42, %v2703_v41  ;;  %v2770_v48 = vpop.f32.mrf.mxu0  ;;  %v2783_v49 = vpop.f32.mrf.mxu1  ;;  %v3676_v61 = vmul.f32 %v8259_v2, %v8259_v2  ;;  %v3670_v38 = vsub.f32 %v8259_v2, %v8269_v36  ;;  %v6231_v34 = vld [vmem:[%s8459_s3 + $0x210] sm:$0xff] }
 0x29d   :  { %v3671_v39 = vmul.f32 %v8269_v36, %v8269_v36  ;;  %v6239_v42 = vld [vmem:[%s8459_s3 + $0x250] sm:$0xff]  ;;  %v2863_v43 = vadd.f32 %v2853_v31, %v2843_v22  ;;  %v2864_v45 = vadd.f32 %v2854_v37, %v2844_v23 }
 0x29e   :  { %v2827_v55 = vperm.slane %v2817_v30, 0  ;;  %v2828_v57 = vperm.slane %v2818_v47, 0  ;;  %v2847_v60 = vperm.slane %v2817_v30, 1  ;;  %v2848_v0 = vperm.slane %v2818_v47, 1  ;;  %3794 = vrot.lane.b32.xlu1 %v3670_v38, %s6301_s22 }
 0x29f   :  { %3642 = vmatpush.bf16.msra.mxu2 %v6235_v46  ;;  %3655 = vmatpush.bf16.msra.mxu3 %v6243_v10  ;;  %v6248_v46 = vld [vmem:[%s8461_s8 + $0x18] sm:$0xff]  ;;  %v3673_v10 = vsel %vm3672_vm5, %v3671_v39, 0.0  ;;  %v3687_v48 = vpack.c.bf16 %v3676_v61, %v3676_v61 }
 0x2a0   :  { %v2837_v59 = vmul.f32 %v2827_v55, %v7456_v62  ;;  %v2838_v63 = vmul.f32 %v2828_v57, %v7468_v16  ;;  %v6241_v62 = vld [vmem:[%s8459_s3 + $0x260] sm:$0xff]  ;;  %3674 = vadd.xlane.f32.xlu0 %v3673_v10  ;;  %v6238_v55 = vld [vmem:[%s8459_s3 + $0x248] sm:$0xff]  ;;  %v2873_v57 = vmul.f32 0.01, %v2863_v43 }
 0x2a1   :  { %v2692_v6 = vpop.f32.mrf.mxu2  ;;  %v2705_v7 = vpop.f32.mrf.mxu3 }
 0x2a2   :  { %v2857_v8 = vadd.f32 %v2847_v60, %v2837_v59  ;;  %v2858_v9 = vadd.f32 %v2848_v0, %v2838_v63  ;;  %v3688_v63 = vunpack.c.l.bf16 %v3687_v48  ;;  %v2883_v5 = vmax.f32 %v2863_v43, %v2873_v57  ;;  %v6246_v7 = vld [vmem:[%s8461_s8 + $0x8] sm:$0xff] }
 0x2a3   :  { %3643 = vmatpush.bf16.msra.mxu2 %v6234_v53  ;;  %3656 = vmatpush.bf16.msra.mxu3 %v6242_v58  ;;  %v2874_v53 = vmul.f32 0.01, %v2864_v45 }
 0x2a4   :  { %v2867_v16 = vmul.f32 0.01, %v2857_v8  ;;  %v2868_v4 = vmul.f32 0.01, %v2858_v9 }
 0x2a5   :  { %v2884_v6 = vmax.f32 %v2864_v45, %v2874_v53  ;;  %v6255_v53 = vld [vmem:[%s8463_s4 + $0x20] sm:$0xff] }
 0x2a6   :  { %v2877_v17 = vmax.f32 %v2857_v8, %v2867_v16  ;;  %v2878_v18 = vmax.f32 %v2858_v9, %v2868_v4  ;;  %v3053_v4 = vpack.c.bf16 %v2883_v5, %v2883_v5 }
 0x2a7   :  { %3644 = vmatpush.bf16.msra.mxu2 %v6233_v11  ;;  %3657 = vmatpush.bf16.msra.mxu3 %v6241_v62  ;;  %v3689_v11 = vsub.f32 %v3676_v61, %v3688_v63  ;;  %v3054_v12 = vpack.c.bf16 %v2884_v6, %v2884_v6 }
 0x2a8   :  { %v3047_v19 = vpack.c.bf16 %v2877_v17, %v2877_v17  ;;  %v3048_v56 = vpack.c.bf16 %v2878_v18, %v2878_v18 }
 0x2a9   :  { %v2742_v25 = vpop.f32.mrf.mxu2  ;;  %v2755_v26 = vpop.f32.mrf.mxu3  ;;  %v3690_v14 = vpack.c.bf16 %v3689_v11, %v3689_v11 }
 0x2aa   :  { %v2801_v32 = vrot.slane %v2742_v25, 2  ;;  %v2802_v35 = vrot.slane %v2755_v26, 2  ;;  %3571 = vmatmul.bf16.vlgmr.msra.gmra.mxu0 %v3047_v19  ;;  %3584 = vmatmul.bf16.vlgmr.msra.gmra.mxu1 %v3048_v56  ;;  %v6284_v19 = vld [vmem:[%s8457_s10 + $0x2] ss:$0 sm:$0xff] }
 0x2ab   :  { %3597 = vmatmul.bf16.vlgmr.msrb.gmra.mxu2 %v3049_v27  ;;  %3610 = vmatmul.bf16.vlgmr.msrb.gmra.mxu3 %v3050_v28  ;;  %v3692_v15 = vunpack.c.l.b16 %v3690_v14 }
 0x2ac   :  { %v2821_v40 = vadd.f32 %v2801_v32, %v2742_v25  ;;  %v2822_v41 = vadd.f32 %v2802_v35, %v2755_v26  ;;  %3645 = vmatpush.bf16.msra.mxu2 %v6232_v20  ;;  %3658 = vmatpush.bf16.msra.mxu3 %v6240_v21 }
 0x2ad   :  { %3733 = vmatpush.bf16.msra.mxu0 %v6249_v29  ;;  %v3693_v17 = vpack.c.b16 %v3692_v15, %v3692_v15 }
 0x2ae   :  { %v2831_v30 = vperm.slane %v2821_v40, 0  ;;  %v2832_v47 = vperm.slane %v2822_v41, 0  ;;  %v2851_v50 = vperm.slane %v2821_v40, 1  ;;  %v2852_v52 = vperm.slane %v2822_v41, 1 }
 0x2af   :  { %v3697_v18 = vsel %vm3694_vm6, %v3687_v48, %v3693_v17  ;;  %v6258_v48 = vld [vmem:[%s8463_s4 + $0x38] sm:$0xff] }
 0x2b0   :  { %v2841_v49 = vmul.f32 %v2831_v30, %v7584_v24  ;;  %v2842_v51 = vmul.f32 %v2832_v47, %v7602_v44  ;;  %3646 = vmatpush.bf16.msra.mxu2 %v6231_v34  ;;  %3659 = vmatpush.bf16.msra.mxu3 %v6239_v42  ;;  %v6247_v24 = vld [vmem:[%s8461_s8 + $0x10] sm:$0xff]  ;;  %v6250_v47 = vld [vmem:[%s8462_s9] sm:$0xff]  ;;  %s6303_s9 = smov 32  }
 0x2b1   :  { %v2744_v58 = vpop.f32.mrf.mxu2  ;;  %v2757_v59 = vpop.f32.mrf.mxu3  ;;  %3734 = vmatpush.bf16.msra.mxu0 %v6248_v46  ;;  %3784 = vmatpush.bf16.msra.mxu1 %v6250_v47  ;;  %v6285_v47 = vld [vmem:[%s8457_s10 + $0x3] ss:$0 sm:$0xff] }
 0x2b2   :  { %v2861_v44 = vadd.f32 %v2851_v50, %v2841_v49  ;;  %v2862_v60 = vadd.f32 %v2852_v52, %v2842_v51  ;;  %v6257_v52 = vld [vmem:[%s8463_s4 + $0x30] sm:$0xff] }
 0x2b4   :  { %v2871_v0 = vmul.f32 0.01, %v2861_v44  ;;  %v2872_v33 = vmul.f32 0.01, %v2862_v60  ;;  %3647 = vmatpush.bf16.msra.mxu2 %v6230_v54  ;;  %3660 = vmatpush.bf16.msra.mxu3 %v6238_v55  ;;  %v6256_v54 = vld [vmem:[%s8463_s4 + $0x28] sm:$0xff] }
 0x2b5   :  { %3735 = vmatpush.bf16.msra.mxu0 %v6247_v24  ;;  %v6254_v24 = vld [vmem:[%s8463_s4 + $0x18] sm:$0xff] }
 0x2b6   :  { %v2881_v8 = vmax.f32 %v2861_v44, %v2871_v0  ;;  %v2882_v9 = vmax.f32 %v2862_v60, %v2872_v33  ;;  %v6253_v44 = vld [vmem:[%s8463_s4 + $0x10] sm:$0xff]  ;;  %v6252_v60 = vld [vmem:[%s8463_s4 + $0x8] sm:$0xff] }
 0x2b8   :  { %3648 = vmatpush.bf16.msra.mxu2 %v6229_v1  ;;  %3661 = vmatpush.bf16.msra.mxu3 %v6237_v3  ;;  %v3051_v62 = vpack.c.bf16 %v2881_v8, %v2881_v8  ;;  %v3052_v16 = vpack.c.bf16 %v2882_v9, %v2882_v9  ;;  %v6251_v1 = vld [vmem:[%s8463_s4] sm:$0xff] }
 0x2b9   :  { %3736 = vmatpush.bf16.msra.mxu0 %v6246_v7 }
 0x2ba   :  { %3623 = vmatmul.bf16.vlgmr.msrb.gmra.mxu0 %v3051_v62  ;;  %3636 = vmatmul.bf16.vlgmr.msrb.gmra.mxu1 %v3052_v16 }
 0x2bb   :  { %3649 = vmatmul.bf16.vlgmr.msra.gmra.mxu2 %v3053_v4  ;;  %3662 = vmatmul.bf16.vlgmr.msra.gmra.mxu3 %v3054_v12 }
 0x2bc   :  { %3979 = vmatpush.bf16.msrb.mxu1 %v6258_v48 }
 0x2bd   :  { %3737 = vmatpush.bf16.msra.mxu0 %v6245_v13 }
 0x2c0   :  { %3980 = vmatpush.bf16.msrb.mxu1 %v6257_v52 }
 0x2c4   :  { %3981 = vmatpush.bf16.msrb.mxu1 %v6256_v54 }
 0x2c8   :  { %3982 = vmatpush.bf16.msrb.mxu1 %v6255_v53 }
 0x2ca   :  { %5749 = vmatmul.msk.bf16.vlgmr.msra.gmra.mxu0 %vm2652_vm4, %v3697_v18 }
 0x2cc   :  { %3983 = vmatpush.bf16.msrb.mxu1 %v6254_v24 }
 0x2d0   :  { %3984 = vmatpush.bf16.msrb.mxu1 %v6253_v44 }
 0x2d4   :  { %3985 = vmatpush.bf16.msrb.mxu1 %v6252_v60 }
 0x2d8   :  { %3986 = vmatpush.bf16.msrb.mxu1 %v6251_v1 }
 0x310   :  { %v3795_v15 = vpop.permute.xlu1 %3794 }
 0x313   :  { %v3675_v57 = vpop.xlane.xlu0 %3674 }
 0x31d   :  { %v3546_v56 = vpop.f32.mrf.mxu2  ;;  %v3559_v20 = vpop.f32.mrf.mxu3 }
 0x31e   :  { %v3547_v21 = vadd.f32 %v6284_v19, %v3546_v56  ;;  %v3669_v19 = vld [vmem:[%s8460_s1 + $0x10] sm:$0xff]  ;;  %v6266_v56 = vld [vmem:[%s8463_s4 + $0x78] sm:$0xff] }
 0x31f   :  { %3802 = vrot.lane.b32.xlu0 %v3669_v19, %s6302_s30  ;;  %3992 = vmatpush.bf16.msrb.mxu0 %v6266_v56  ;;  %v6271_v19 = vld [vmem:[%s8464_s5] sm:$0xff] }
 0x320   :  { %v3560_v22 = vadd.f32 %v3559_v20, %v3547_v21  ;;  %v6270_v20 = vld [vmem:[%s8463_s4 + $0x98] sm:$0xff]  ;;  %v6265_v21 = vld [vmem:[%s8463_s4 + $0x70] sm:$0xff] }
 0x321   :  { %4009 = vmatpush.bf16.msrb.mxu2 %v6270_v20 }
 0x323   :  { %3993 = vmatpush.bf16.msrb.mxu0 %v6265_v21 }
 0x325   :  { %v3548_v23 = vpop.f32.mrf.mxu2  ;;  %v3561_v25 = vpop.f32.mrf.mxu3 }
 0x326   :  { %v6264_v23 = vld [vmem:[%s8463_s4 + $0x68] sm:$0xff] }
 0x327   :  { %v3572_v26 = vpop.f32.mrf.mxu0  ;;  %v3585_v27 = vpop.f32.mrf.mxu1  ;;  %v6268_v25 = vld [vmem:[%s8463_s4 + $0x88] sm:$0xff]  ;;  %3994 = vmatpush.bf16.msrb.mxu0 %v6264_v23 }
 0x328   :  { %v3573_v28 = vadd.f32 %v3572_v26, %v3560_v22  ;;  %v6269_v22 = vld [vmem:[%s8463_s4 + $0x90] sm:$0xff] }
 0x329   :  { %4010 = vmatpush.bf16.msrb.mxu2 %v6269_v22 }
 0x32a   :  { %v3586_v29 = vadd.f32 %v3585_v27, %v3573_v28  ;;  %v6263_v27 = vld [vmem:[%s8463_s4 + $0x60] sm:$0xff]  ;;  %v3756_v28 = vmul.f32 %v8259_v2, %v8269_v36  ;;  %v6261_v2 = vld [vmem:[%s8463_s4 + $0x50] sm:$0xff]  ;;  %v6260_v36 = vld [vmem:[%s8463_s4 + $0x48] sm:$0xff] }
 0x32b   :  { %3995 = vmatpush.bf16.msrb.mxu0 %v6263_v27 }
 0x32d   :  { %4011 = vmatpush.bf16.msrb.mxu2 %v6268_v25 }
 0x32e   :  { %v3598_v31 = vpop.f32.mrf.mxu2  ;;  %v3611_v32 = vpop.f32.mrf.mxu3 }
 0x32f   :  { %v3599_v35 = vadd.f32 %v3598_v31, %v3586_v29  ;;  %v3574_v37 = vpop.f32.mrf.mxu0  ;;  %v3587_v61 = vpop.f32.mrf.mxu1 }
 0x330   :  { %v6262_v61 = vld [vmem:[%s8463_s4 + $0x58] sm:$0xff] }
 0x331   :  { %v3612_v38 = vadd.f32 %v3611_v32, %v3599_v35  ;;  %3996 = vmatpush.bf16.msrb.mxu0 %v6262_v61 }
 0x335   :  { %3997 = vmatpush.bf16.msrb.mxu0 %v6261_v2 }
 0x336   :  { %v3600_v39 = vpop.f32.mrf.mxu2  ;;  %v3613_v40 = vpop.f32.mrf.mxu3 }
 0x337   :  { %v3624_v41 = vpop.f32.mrf.mxu0  ;;  %v3637_v34 = vpop.f32.mrf.mxu1 }
 0x338   :  { %v3625_v42 = vadd.f32 %v3624_v41, %v3612_v38  ;;  %v6267_v38 = vld [vmem:[%s8463_s4 + $0x80] sm:$0xff] }
 0x339   :  { %4012 = vmatpush.bf16.msrb.mxu2 %v6267_v38  ;;  %3998 = vmatpush.bf16.msrb.mxu0 %v6260_v36  ;;  %v6259_v41 = vld [vmem:[%s8463_s4 + $0x40] sm:$0xff] }
 0x33a   :  { %v3638_v43 = vadd.f32 %v3637_v34, %v3625_v42  ;;  %v6287_v36 = vld [vmem:[%s8457_s10 + $0x6] ss:$0 sm:$0xff] }
 0x33d   :  { %3999 = vmatpush.bf16.msrb.mxu0 %v6259_v41 }
 0x33e   :  { %v3650_v45 = vpop.f32.mrf.mxu2  ;;  %v3663_v46 = vpop.f32.mrf.mxu3 }
 0x33f   :  { %v3626_v10 = vpop.f32.mrf.mxu0  ;;  %v3639_v30 = vpop.f32.mrf.mxu1  ;;  %v3651_v13 = vadd.f32 %v3650_v45, %v3638_v43 }
 0x340   :  { %v6304_v30 = vmov 8.0  }
 0x341   :  { %v3664_v14 = vadd.f32 %v3663_v46, %v3651_v13 }
 0x343   :  { %v3805_v17 = vsel %vm2652_vm4, %v3664_v14, %v3795_v15 }
 0x344   :  { %v3850_v18 = vpack.c.bf16 %v3805_v17, %v3805_v17 }
 0x346   :  { %v3652_v49 = vpop.f32.mrf.mxu2  ;;  %v3665_v50 = vpop.f32.mrf.mxu3 }
 0x347   :  { %v3739_v51 = vpop.f32.mrf.mxu0 }
 0x34f   :  { %v3741_v55 = vpop.f32.mrf.mxu0 }
 0x350   :  { %v3744_v58 = vadd.f32 %v3741_v55, %v3739_v51 }
 0x352   :  { %v3745_v59 = vmul.f32 %v3744_v58, %v3675_v57 }
 0x354   :  { %6293 = vrsqrt.f32 %v3745_v59  ;;  %vm3752_vm8 = vweird.f32 %v3745_v59 }
 0x355   :  { %6295 = vrcp.f32 %v6304_v30 }
 0x35a   :  { %v6294_v63 = vpop.eup %6293 }
 0x35b   :  { %v3747_v0 = vmul.f32 %v6294_v63, %v3745_v59  ;;  %vm3753_vm7 = vweird.f32 %v6294_v63  ;;  %v6296_v48 = vpop.eup %6295 }
 0x35c   :  { %vm3754_vm9 = vmor %vm3752_vm8, %vm3753_vm7  ;;  %v4029_v50 = vmul.f32 8.0, %v6296_v48  ;;  %vm4033_vm14 = vweird.f32 %v6296_v48 }
 0x35d   :  { %v3748_v33 = vmul.f32 %v6294_v63, %v3747_v0 }
 0x35e   :  { %v4030_v55 = vsub.f32 1.0, %v4029_v50 }
 0x35f   :  { %v3749_v3 = vmul.f32 0.5, %v3748_v33 }
 0x360   :  { %v4031_v58 = vmul.f32 %v6296_v48, %v4030_v55 }
 0x361   :  { %v3750_v5 = vsub.f32 1.5, %v3749_v3  ;;  %v6276_v3 = vld [vmem:[%s8464_s5 + $0x28] sm:$0xff] }
 0x362   :  { %v4032_v60 = vadd.f32 %v6296_v48, %v4031_v58  ;;  %4120 = vmatpush.bf16.msrb.mxu3 %v6276_v3 }
 0x363   :  { %v3751_v6 = vmul.f32 %v6294_v63, %v3750_v5 }
 0x364   :  { %v8391_v33 = vsel %vm4033_vm14, %v6296_v48, %v4032_v60 }
 0x365   :  { %v3755_v7 = vsel %vm3754_vm9, %v6294_v63, %v3751_v6 }
 0x366   :  { %v3759_v8 = vpack.c.bf16 %v3755_v7, %v3755_v7 }
 0x368   :  { %v3760_v9 = vunpack.c.l.bf16 %v3759_v8 }
 0x36a   :  { %v3761_v11 = vsub.f32 %v3755_v7, %v3760_v9  ;;  %v6275_v7 = vld [vmem:[%s8464_s5 + $0x20] sm:$0xff] }
 0x36b   :  { %4121 = vmatpush.bf16.msrb.mxu3 %v6275_v7 }
 0x36c   :  { %v3762_v62 = vpack.c.bf16 %v3761_v11, %v3761_v11 }
 0x36e   :  { %v3764_v16 = vunpack.c.l.b16 %v3762_v62  ;;  %v6274_v62 = vld [vmem:[%s8464_s5 + $0x18] sm:$0xff] }
 0x36f   :  { %4122 = vmatpush.bf16.msrb.mxu3 %v6274_v62 }
 0x370   :  { %v3765_v4 = vpack.c.b16 %v3764_v16, %v3764_v16 }
 0x372   :  { %v3768_v12 = vsel %vm3694_vm6, %v3759_v8, %v3765_v4  ;;  %vm4233_vm6 = vcmask 31744  }
 0x373   :  { %5754 = vmatmul.msk.bf16.vlgmr.msra.gmra.mxu1 %vm3672_vm5, %v3768_v12  ;;  %v6273_v12 = vld [vmem:[%s8464_s5 + $0x10] sm:$0xff] }
 0x374   :  { %4123 = vmatpush.bf16.msrb.mxu3 %v6273_v12 }
 0x383   :  { %3987 = vmatmul.bf16.vlgmr.msrb.gmra.mxu1 %v3850_v18 }
 0x391   :  { %v3803_v39 = vpop.permute.xlu0 %3802 }
 0x392   :  { %v3852_v40 = vpack.c.bf16 %v3803_v39, %v3803_v39 }
 0x394   :  { %5835 = vmatmul.msk.bf16.vlgmr.msrb.gmra.mxu2 %vm3975_vm10, %v3852_v40 }
 0x3f0   :  { %v3786_v26 = vpop.f32.mrf.mxu1 }
 0x3f8   :  { %v3788_v29 = vpop.f32.mrf.mxu1 }
 0x3f9   :  { %v3791_v31 = vadd.f32 %v3788_v29, %v3786_v26  ;;  %v4018_v26 = vld [vmem:[%s8457_s10 + $0x4] sm:$0x1] }
 0x3fb   :  { %v3792_v32 = vmul.f32 %v3791_v31, %v3756_v28 }
 0x3fd   :  { %3798 = vrot.lane.b32.xlu1 %v3792_v32, %s6303_s9  ;;  %v6286_v32 = vld [vmem:[%s8457_s10 + $0x5] ss:$0 sm:$0xff] }
 0x400   :  { %v3988_v35 = vpop.f32.mrf.mxu1 }
 0x401   :  { %v3989_v49 = vadd.f32 %v6285_v47, %v3988_v35 }
 0x408   :  { %v3990_v37 = vpop.f32.mrf.mxu1 }
 0x417   :  { %v4014_v46 = vpop.f32.mrf.mxu2 }
 0x41f   :  { %v4016_v10 = vpop.f32.mrf.mxu2 }
 0x46f   :  { %v3799_v34 = vpop.permute.xlu1 %3798 }
 0x470   :  { %v3807_v42 = vsel %vm3806_vm11, %v3795_v15, %v3799_v34  ;;  %v6272_v15 = vld [vmem:[%s8464_s5 + $0x8] sm:$0xff] }
 0x471   :  { %v3809_v43 = vsel %vm3808_vm12, %v3807_v42, %v3803_v39  ;;  %4124 = vmatpush.bf16.msrb.mxu3 %v6272_v15 }
 0x472   :  { %v3851_v45 = vpack.c.bf16 %v3809_v43, %v3809_v43 }
 0x474   :  { %4000 = vmatmul.bf16.vlgmr.msrb.gmra.mxu0 %v3851_v45 }
 0x475   :  { %4125 = vmatpush.bf16.msrb.mxu3 %v6271_v19 }
 0x4f1   :  { %v4001_v51 = vpop.f32.mrf.mxu0 }
 0x4f2   :  { %v4002_v52 = vadd.f32 %v4001_v51, %v3989_v49 }
 0x4f4   :  { %v4015_v54 = vadd.f32 %v4014_v46, %v4002_v52 }
 0x4f6   :  { %v4021_v57 = vsel %vm4020_vm13, %v4015_v54, 0.0 }
 0x4f7   :  { %v4022_v53 = vrot.slane %v4021_v57, 4 }
 0x4f9   :  { %v4023_v59 = vadd.f32 %v4022_v53, %v4021_v57  ;;  %v4003_v24 = vpop.f32.mrf.mxu0  ;;  %v6278_v53 = vld [vmem:[%s8464_s5 + $0x38] sm:$0xff] }
 0x4fa   :  { %4197 = vmatpush.bf16.msra.mxu2 %v6278_v53  ;;  %v6277_v24 = vld [vmem:[%s8464_s5 + $0x30] sm:$0xff] }
 0x4fb   :  { %v4024_v44 = vrot.slane %v4023_v59, 2 }
 0x4fd   :  { %v4025_v63 = vadd.f32 %v4024_v44, %v4023_v59 }
 0x4fe   :  { %4198 = vmatpush.bf16.msra.mxu2 %v6277_v24 }
 0x4ff   :  { %v4026_v0 = vrot.slane %v4025_v63, 1 }
 0x501   :  { %v4027_v1 = vadd.f32 %v4026_v0, %v4025_v63  ;;  %v6279_v63 = vld [vmem:[%s8464_s5 + $0x40] sm:$0xff] }
 0x502   :  { %4227 = vmatpush.bf16.msra.mxu3 %v6279_v63 }
 0x503   :  { %v4035_v5 = vmul.f32 %v8391_v33, %v4027_v1 }
 0x505   :  { %v4036_v6 = vsub.f32 %v4015_v54, %v4035_v5 }
 0x507   :  { %v4037_v8 = vmul.f32 %v4036_v6, %v4036_v6 }
 0x509   :  { %v4038_v9 = vsel %vm4020_vm13, %v4037_v8, 0.0  ;;  %v4133_v8 = vld [vmem:[%s8457_s10 + $0x7] sm:$0x1] }
 0x50a   :  { %v4039_v11 = vrot.slane %v4038_v9, 4 }
 0x50c   :  { %v4040_v16 = vadd.f32 %v4039_v11, %v4038_v9 }
 0x50e   :  { %v4041_v4 = vrot.slane %v4040_v16, 2 }
 0x510   :  { %v4042_v13 = vadd.f32 %v4041_v4, %v4040_v16  ;;  %v6288_v16 = vld [vmem:[%s8457_s10 + $0x8] ss:$0 sm:$0xff] }
 0x512   :  { %v4043_v14 = vrot.slane %v4042_v13, 1 }
 0x514   :  { %v4044_v17 = vadd.f32 %v4043_v14, %v4042_v13  ;;  %v6289_v14 = vld [vmem:[%s8457_s10 + $0x9] ss:$0 sm:$0xff] }
 0x516   :  { %v4045_v18 = vmul.f32 %v4044_v17, %v8391_v33 }
 0x518   :  { %v4046_v56 = vadd.f32 1e-05, %v4045_v18 }
 0x51a   :  { %6297 = vrsqrt.f32 %v4046_v56  ;;  %vm4053_vm0 = vweird.f32 %v4046_v56 }
 0x520   :  { %v6298_v20 = vpop.eup %6297 }
 0x521   :  { %v4048_v21 = vmul.f32 %v6298_v20, %v4046_v56  ;;  %vm4054_vm15 = vweird.f32 %v6298_v20 }
 0x522   :  { %vm4055_vm1 = vmor %vm4053_vm0, %vm4054_vm15 }
 0x523   :  { %v4049_v22 = vmul.f32 %v6298_v20, %v4048_v21  ;;  %v6290_v21 = vld [vmem:[%s8457_s10 + $0xa] ss:$0 sm:$0xff] }
 0x525   :  { %v4050_v23 = vmul.f32 0.5, %v4049_v22 }
 0x527   :  { %v4051_v25 = vsub.f32 1.5, %v4050_v23 }
 0x529   :  { %v4052_v27 = vmul.f32 %v6298_v20, %v4051_v25 }
 0x52b   :  { %v4056_v28 = vsel %vm4055_vm1, %v6298_v20, %v4052_v27 }
 0x52c   :  { %v4057_v29 = vmul.f32 %v4056_v28, %v4018_v26 }
 0x52e   :  { %v4058_v31 = vperm.slane %v4057_v29, 0 }
 0x530   :  { %v4059_v35 = vmul.f32 %v4058_v31, %v4036_v6 }
 0x532   :  { %v4061_v37 = vadd.f32 %v6286_v32, %v4059_v35 }
 0x534   :  { %v4062_v61 = vmul.f32 0.01, %v4061_v37 }
 0x536   :  { %v4063_v38 = vmax.f32 %v4061_v37, %v4062_v61 }
 0x538   :  { %v4076_v2 = vpack.c.bf16 %v4063_v38, %v4063_v38 }
 0x53a   :  { %5860 = vmatmul.msk.bf16.vlgmr.msrb.gmra.mxu3 %vm4020_vm13, %v4076_v2 }
 0x5bd   :  { %v4127_v39 = vpop.f32.mrf.mxu3 }
 0x5be   :  { %v4128_v40 = vadd.f32 %v6287_v36, %v4127_v39 }
 0x5c0   :  { %v4131_v41 = vmul.f32 0.01, %v4128_v40 }
 0x5c2   :  { %v4132_v34 = vmax.f32 %v4128_v40, %v4131_v41 }
 0x5c4   :  { %v4135_v42 = vsel %vm3806_vm11, %v4132_v34, 0.0 }
 0x5c5   :  { %v4136_v43 = vrot.slane %v4135_v42, 4  ;;  %v4129_v45 = vpop.f32.mrf.mxu3 }
 0x5c7   :  { %v4137_v46 = vadd.f32 %v4136_v43, %v4135_v42 }
 0x5c9   :  { %v4138_v10 = vrot.slane %v4137_v46, 2 }
 0x5cb   :  { %v4139_v30 = vadd.f32 %v4138_v10, %v4137_v46 }
 0x5cd   :  { %v4140_v47 = vrot.slane %v4139_v30, 1 }
 0x5cf   :  { %v4141_v48 = vadd.f32 %v4140_v47, %v4139_v30 }
 0x5d1   :  { %v4142_v49 = vmul.f32 %v4141_v48, %v8391_v33 }
 0x5d3   :  { %v4143_v50 = vsub.f32 %v4132_v34, %v4142_v49 }
 0x5d5   :  { %v4144_v51 = vmul.f32 %v4143_v50, %v4143_v50 }
 0x5d7   :  { %v4145_v52 = vsel %vm3806_vm11, %v4144_v51, 0.0 }
 0x5d8   :  { %v4146_v54 = vrot.slane %v4145_v52, 4 }
 0x5da   :  { %v4147_v55 = vadd.f32 %v4146_v54, %v4145_v52 }
 0x5dc   :  { %v4148_v57 = vrot.slane %v4147_v55, 2 }
 0x5de   :  { %v4149_v58 = vadd.f32 %v4148_v57, %v4147_v55 }
 0x5e0   :  { %v4150_v59 = vrot.slane %v4149_v58, 1 }
 0x5e2   :  { %v4151_v44 = vadd.f32 %v4150_v59, %v4149_v58 }
 0x5e4   :  { %v4152_v60 = vmul.f32 %v4151_v44, %v8391_v33 }
 0x5e6   :  { %v4153_v0 = vadd.f32 1e-05, %v4152_v60 }
 0x5e8   :  { %6299 = vrsqrt.f32 %v4153_v0  ;;  %vm4160_vm3 = vweird.f32 %v4153_v0 }
 0x5ee   :  { %v6300_v1 = vpop.eup %6299 }
 0x5ef   :  { %v4155_v3 = vmul.f32 %v6300_v1, %v4153_v0  ;;  %vm4161_vm2 = vweird.f32 %v6300_v1 }
 0x5f0   :  { %vm4162_vm4 = vmor %vm4160_vm3, %vm4161_vm2 }
 0x5f1   :  { %v4156_v5 = vmul.f32 %v6300_v1, %v4155_v3 }
 0x5f3   :  { %v4157_v6 = vmul.f32 0.5, %v4156_v5 }
 0x5f5   :  { %v4158_v7 = vsub.f32 1.5, %v4157_v6 }
 0x5f7   :  { %v4159_v9 = vmul.f32 %v6300_v1, %v4158_v7 }
 0x5f9   :  { %v4163_v33 = vsel %vm4162_vm4, %v6300_v1, %v4159_v9 }
 0x5fa   :  { %v4164_v11 = vmul.f32 %v4163_v33, %v4133_v8 }
 0x5fc   :  { %v4165_v62 = vperm.slane %v4164_v11, 0 }
 0x5fe   :  { %v4166_v4 = vmul.f32 %v4165_v62, %v4143_v50 }
 0x600   :  { %v4168_v12 = vadd.f32 %v6288_v16, %v4166_v4 }
 0x602   :  { %v4173_v13 = vpack.c.bf16 %v4168_v12, %v4168_v12 }
 0x604   :  { %5869 = vmatmul.msk.bf16.vlgmr.msra.gmra.mxu2 %vm3806_vm11, %v4173_v13 }
 0x687   :  { %v4200_v15 = vpop.f32.mrf.mxu2 }
 0x688   :  { %v4201_v17 = vadd.f32 %v6289_v14, %v4200_v15 }
 0x68a   :  { %v4204_v18 = vmul.f32 0.01, %v4201_v17 }
 0x68c   :  { %v4205_v19 = vmax.f32 %v4201_v17, %v4204_v18 }
 0x68e   :  { %v4208_v56 = vpack.c.bf16 %v4205_v19, %v4205_v19 }
 0x68f   :  { %v4202_v20 = vpop.f32.mrf.mxu2 }
 0x690   :  { %5874 = vmatmul.msk.bf16.vlgmr.msra.gmra.mxu3 %vm3672_vm5, %v4208_v56 }
 0x713   :  { %v4229_v22 = vpop.f32.mrf.mxu3 }
 0x714   :  { %v4230_v23 = vadd.f32 %v6290_v21, %v4229_v22 }
 0x716   :  { %4234 = vst.msk [vmem:[%s8465_s11] sm:$0xff] %vm4233_vm6, %v4230_v23 }
 0x71b   :  { %v4231_v25 = vpop.f32.mrf.mxu3 }

</bundles_post_ra>
